<compile_context>
chip_gen: v6e
topology: v6e:2x2x1
jax: 0.10.0
libtpu: 0.0.40
codegen_flags: <defaults>
</compile_context>

<pallas_src>
import math

import jax
import jax.numpy as jnp
from jax import lax
from jax.experimental import pallas as pl
from jax.experimental.pallas import tpu as pltpu

_EPS = 1e-5     # torch InstanceNorm{1,2}d default eps
_SLOPE = 0.2    # LeakyReLU negative slope


def _leaky(x):
    return jnp.where(x >= 0, x, _SLOPE * x)


# ------------------------------ fused kernel --------------------------------

def _make_fused_kernel(layer_dims, X, Y, T):
    """Build the fused per-batch kernel.

    layer_dims: tuple of (cin, cout) per conv layer.
    Layout inside the kernel: each channel is a (T, X*Y) f32 slab with the
    flattened spatial axis on lanes (lane-dense).
    """
    N = X * Y
    n_layers = len(layer_dims)

    def kernel(x_ref, *args):
        o_ref = args[-1]
        w_refs = args[:-1]

        # Index slabs, hoisted (computed once per grid step, reused by masks).
        lane = lax.broadcasted_iota(jnp.int32, (T, N), 1)   # flattened x*Y+y
        row = lax.broadcasted_iota(jnp.int32, (T, N), 0)    # time index
        if Y & (Y - 1) == 0:
            yid = jnp.bitwise_and(lane, Y - 1)               # y index (pow-2 Y)
        else:
            yid = lane % Y                                   # general fallback

        def lane_roll(v, s):
            # result[..., i] = v[..., (i + s) % N]
            s = s % N
            return v if s == 0 else pltpu.roll(v, (N - s) % N, axis=1)

        def y_shift(v, dy):
            # result[t, (x, y)] = v[t, (x, y + dy)], zero padded in y.
            if dy == 0:
                return v
            r = lane_roll(v, dy)
            if dy > 0:
                return jnp.where(yid < Y - dy, r, 0.0)
            return jnp.where(yid >= -dy, r, 0.0)

        def x_shift(v, dx):
            # result[t, (x, y)] = v[t, (x + dx, y)], zero padded in x.
            if dx == 0:
                return v
            r = lane_roll(v, dx * Y)
            if dx > 0:
                return jnp.where(lane < (X - dx) * Y, r, 0.0)
            return jnp.where(lane >= (-dx) * Y, r, 0.0)

        def t_shift(v, dt):
            # result[t, :] = v[t + dt, :], zero padded in t (sublane roll).
            if dt == 0:
                return v
            r = pltpu.roll(v, (T - (dt % T)) % T, axis=0)
            if dt > 0:
                return jnp.where(row < T - dt, r, 0.0)
            return jnp.where(row >= -dt, r, 0.0)

        def spatial_layer(chs, w_ref, cin, cout):
            # Conv2d 3x3 (pad=1, no bias) + InstanceNorm2d + LeakyReLU(0.2).
            # y-shifted slabs built once per (ci, ky), reused for all (co, kx);
            # the kx (x-direction) shift is applied to the per-co inner sums.
            ysl = [[y_shift(chs[ci], ky - 1) for ky in range(3)]
                   for ci in range(cin)]
            accs = [None] * cout
            for kx in range(3):
                for co in range(cout):
                    inner = None
                    for ci in range(cin):
                        for ky in range(3):
                            w = w_ref[((co * cin + ci) * 3 + kx) * 3 + ky]
                            term = w * ysl[ci][ky]
                            inner = term if inner is None else inner + term
                    sh = x_shift(inner, kx - 1)
                    accs[co] = sh if accs[co] is None else accs[co] + sh
            out = []
            for co in range(cout):
                a = accs[co]
                mean = jnp.mean(a, axis=1, keepdims=True)   # per (t, co) over X*Y
                d = a - mean
                var = jnp.mean(d * d, axis=1, keepdims=True)
                out.append(_leaky(d * lax.rsqrt(var + _EPS)))
            return out

        def temporal_layer(chs, w_ref, c, res=None):
            # Conv1d k=3 (pad=1, no bias) + InstanceNorm1d + LeakyReLU(0.2),
            # optional fused residual add.
            taps = [(t_shift(chs[ci], -1), chs[ci], t_shift(chs[ci], 1))
                    for ci in range(c)]
            out = []
            for co in range(c):
                acc = None
                for ci in range(c):
                    for k in range(3):
                        w = w_ref[(co * c + ci) * 3 + k]
                        term = w * taps[ci][k]
                        acc = term if acc is None else acc + term
                mean = jnp.mean(acc, axis=0, keepdims=True)  # per (x*y, co) over T
                d = acc - mean
                var = jnp.mean(d * d, axis=0, keepdims=True)
                y = _leaky(d * lax.rsqrt(var + _EPS))
                if res is not None:
                    y = y + res[co]                          # fused residual add
                out.append(y)
            return out

        def sta_gate(chs, sp_ref, tm_ref):
            # SpatiotemporalAttention: 7x7 spatial conv on [avg, max] -> sigmoid,
            # k=3 temporal conv -> sigmoid, gate applied to every channel.
            c = len(chs)
            s = chs[0]
            m = chs[0]
            for ci in range(1, c):
                s = s + chs[ci]
                m = jnp.maximum(m, chs[ci])
            feats = (s * (1.0 / c), m)            # torch.cat([avg, max]) order
            ysl = [[y_shift(feats[ic], ky - 3) for ky in range(7)]
                   for ic in range(2)]
            acc = None
            for kx in range(7):
                inner = None
                for ic in range(2):
                    for ky in range(7):
                        w = sp_ref[(ic * 7 + kx) * 7 + ky]
                        term = w * ysl[ic][ky]
                        inner = term if inner is None else inner + term
                sh = x_shift(inner, kx - 3)
                acc = sh if acc is None else acc + sh
            attn = jax.nn.sigmoid(acc + sp_ref[2 * 49])       # (T, N)
            g = jax.nn.sigmoid(tm_ref[0] * t_shift(attn, -1)
                               + tm_ref[1] * attn
                               + tm_ref[2] * t_shift(attn, 1)
                               + tm_ref[3])
            return [g * ch for ch in chs]

        c_in = x_ref.shape[1]
        chs = [x_ref[0, ci] for ci in range(c_in)]
        res = chs[:2]                                        # input_image[:, :2]

        wi = 0
        for li, (cin, cout) in enumerate(layer_dims):
            chs = spatial_layer(chs, w_refs[wi], cin, cout)
            fuse_res = (li == n_layers - 1) and (cout == len(res))
            chs = temporal_layer(chs, w_refs[wi + 1], cout,
                                 res=res if fuse_res else None)
            wi += 2
        if n_layers == 0:
            chs = [chs[i] + res[i] for i in range(len(chs))]

        gated = sta_gate(chs, w_refs[wi], w_refs[wi + 1])
        for ci, g in enumerate(gated):
            o_ref[0, ci] = g

    return kernel


# -------------------------------- wrapper ------------------------------------

def conv_block_sm2d_t_forward(params, image):
    x = image.astype(jnp.float32)
    B, C, T, X, Y = x.shape
    N = X * Y

    layer_dims = []
    operands = [x.reshape(B, C, T, N)]                 # lane-dense input layout
    in_specs = [pl.BlockSpec((1, C, T, N), lambda b: (b, 0, 0, 0))]
    smem = pl.BlockSpec(memory_space=pltpu.MemorySpace.SMEM)
    for layer in params["layers"]:
        w2d = layer["conv2d"]
        layer_dims.append((int(w2d.shape[1]), int(w2d.shape[0])))
        operands.append(w2d.reshape(-1).astype(jnp.float32))
        operands.append(layer["conv1d"].reshape(-1).astype(jnp.float32))
        in_specs += [smem, smem]
    operands.append(jnp.concatenate(
        [params["sta_spatial_w"].reshape(-1),
         params["sta_spatial_b"].reshape(-1)]).astype(jnp.float32))
    operands.append(jnp.concatenate(
        [params["sta_temporal_w"].reshape(-1),
         params["sta_temporal_b"].reshape(-1)]).astype(jnp.float32))
    in_specs += [smem, smem]

    c_out = layer_dims[-1][1] if layer_dims else C
    kernel = _make_fused_kernel(tuple(layer_dims), X, Y, T)

    out = pl.pallas_call(
        kernel,
        out_shape=jax.ShapeDtypeStruct((B, c_out, T, N), jnp.float32),
        grid=(B,),
        in_specs=in_specs,
        out_specs=pl.BlockSpec((1, c_out, T, N), lambda b: (b, 0, 0, 0)),
        compiler_params=pltpu.CompilerParams(
            dimension_semantics=("parallel",),       # batch -> 2 TCs on v7x
            vmem_limit_bytes=32 * 1024 * 1024,
        ),
    )(*operands)
    return out.reshape(B, c_out, T, X, Y)


# ------------------------------- parameters ----------------------------------

def init_params(key, in_chans=2, conv_num=2, out_chans=None, max_chans=None):
    out_chans = out_chans or in_chans
    max_chans = max_chans or in_chans
    keys = jax.random.split(key, 2 * conv_num + 4)
    ki = iter(keys)

    def uniform(k, shape, fan_in):
        bound = 1.0 / math.sqrt(fan_in)
        return jax.random.uniform(k, shape, jnp.float32, -bound, bound)

    layers = []
    for idx in range(conv_num):
        cin = in_chans if idx == 0 else max_chans
        cout = out_chans if idx == conv_num - 1 else max_chans
        layers.append({
            "conv2d": uniform(next(ki), (cout, cin, 3, 3), cin * 9),
            "conv1d": uniform(next(ki), (cout, cout, 3), cout * 3),
        })
    return {
        "layers": layers,
        "sta_spatial_w": uniform(next(ki), (1, 2, 7, 7), 2 * 49),
        "sta_spatial_b": uniform(next(ki), (1,), 2 * 49),
        "sta_temporal_w": uniform(next(ki), (1, 1, 3), 3),
        "sta_temporal_b": uniform(next(ki), (1,), 3),
    }


# ---------------------------- pure-JAX reference -----------------------------

def _instnorm(x, axes):
    mean = jnp.mean(x, axis=axes, keepdims=True)
    var = jnp.mean((x - mean) ** 2, axis=axes, keepdims=True)
    return (x - mean) / jnp.sqrt(var + _EPS)


def ref_forward(params, image):
    hp = lax.Precision.HIGHEST
    x = image.astype(jnp.float32)
    b, _, t, xs, ys = x.shape
    inp = x
    for layer in params["layers"]:
        c = x.shape[1]
        xi = x.transpose(0, 2, 1, 3, 4).reshape(b * t, c, xs, ys)
        y = lax.conv_general_dilated(xi, layer["conv2d"], (1, 1), [(1, 1), (1, 1)],
                                     dimension_numbers=("NCHW", "OIHW", "NCHW"),
                                     precision=hp)
        c = y.shape[1]
        y = _leaky(_instnorm(y, (2, 3)))
        x = y.reshape(b, t, c, xs, ys).transpose(0, 2, 1, 3, 4)
        xi = x.transpose(0, 3, 4, 1, 2).reshape(b * xs * ys, c, t)
        y = lax.conv_general_dilated(xi, layer["conv1d"], (1,), [(1, 1)],
                                     dimension_numbers=("NCH", "OIH", "NCH"),
                                     precision=hp)
        y = _leaky(_instnorm(y, (2,)))
        x = y.reshape(b, xs, ys, c, t).transpose(0, 3, 4, 1, 2)
    x = x + inp[:, :2]
    avg = jnp.mean(x, axis=1, keepdims=True)
    mx = jnp.max(x, axis=1, keepdims=True)
    cat = jnp.concatenate([avg, mx], axis=1)
    ci = cat.transpose(0, 2, 1, 3, 4).reshape(b * t, 2, xs, ys)
    a = lax.conv_general_dilated(ci, params["sta_spatial_w"], (1, 1),
                                 [(3, 3), (3, 3)],
                                 dimension_numbers=("NCHW", "OIHW", "NCHW"),
                                 precision=hp)
    a = jax.nn.sigmoid(a + params["sta_spatial_b"].reshape(1, 1, 1, 1))
    a = a.reshape(b, t, 1, xs, ys).transpose(0, 3, 4, 2, 1).reshape(b * xs * ys, 1, t)
    a = lax.conv_general_dilated(a, params["sta_temporal_w"], (1,), [(1, 1)],
                                 dimension_numbers=("NCH", "OIH", "NCH"),
                                 precision=hp)
    a = jax.nn.sigmoid(a + params["sta_temporal_b"].reshape(1, 1, 1))
    a = a.reshape(b, xs, ys, 1, t).transpose(0, 3, 4, 1, 2)
    return a * x


# ---------------------------------- main --------------------------------------

if __name__ == "__main__":
    # in_chans must be 2: SpatiotemporalAttention's spatial conv consumes the
    # 2-channel [avg, max] map and the residual slices input[:, :2].
    B, C, T, X, Y = 2, 2, 8, 16, 16
    CONV_NUM = 2

    root = jax.random.PRNGKey(0)
    k_img, k_par = jax.random.split(root)
    image = jax.random.normal(k_img, (B, C, T, X, Y), jnp.float32)
    params = init_params(k_par, in_chans=C, conv_num=CONV_NUM)

    fwd = jax.jit(conv_block_sm2d_t_forward)
    out = jax.block_until_ready(fwd(params, image))

    assert out.shape == (B, C, T, X, Y), out.shape
    assert bool(jnp.all(jnp.isfinite(out)))

    ref = jax.block_until_ready(ref_forward(params, image))
    max_err = float(jnp.max(jnp.abs(out - ref)))
    assert max_err < 2e-3, f"mismatch vs reference: {max_err}"

    print("KERNEL_OK")
</pallas_src>

<mosaic_0001>
module attributes {stable_mosaic.version = 11 : i64} {
  func.func @kernel(%arg0: i32, %arg1: memref<1x2x8x256xf32, #tpu.memory_space<vmem>>, %arg2: memref<36xf32, #tpu.memory_space<smem>>, %arg3: memref<12xf32, #tpu.memory_space<smem>>, %arg4: memref<36xf32, #tpu.memory_space<smem>>, %arg5: memref<12xf32, #tpu.memory_space<smem>>, %arg6: memref<99xf32, #tpu.memory_space<smem>>, %arg7: memref<4xf32, #tpu.memory_space<smem>>, %arg8: memref<1x2x8x256xf32, #tpu.memory_space<vmem>>) attributes {dimension_semantics = [#tpu.dimension_semantics<parallel>], iteration_bounds = array<i64: 2>, scalar_prefetch = 0 : i64, scratch_operands = 0 : i64, tpu.core_type = #tpu.core_type<tc>, window_params = [{transform_indices = @transform_0, window_bounds = array<i64: 1, 2, 8, 256>}, {transform_indices = @transform_1, window_bounds = array<i64: 36>}, {transform_indices = @transform_2, window_bounds = array<i64: 12>}, {transform_indices = @transform_3, window_bounds = array<i64: 36>}, {transform_indices = @transform_4, window_bounds = array<i64: 12>}, {transform_indices = @transform_5, window_bounds = array<i64: 99>}, {transform_indices = @transform_6, window_bounds = array<i64: 4>}, {transform_indices = @transform_7, window_bounds = array<i64: 1, 2, 8, 256>}]} {
    %0 = tpu.iota {dimensions = array<i32: 1>} : vector<8x256xi32>
    %1 = tpu.iota {dimensions = array<i32: 0>} : vector<8x256xi32>
    %c15_i32 = arith.constant 15 : i32
    %2 = vector.broadcast %c15_i32 : i32 to vector<8x256xi32>
    %3 = arith.andi %0, %2 : vector<8x256xi32>
    %c0 = arith.constant 0 : index
    %c0_0 = arith.constant 0 : index
    %c0_1 = arith.constant 0 : index
    %c0_2 = arith.constant 0 : index
    %4 = vector.load %arg1[%c0, %c0_0, %c0_1, %c0_2] : memref<1x2x8x256xf32, #tpu.memory_space<vmem>>, vector<1x1x8x256xf32>
    %5 = vector.shape_cast %4 : vector<1x1x8x256xf32> to vector<8x256xf32>
    %c0_3 = arith.constant 0 : index
    %c1 = arith.constant 1 : index
    %c0_4 = arith.constant 0 : index
    %c0_5 = arith.constant 0 : index
    %6 = vector.load %arg1[%c0_3, %c1, %c0_4, %c0_5] : memref<1x2x8x256xf32, #tpu.memory_space<vmem>>, vector<1x1x8x256xf32>
    %7 = vector.shape_cast %6 : vector<1x1x8x256xf32> to vector<8x256xf32>
    %c1_i32 = arith.constant 1 : i32
    %8 = tpu.dynamic_rotate %5 by %c1_i32 dim 1 : vector<8x256xf32>, i32 -> vector<8x256xf32>
    %c1_i32_6 = arith.constant 1 : i32
    %9 = vector.broadcast %c1_i32_6 : i32 to vector<8x256xi32>
    %10 = arith.cmpi sge, %3, %9 : vector<8x256xi32>
    %cst = arith.constant 0.000000e+00 : f32
    %11 = vector.broadcast %cst : f32 to vector<8x256xf32>
    %12 = arith.select %10, %8, %11 : vector<8x256xi1>, vector<8x256xf32>
    %c255_i32 = arith.constant 255 : i32
    %13 = tpu.dynamic_rotate %5 by %c255_i32 dim 1 : vector<8x256xf32>, i32 -> vector<8x256xf32>
    %c15_i32_7 = arith.constant 15 : i32
    %14 = vector.broadcast %c15_i32_7 : i32 to vector<8x256xi32>
    %15 = arith.cmpi slt, %3, %14 : vector<8x256xi32>
    %cst_8 = arith.constant 0.000000e+00 : f32
    %16 = vector.broadcast %cst_8 : f32 to vector<8x256xf32>
    %17 = arith.select %15, %13, %16 : vector<8x256xi1>, vector<8x256xf32>
    %c1_i32_9 = arith.constant 1 : i32
    %18 = tpu.dynamic_rotate %7 by %c1_i32_9 dim 1 : vector<8x256xf32>, i32 -> vector<8x256xf32>
    %c1_i32_10 = arith.constant 1 : i32
    %19 = vector.broadcast %c1_i32_10 : i32 to vector<8x256xi32>
    %20 = arith.cmpi sge, %3, %19 : vector<8x256xi32>
    %cst_11 = arith.constant 0.000000e+00 : f32
    %21 = vector.broadcast %cst_11 : f32 to vector<8x256xf32>
    %22 = arith.select %20, %18, %21 : vector<8x256xi1>, vector<8x256xf32>
    %c255_i32_12 = arith.constant 255 : i32
    %23 = tpu.dynamic_rotate %7 by %c255_i32_12 dim 1 : vector<8x256xf32>, i32 -> vector<8x256xf32>
    %c15_i32_13 = arith.constant 15 : i32
    %24 = vector.broadcast %c15_i32_13 : i32 to vector<8x256xi32>
    %25 = arith.cmpi slt, %3, %24 : vector<8x256xi32>
    %cst_14 = arith.constant 0.000000e+00 : f32
    %26 = vector.broadcast %cst_14 : f32 to vector<8x256xf32>
    %27 = arith.select %25, %23, %26 : vector<8x256xi1>, vector<8x256xf32>
    %c0_15 = arith.constant 0 : index
    %28 = memref.load %arg2[%c0_15] : memref<36xf32, #tpu.memory_space<smem>>
    %29 = vector.broadcast %28 : f32 to vector<8x256xf32>
    %30 = arith.mulf %29, %12 : vector<8x256xf32>
    %c1_16 = arith.constant 1 : index
    %31 = memref.load %arg2[%c1_16] : memref<36xf32, #tpu.memory_space<smem>>
    %32 = vector.broadcast %31 : f32 to vector<8x256xf32>
    %33 = arith.mulf %32, %5 : vector<8x256xf32>
    %34 = arith.addf %30, %33 : vector<8x256xf32>
    %c2 = arith.constant 2 : index
    %35 = memref.load %arg2[%c2] : memref<36xf32, #tpu.memory_space<smem>>
    %36 = vector.broadcast %35 : f32 to vector<8x256xf32>
    %37 = arith.mulf %36, %17 : vector<8x256xf32>
    %38 = arith.addf %34, %37 : vector<8x256xf32>
    %c9 = arith.constant 9 : index
    %39 = memref.load %arg2[%c9] : memref<36xf32, #tpu.memory_space<smem>>
    %40 = vector.broadcast %39 : f32 to vector<8x256xf32>
    %41 = arith.mulf %40, %22 : vector<8x256xf32>
    %42 = arith.addf %38, %41 : vector<8x256xf32>
    %c10 = arith.constant 10 : index
    %43 = memref.load %arg2[%c10] : memref<36xf32, #tpu.memory_space<smem>>
    %44 = vector.broadcast %43 : f32 to vector<8x256xf32>
    %45 = arith.mulf %44, %7 : vector<8x256xf32>
    %46 = arith.addf %42, %45 : vector<8x256xf32>
    %c11 = arith.constant 11 : index
    %47 = memref.load %arg2[%c11] : memref<36xf32, #tpu.memory_space<smem>>
    %48 = vector.broadcast %47 : f32 to vector<8x256xf32>
    %49 = arith.mulf %48, %27 : vector<8x256xf32>
    %50 = arith.addf %46, %49 : vector<8x256xf32>
    %c16_i32 = arith.constant 16 : i32
    %51 = tpu.dynamic_rotate %50 by %c16_i32 dim 1 : vector<8x256xf32>, i32 -> vector<8x256xf32>
    %c16_i32_17 = arith.constant 16 : i32
    %52 = vector.broadcast %c16_i32_17 : i32 to vector<8x256xi32>
    %53 = arith.cmpi sge, %0, %52 : vector<8x256xi32>
    %cst_18 = arith.constant 0.000000e+00 : f32
    %54 = vector.broadcast %cst_18 : f32 to vector<8x256xf32>
    %55 = arith.select %53, %51, %54 : vector<8x256xi1>, vector<8x256xf32>
    %c18 = arith.constant 18 : index
    %56 = memref.load %arg2[%c18] : memref<36xf32, #tpu.memory_space<smem>>
    %57 = vector.broadcast %56 : f32 to vector<8x256xf32>
    %58 = arith.mulf %57, %12 : vector<8x256xf32>
    %c19 = arith.constant 19 : index
    %59 = memref.load %arg2[%c19] : memref<36xf32, #tpu.memory_space<smem>>
    %60 = vector.broadcast %59 : f32 to vector<8x256xf32>
    %61 = arith.mulf %60, %5 : vector<8x256xf32>
    %62 = arith.addf %58, %61 : vector<8x256xf32>
    %c20 = arith.constant 20 : index
    %63 = memref.load %arg2[%c20] : memref<36xf32, #tpu.memory_space<smem>>
    %64 = vector.broadcast %63 : f32 to vector<8x256xf32>
    %65 = arith.mulf %64, %17 : vector<8x256xf32>
    %66 = arith.addf %62, %65 : vector<8x256xf32>
    %c27 = arith.constant 27 : index
    %67 = memref.load %arg2[%c27] : memref<36xf32, #tpu.memory_space<smem>>
    %68 = vector.broadcast %67 : f32 to vector<8x256xf32>
    %69 = arith.mulf %68, %22 : vector<8x256xf32>
    %70 = arith.addf %66, %69 : vector<8x256xf32>
    %c28 = arith.constant 28 : index
    %71 = memref.load %arg2[%c28] : memref<36xf32, #tpu.memory_space<smem>>
    %72 = vector.broadcast %71 : f32 to vector<8x256xf32>
    %73 = arith.mulf %72, %7 : vector<8x256xf32>
    %74 = arith.addf %70, %73 : vector<8x256xf32>
    %c29 = arith.constant 29 : index
    %75 = memref.load %arg2[%c29] : memref<36xf32, #tpu.memory_space<smem>>
    %76 = vector.broadcast %75 : f32 to vector<8x256xf32>
    %77 = arith.mulf %76, %27 : vector<8x256xf32>
    %78 = arith.addf %74, %77 : vector<8x256xf32>
    %c16_i32_19 = arith.constant 16 : i32
    %79 = tpu.dynamic_rotate %78 by %c16_i32_19 dim 1 : vector<8x256xf32>, i32 -> vector<8x256xf32>
    %c16_i32_20 = arith.constant 16 : i32
    %80 = vector.broadcast %c16_i32_20 : i32 to vector<8x256xi32>
    %81 = arith.cmpi sge, %0, %80 : vector<8x256xi32>
    %cst_21 = arith.constant 0.000000e+00 : f32
    %82 = vector.broadcast %cst_21 : f32 to vector<8x256xf32>
    %83 = arith.select %81, %79, %82 : vector<8x256xi1>, vector<8x256xf32>
    %c3 = arith.constant 3 : index
    %84 = memref.load %arg2[%c3] : memref<36xf32, #tpu.memory_space<smem>>
    %85 = vector.broadcast %84 : f32 to vector<8x256xf32>
    %86 = arith.mulf %85, %12 : vector<8x256xf32>
    %c4 = arith.constant 4 : index
    %87 = memref.load %arg2[%c4] : memref<36xf32, #tpu.memory_space<smem>>
    %88 = vector.broadcast %87 : f32 to vector<8x256xf32>
    %89 = arith.mulf %88, %5 : vector<8x256xf32>
    %90 = arith.addf %86, %89 : vector<8x256xf32>
    %c5 = arith.constant 5 : index
    %91 = memref.load %arg2[%c5] : memref<36xf32, #tpu.memory_space<smem>>
    %92 = vector.broadcast %91 : f32 to vector<8x256xf32>
    %93 = arith.mulf %92, %17 : vector<8x256xf32>
    %94 = arith.addf %90, %93 : vector<8x256xf32>
    %c12 = arith.constant 12 : index
    %95 = memref.load %arg2[%c12] : memref<36xf32, #tpu.memory_space<smem>>
    %96 = vector.broadcast %95 : f32 to vector<8x256xf32>
    %97 = arith.mulf %96, %22 : vector<8x256xf32>
    %98 = arith.addf %94, %97 : vector<8x256xf32>
    %c13 = arith.constant 13 : index
    %99 = memref.load %arg2[%c13] : memref<36xf32, #tpu.memory_space<smem>>
    %100 = vector.broadcast %99 : f32 to vector<8x256xf32>
    %101 = arith.mulf %100, %7 : vector<8x256xf32>
    %102 = arith.addf %98, %101 : vector<8x256xf32>
    %c14 = arith.constant 14 : index
    %103 = memref.load %arg2[%c14] : memref<36xf32, #tpu.memory_space<smem>>
    %104 = vector.broadcast %103 : f32 to vector<8x256xf32>
    %105 = arith.mulf %104, %27 : vector<8x256xf32>
    %106 = arith.addf %102, %105 : vector<8x256xf32>
    %107 = arith.addf %55, %106 : vector<8x256xf32>
    %c21 = arith.constant 21 : index
    %108 = memref.load %arg2[%c21] : memref<36xf32, #tpu.memory_space<smem>>
    %109 = vector.broadcast %108 : f32 to vector<8x256xf32>
    %110 = arith.mulf %109, %12 : vector<8x256xf32>
    %c22 = arith.constant 22 : index
    %111 = memref.load %arg2[%c22] : memref<36xf32, #tpu.memory_space<smem>>
    %112 = vector.broadcast %111 : f32 to vector<8x256xf32>
    %113 = arith.mulf %112, %5 : vector<8x256xf32>
    %114 = arith.addf %110, %113 : vector<8x256xf32>
    %c23 = arith.constant 23 : index
    %115 = memref.load %arg2[%c23] : memref<36xf32, #tpu.memory_space<smem>>
    %116 = vector.broadcast %115 : f32 to vector<8x256xf32>
    %117 = arith.mulf %116, %17 : vector<8x256xf32>
    %118 = arith.addf %114, %117 : vector<8x256xf32>
    %c30 = arith.constant 30 : index
    %119 = memref.load %arg2[%c30] : memref<36xf32, #tpu.memory_space<smem>>
    %120 = vector.broadcast %119 : f32 to vector<8x256xf32>
    %121 = arith.mulf %120, %22 : vector<8x256xf32>
    %122 = arith.addf %118, %121 : vector<8x256xf32>
    %c31 = arith.constant 31 : index
    %123 = memref.load %arg2[%c31] : memref<36xf32, #tpu.memory_space<smem>>
    %124 = vector.broadcast %123 : f32 to vector<8x256xf32>
    %125 = arith.mulf %124, %7 : vector<8x256xf32>
    %126 = arith.addf %122, %125 : vector<8x256xf32>
    %c32 = arith.constant 32 : index
    %127 = memref.load %arg2[%c32] : memref<36xf32, #tpu.memory_space<smem>>
    %128 = vector.broadcast %127 : f32 to vector<8x256xf32>
    %129 = arith.mulf %128, %27 : vector<8x256xf32>
    %130 = arith.addf %126, %129 : vector<8x256xf32>
    %131 = arith.addf %83, %130 : vector<8x256xf32>
    %c6 = arith.constant 6 : index
    %132 = memref.load %arg2[%c6] : memref<36xf32, #tpu.memory_space<smem>>
    %133 = vector.broadcast %132 : f32 to vector<8x256xf32>
    %134 = arith.mulf %133, %12 : vector<8x256xf32>
    %c7 = arith.constant 7 : index
    %135 = memref.load %arg2[%c7] : memref<36xf32, #tpu.memory_space<smem>>
    %136 = vector.broadcast %135 : f32 to vector<8x256xf32>
    %137 = arith.mulf %136, %5 : vector<8x256xf32>
    %138 = arith.addf %134, %137 : vector<8x256xf32>
    %c8 = arith.constant 8 : index
    %139 = memref.load %arg2[%c8] : memref<36xf32, #tpu.memory_space<smem>>
    %140 = vector.broadcast %139 : f32 to vector<8x256xf32>
    %141 = arith.mulf %140, %17 : vector<8x256xf32>
    %142 = arith.addf %138, %141 : vector<8x256xf32>
    %c15 = arith.constant 15 : index
    %143 = memref.load %arg2[%c15] : memref<36xf32, #tpu.memory_space<smem>>
    %144 = vector.broadcast %143 : f32 to vector<8x256xf32>
    %145 = arith.mulf %144, %22 : vector<8x256xf32>
    %146 = arith.addf %142, %145 : vector<8x256xf32>
    %c16 = arith.constant 16 : index
    %147 = memref.load %arg2[%c16] : memref<36xf32, #tpu.memory_space<smem>>
    %148 = vector.broadcast %147 : f32 to vector<8x256xf32>
    %149 = arith.mulf %148, %7 : vector<8x256xf32>
    %150 = arith.addf %146, %149 : vector<8x256xf32>
    %c17 = arith.constant 17 : index
    %151 = memref.load %arg2[%c17] : memref<36xf32, #tpu.memory_space<smem>>
    %152 = vector.broadcast %151 : f32 to vector<8x256xf32>
    %153 = arith.mulf %152, %27 : vector<8x256xf32>
    %154 = arith.addf %150, %153 : vector<8x256xf32>
    %c240_i32 = arith.constant 240 : i32
    %155 = tpu.dynamic_rotate %154 by %c240_i32 dim 1 : vector<8x256xf32>, i32 -> vector<8x256xf32>
    %c240_i32_22 = arith.constant 240 : i32
    %156 = vector.broadcast %c240_i32_22 : i32 to vector<8x256xi32>
    %157 = arith.cmpi slt, %0, %156 : vector<8x256xi32>
    %cst_23 = arith.constant 0.000000e+00 : f32
    %158 = vector.broadcast %cst_23 : f32 to vector<8x256xf32>
    %159 = arith.select %157, %155, %158 : vector<8x256xi1>, vector<8x256xf32>
    %160 = arith.addf %107, %159 : vector<8x256xf32>
    %c24 = arith.constant 24 : index
    %161 = memref.load %arg2[%c24] : memref<36xf32, #tpu.memory_space<smem>>
    %162 = vector.broadcast %161 : f32 to vector<8x256xf32>
    %163 = arith.mulf %162, %12 : vector<8x256xf32>
    %c25 = arith.constant 25 : index
    %164 = memref.load %arg2[%c25] : memref<36xf32, #tpu.memory_space<smem>>
    %165 = vector.broadcast %164 : f32 to vector<8x256xf32>
    %166 = arith.mulf %165, %5 : vector<8x256xf32>
    %167 = arith.addf %163, %166 : vector<8x256xf32>
    %c26 = arith.constant 26 : index
    %168 = memref.load %arg2[%c26] : memref<36xf32, #tpu.memory_space<smem>>
    %169 = vector.broadcast %168 : f32 to vector<8x256xf32>
    %170 = arith.mulf %169, %17 : vector<8x256xf32>
    %171 = arith.addf %167, %170 : vector<8x256xf32>
    %c33 = arith.constant 33 : index
    %172 = memref.load %arg2[%c33] : memref<36xf32, #tpu.memory_space<smem>>
    %173 = vector.broadcast %172 : f32 to vector<8x256xf32>
    %174 = arith.mulf %173, %22 : vector<8x256xf32>
    %175 = arith.addf %171, %174 : vector<8x256xf32>
    %c34 = arith.constant 34 : index
    %176 = memref.load %arg2[%c34] : memref<36xf32, #tpu.memory_space<smem>>
    %177 = vector.broadcast %176 : f32 to vector<8x256xf32>
    %178 = arith.mulf %177, %7 : vector<8x256xf32>
    %179 = arith.addf %175, %178 : vector<8x256xf32>
    %c35 = arith.constant 35 : index
    %180 = memref.load %arg2[%c35] : memref<36xf32, #tpu.memory_space<smem>>
    %181 = vector.broadcast %180 : f32 to vector<8x256xf32>
    %182 = arith.mulf %181, %27 : vector<8x256xf32>
    %183 = arith.addf %179, %182 : vector<8x256xf32>
    %c240_i32_24 = arith.constant 240 : i32
    %184 = tpu.dynamic_rotate %183 by %c240_i32_24 dim 1 : vector<8x256xf32>, i32 -> vector<8x256xf32>
    %c240_i32_25 = arith.constant 240 : i32
    %185 = vector.broadcast %c240_i32_25 : i32 to vector<8x256xi32>
    %186 = arith.cmpi slt, %0, %185 : vector<8x256xi32>
    %cst_26 = arith.constant 0.000000e+00 : f32
    %187 = vector.broadcast %cst_26 : f32 to vector<8x256xf32>
    %188 = arith.select %186, %184, %187 : vector<8x256xi1>, vector<8x256xf32>
    %189 = arith.addf %131, %188 : vector<8x256xf32>
    %cst_27 = arith.constant dense<0.000000e+00> : vector<8xf32>
    %190 = vector.multi_reduction <add>, %160, %cst_27 [1] : vector<8x256xf32> to vector<8xf32>
    %191 = vector.shape_cast %190 : vector<8xf32> to vector<8x1xf32>
    %cst_28 = arith.constant 2.560000e+02 : f32
    %192 = vector.broadcast %cst_28 : f32 to vector<8x1xf32>
    %193 = arith.divf %191, %192 : vector<8x1xf32>
    %194 = vector.broadcast %193 : vector<8x1xf32> to vector<8x256xf32>
    %195 = arith.subf %160, %194 : vector<8x256xf32>
    %196 = arith.mulf %195, %195 : vector<8x256xf32>
    %cst_29 = arith.constant dense<0.000000e+00> : vector<8xf32>
    %197 = vector.multi_reduction <add>, %196, %cst_29 [1] : vector<8x256xf32> to vector<8xf32>
    %198 = vector.shape_cast %197 : vector<8xf32> to vector<8x1xf32>
    %cst_30 = arith.constant 2.560000e+02 : f32
    %199 = vector.broadcast %cst_30 : f32 to vector<8x1xf32>
    %200 = arith.divf %198, %199 : vector<8x1xf32>
    %cst_31 = arith.constant 9.99999974E-6 : f32
    %201 = vector.broadcast %cst_31 : f32 to vector<8x1xf32>
    %202 = arith.addf %200, %201 : vector<8x1xf32>
    %203 = math.rsqrt %202 : vector<8x1xf32>
    %204 = vector.broadcast %203 : vector<8x1xf32> to vector<8x256xf32>
    %205 = arith.mulf %195, %204 : vector<8x256xf32>
    %cst_32 = arith.constant 0.000000e+00 : f32
    %206 = vector.broadcast %cst_32 : f32 to vector<8x256xf32>
    %207 = arith.cmpf oge, %205, %206 : vector<8x256xf32>
    %cst_33 = arith.constant 2.000000e-01 : f32
    %208 = vector.broadcast %cst_33 : f32 to vector<8x256xf32>
    %209 = arith.mulf %208, %205 : vector<8x256xf32>
    %210 = arith.select %207, %205, %209 : vector<8x256xi1>, vector<8x256xf32>
    %cst_34 = arith.constant dense<0.000000e+00> : vector<8xf32>
    %211 = vector.multi_reduction <add>, %189, %cst_34 [1] : vector<8x256xf32> to vector<8xf32>
    %212 = vector.shape_cast %211 : vector<8xf32> to vector<8x1xf32>
    %cst_35 = arith.constant 2.560000e+02 : f32
    %213 = vector.broadcast %cst_35 : f32 to vector<8x1xf32>
    %214 = arith.divf %212, %213 : vector<8x1xf32>
    %215 = vector.broadcast %214 : vector<8x1xf32> to vector<8x256xf32>
    %216 = arith.subf %189, %215 : vector<8x256xf32>
    %217 = arith.mulf %216, %216 : vector<8x256xf32>
    %cst_36 = arith.constant dense<0.000000e+00> : vector<8xf32>
    %218 = vector.multi_reduction <add>, %217, %cst_36 [1] : vector<8x256xf32> to vector<8xf32>
    %219 = vector.shape_cast %218 : vector<8xf32> to vector<8x1xf32>
    %cst_37 = arith.constant 2.560000e+02 : f32
    %220 = vector.broadcast %cst_37 : f32 to vector<8x1xf32>
    %221 = arith.divf %219, %220 : vector<8x1xf32>
    %cst_38 = arith.constant 9.99999974E-6 : f32
    %222 = vector.broadcast %cst_38 : f32 to vector<8x1xf32>
    %223 = arith.addf %221, %222 : vector<8x1xf32>
    %224 = math.rsqrt %223 : vector<8x1xf32>
    %225 = vector.broadcast %224 : vector<8x1xf32> to vector<8x256xf32>
    %226 = arith.mulf %216, %225 : vector<8x256xf32>
    %cst_39 = arith.constant 0.000000e+00 : f32
    %227 = vector.broadcast %cst_39 : f32 to vector<8x256xf32>
    %228 = arith.cmpf oge, %226, %227 : vector<8x256xf32>
    %cst_40 = arith.constant 2.000000e-01 : f32
    %229 = vector.broadcast %cst_40 : f32 to vector<8x256xf32>
    %230 = arith.mulf %229, %226 : vector<8x256xf32>
    %231 = arith.select %228, %226, %230 : vector<8x256xi1>, vector<8x256xf32>
    %c1_i32_41 = arith.constant 1 : i32
    %232 = tpu.dynamic_rotate %210 by %c1_i32_41 dim 0 : vector<8x256xf32>, i32 -> vector<8x256xf32>
    %c1_i32_42 = arith.constant 1 : i32
    %233 = vector.broadcast %c1_i32_42 : i32 to vector<8x256xi32>
    %234 = arith.cmpi sge, %1, %233 : vector<8x256xi32>
    %cst_43 = arith.constant 0.000000e+00 : f32
    %235 = vector.broadcast %cst_43 : f32 to vector<8x256xf32>
    %236 = arith.select %234, %232, %235 : vector<8x256xi1>, vector<8x256xf32>
    %c7_i32 = arith.constant 7 : i32
    %237 = tpu.dynamic_rotate %210 by %c7_i32 dim 0 : vector<8x256xf32>, i32 -> vector<8x256xf32>
    %c7_i32_44 = arith.constant 7 : i32
    %238 = vector.broadcast %c7_i32_44 : i32 to vector<8x256xi32>
    %239 = arith.cmpi slt, %1, %238 : vector<8x256xi32>
    %cst_45 = arith.constant 0.000000e+00 : f32
    %240 = vector.broadcast %cst_45 : f32 to vector<8x256xf32>
    %241 = arith.select %239, %237, %240 : vector<8x256xi1>, vector<8x256xf32>
    %c1_i32_46 = arith.constant 1 : i32
    %242 = tpu.dynamic_rotate %231 by %c1_i32_46 dim 0 : vector<8x256xf32>, i32 -> vector<8x256xf32>
    %c1_i32_47 = arith.constant 1 : i32
    %243 = vector.broadcast %c1_i32_47 : i32 to vector<8x256xi32>
    %244 = arith.cmpi sge, %1, %243 : vector<8x256xi32>
    %cst_48 = arith.constant 0.000000e+00 : f32
    %245 = vector.broadcast %cst_48 : f32 to vector<8x256xf32>
    %246 = arith.select %244, %242, %245 : vector<8x256xi1>, vector<8x256xf32>
    %c7_i32_49 = arith.constant 7 : i32
    %247 = tpu.dynamic_rotate %231 by %c7_i32_49 dim 0 : vector<8x256xf32>, i32 -> vector<8x256xf32>
    %c7_i32_50 = arith.constant 7 : i32
    %248 = vector.broadcast %c7_i32_50 : i32 to vector<8x256xi32>
    %249 = arith.cmpi slt, %1, %248 : vector<8x256xi32>
    %cst_51 = arith.constant 0.000000e+00 : f32
    %250 = vector.broadcast %cst_51 : f32 to vector<8x256xf32>
    %251 = arith.select %249, %247, %250 : vector<8x256xi1>, vector<8x256xf32>
    %c0_52 = arith.constant 0 : index
    %252 = memref.load %arg3[%c0_52] : memref<12xf32, #tpu.memory_space<smem>>
    %253 = vector.broadcast %252 : f32 to vector<8x256xf32>
    %254 = arith.mulf %253, %236 : vector<8x256xf32>
    %c1_53 = arith.constant 1 : index
    %255 = memref.load %arg3[%c1_53] : memref<12xf32, #tpu.memory_space<smem>>
    %256 = vector.broadcast %255 : f32 to vector<8x256xf32>
    %257 = arith.mulf %256, %210 : vector<8x256xf32>
    %258 = arith.addf %254, %257 : vector<8x256xf32>
    %c2_54 = arith.constant 2 : index
    %259 = memref.load %arg3[%c2_54] : memref<12xf32, #tpu.memory_space<smem>>
    %260 = vector.broadcast %259 : f32 to vector<8x256xf32>
    %261 = arith.mulf %260, %241 : vector<8x256xf32>
    %262 = arith.addf %258, %261 : vector<8x256xf32>
    %c3_55 = arith.constant 3 : index
    %263 = memref.load %arg3[%c3_55] : memref<12xf32, #tpu.memory_space<smem>>
    %264 = vector.broadcast %263 : f32 to vector<8x256xf32>
    %265 = arith.mulf %264, %246 : vector<8x256xf32>
    %266 = arith.addf %262, %265 : vector<8x256xf32>
    %c4_56 = arith.constant 4 : index
    %267 = memref.load %arg3[%c4_56] : memref<12xf32, #tpu.memory_space<smem>>
    %268 = vector.broadcast %267 : f32 to vector<8x256xf32>
    %269 = arith.mulf %268, %231 : vector<8x256xf32>
    %270 = arith.addf %266, %269 : vector<8x256xf32>
    %c5_57 = arith.constant 5 : index
    %271 = memref.load %arg3[%c5_57] : memref<12xf32, #tpu.memory_space<smem>>
    %272 = vector.broadcast %271 : f32 to vector<8x256xf32>
    %273 = arith.mulf %272, %251 : vector<8x256xf32>
    %274 = arith.addf %270, %273 : vector<8x256xf32>
    %cst_58 = arith.constant dense<0.000000e+00> : vector<256xf32>
    %275 = vector.multi_reduction <add>, %274, %cst_58 [0] : vector<8x256xf32> to vector<256xf32>
    %276 = vector.shape_cast %275 : vector<256xf32> to vector<1x256xf32>
    %cst_59 = arith.constant 8.000000e+00 : f32
    %277 = vector.broadcast %cst_59 : f32 to vector<1x256xf32>
    %278 = arith.divf %276, %277 : vector<1x256xf32>
    %279 = vector.broadcast %278 : vector<1x256xf32> to vector<8x256xf32>
    %280 = arith.subf %274, %279 : vector<8x256xf32>
    %281 = arith.mulf %280, %280 : vector<8x256xf32>
    %cst_60 = arith.constant dense<0.000000e+00> : vector<256xf32>
    %282 = vector.multi_reduction <add>, %281, %cst_60 [0] : vector<8x256xf32> to vector<256xf32>
    %283 = vector.shape_cast %282 : vector<256xf32> to vector<1x256xf32>
    %cst_61 = arith.constant 8.000000e+00 : f32
    %284 = vector.broadcast %cst_61 : f32 to vector<1x256xf32>
    %285 = arith.divf %283, %284 : vector<1x256xf32>
    %cst_62 = arith.constant 9.99999974E-6 : f32
    %286 = vector.broadcast %cst_62 : f32 to vector<1x256xf32>
    %287 = arith.addf %285, %286 : vector<1x256xf32>
    %288 = math.rsqrt %287 : vector<1x256xf32>
    %289 = vector.broadcast %288 : vector<1x256xf32> to vector<8x256xf32>
    %290 = arith.mulf %280, %289 : vector<8x256xf32>
    %cst_63 = arith.constant 0.000000e+00 : f32
    %291 = vector.broadcast %cst_63 : f32 to vector<8x256xf32>
    %292 = arith.cmpf oge, %290, %291 : vector<8x256xf32>
    %cst_64 = arith.constant 2.000000e-01 : f32
    %293 = vector.broadcast %cst_64 : f32 to vector<8x256xf32>
    %294 = arith.mulf %293, %290 : vector<8x256xf32>
    %295 = arith.select %292, %290, %294 : vector<8x256xi1>, vector<8x256xf32>
    %c6_65 = arith.constant 6 : index
    %296 = memref.load %arg3[%c6_65] : memref<12xf32, #tpu.memory_space<smem>>
    %297 = vector.broadcast %296 : f32 to vector<8x256xf32>
    %298 = arith.mulf %297, %236 : vector<8x256xf32>
    %c7_66 = arith.constant 7 : index
    %299 = memref.load %arg3[%c7_66] : memref<12xf32, #tpu.memory_space<smem>>
    %300 = vector.broadcast %299 : f32 to vector<8x256xf32>
    %301 = arith.mulf %300, %210 : vector<8x256xf32>
    %302 = arith.addf %298, %301 : vector<8x256xf32>
    %c8_67 = arith.constant 8 : index
    %303 = memref.load %arg3[%c8_67] : memref<12xf32, #tpu.memory_space<smem>>
    %304 = vector.broadcast %303 : f32 to vector<8x256xf32>
    %305 = arith.mulf %304, %241 : vector<8x256xf32>
    %306 = arith.addf %302, %305 : vector<8x256xf32>
    %c9_68 = arith.constant 9 : index
    %307 = memref.load %arg3[%c9_68] : memref<12xf32, #tpu.memory_space<smem>>
    %308 = vector.broadcast %307 : f32 to vector<8x256xf32>
    %309 = arith.mulf %308, %246 : vector<8x256xf32>
    %310 = arith.addf %306, %309 : vector<8x256xf32>
    %c10_69 = arith.constant 10 : index
    %311 = memref.load %arg3[%c10_69] : memref<12xf32, #tpu.memory_space<smem>>
    %312 = vector.broadcast %311 : f32 to vector<8x256xf32>
    %313 = arith.mulf %312, %231 : vector<8x256xf32>
    %314 = arith.addf %310, %313 : vector<8x256xf32>
    %c11_70 = arith.constant 11 : index
    %315 = memref.load %arg3[%c11_70] : memref<12xf32, #tpu.memory_space<smem>>
    %316 = vector.broadcast %315 : f32 to vector<8x256xf32>
    %317 = arith.mulf %316, %251 : vector<8x256xf32>
    %318 = arith.addf %314, %317 : vector<8x256xf32>
    %cst_71 = arith.constant dense<0.000000e+00> : vector<256xf32>
    %319 = vector.multi_reduction <add>, %318, %cst_71 [0] : vector<8x256xf32> to vector<256xf32>
    %320 = vector.shape_cast %319 : vector<256xf32> to vector<1x256xf32>
    %cst_72 = arith.constant 8.000000e+00 : f32
    %321 = vector.broadcast %cst_72 : f32 to vector<1x256xf32>
    %322 = arith.divf %320, %321 : vector<1x256xf32>
    %323 = vector.broadcast %322 : vector<1x256xf32> to vector<8x256xf32>
    %324 = arith.subf %318, %323 : vector<8x256xf32>
    %325 = arith.mulf %324, %324 : vector<8x256xf32>
    %cst_73 = arith.constant dense<0.000000e+00> : vector<256xf32>
    %326 = vector.multi_reduction <add>, %325, %cst_73 [0] : vector<8x256xf32> to vector<256xf32>
    %327 = vector.shape_cast %326 : vector<256xf32> to vector<1x256xf32>
    %cst_74 = arith.constant 8.000000e+00 : f32
    %328 = vector.broadcast %cst_74 : f32 to vector<1x256xf32>
    %329 = arith.divf %327, %328 : vector<1x256xf32>
    %cst_75 = arith.constant 9.99999974E-6 : f32
    %330 = vector.broadcast %cst_75 : f32 to vector<1x256xf32>
    %331 = arith.addf %329, %330 : vector<1x256xf32>
    %332 = math.rsqrt %331 : vector<1x256xf32>
    %333 = vector.broadcast %332 : vector<1x256xf32> to vector<8x256xf32>
    %334 = arith.mulf %324, %333 : vector<8x256xf32>
    %cst_76 = arith.constant 0.000000e+00 : f32
    %335 = vector.broadcast %cst_76 : f32 to vector<8x256xf32>
    %336 = arith.cmpf oge, %334, %335 : vector<8x256xf32>
    %cst_77 = arith.constant 2.000000e-01 : f32
    %337 = vector.broadcast %cst_77 : f32 to vector<8x256xf32>
    %338 = arith.mulf %337, %334 : vector<8x256xf32>
    %339 = arith.select %336, %334, %338 : vector<8x256xi1>, vector<8x256xf32>
    %c1_i32_78 = arith.constant 1 : i32
    %340 = tpu.dynamic_rotate %295 by %c1_i32_78 dim 1 : vector<8x256xf32>, i32 -> vector<8x256xf32>
    %c1_i32_79 = arith.constant 1 : i32
    %341 = vector.broadcast %c1_i32_79 : i32 to vector<8x256xi32>
    %342 = arith.cmpi sge, %3, %341 : vector<8x256xi32>
    %cst_80 = arith.constant 0.000000e+00 : f32
    %343 = vector.broadcast %cst_80 : f32 to vector<8x256xf32>
    %344 = arith.select %342, %340, %343 : vector<8x256xi1>, vector<8x256xf32>
    %c255_i32_81 = arith.constant 255 : i32
    %345 = tpu.dynamic_rotate %295 by %c255_i32_81 dim 1 : vector<8x256xf32>, i32 -> vector<8x256xf32>
    %c15_i32_82 = arith.constant 15 : i32
    %346 = vector.broadcast %c15_i32_82 : i32 to vector<8x256xi32>
    %347 = arith.cmpi slt, %3, %346 : vector<8x256xi32>
    %cst_83 = arith.constant 0.000000e+00 : f32
    %348 = vector.broadcast %cst_83 : f32 to vector<8x256xf32>
    %349 = arith.select %347, %345, %348 : vector<8x256xi1>, vector<8x256xf32>
    %c1_i32_84 = arith.constant 1 : i32
    %350 = tpu.dynamic_rotate %339 by %c1_i32_84 dim 1 : vector<8x256xf32>, i32 -> vector<8x256xf32>
    %c1_i32_85 = arith.constant 1 : i32
    %351 = vector.broadcast %c1_i32_85 : i32 to vector<8x256xi32>
    %352 = arith.cmpi sge, %3, %351 : vector<8x256xi32>
    %cst_86 = arith.constant 0.000000e+00 : f32
    %353 = vector.broadcast %cst_86 : f32 to vector<8x256xf32>
    %354 = arith.select %352, %350, %353 : vector<8x256xi1>, vector<8x256xf32>
    %c255_i32_87 = arith.constant 255 : i32
    %355 = tpu.dynamic_rotate %339 by %c255_i32_87 dim 1 : vector<8x256xf32>, i32 -> vector<8x256xf32>
    %c15_i32_88 = arith.constant 15 : i32
    %356 = vector.broadcast %c15_i32_88 : i32 to vector<8x256xi32>
    %357 = arith.cmpi slt, %3, %356 : vector<8x256xi32>
    %cst_89 = arith.constant 0.000000e+00 : f32
    %358 = vector.broadcast %cst_89 : f32 to vector<8x256xf32>
    %359 = arith.select %357, %355, %358 : vector<8x256xi1>, vector<8x256xf32>
    %c0_90 = arith.constant 0 : index
    %360 = memref.load %arg4[%c0_90] : memref<36xf32, #tpu.memory_space<smem>>
    %361 = vector.broadcast %360 : f32 to vector<8x256xf32>
    %362 = arith.mulf %361, %344 : vector<8x256xf32>
    %c1_91 = arith.constant 1 : index
    %363 = memref.load %arg4[%c1_91] : memref<36xf32, #tpu.memory_space<smem>>
    %364 = vector.broadcast %363 : f32 to vector<8x256xf32>
    %365 = arith.mulf %364, %295 : vector<8x256xf32>
    %366 = arith.addf %362, %365 : vector<8x256xf32>
    %c2_92 = arith.constant 2 : index
    %367 = memref.load %arg4[%c2_92] : memref<36xf32, #tpu.memory_space<smem>>
    %368 = vector.broadcast %367 : f32 to vector<8x256xf32>
    %369 = arith.mulf %368, %349 : vector<8x256xf32>
    %370 = arith.addf %366, %369 : vector<8x256xf32>
    %c9_93 = arith.constant 9 : index
    %371 = memref.load %arg4[%c9_93] : memref<36xf32, #tpu.memory_space<smem>>
    %372 = vector.broadcast %371 : f32 to vector<8x256xf32>
    %373 = arith.mulf %372, %354 : vector<8x256xf32>
    %374 = arith.addf %370, %373 : vector<8x256xf32>
    %c10_94 = arith.constant 10 : index
    %375 = memref.load %arg4[%c10_94] : memref<36xf32, #tpu.memory_space<smem>>
    %376 = vector.broadcast %375 : f32 to vector<8x256xf32>
    %377 = arith.mulf %376, %339 : vector<8x256xf32>
    %378 = arith.addf %374, %377 : vector<8x256xf32>
    %c11_95 = arith.constant 11 : index
    %379 = memref.load %arg4[%c11_95] : memref<36xf32, #tpu.memory_space<smem>>
    %380 = vector.broadcast %379 : f32 to vector<8x256xf32>
    %381 = arith.mulf %380, %359 : vector<8x256xf32>
    %382 = arith.addf %378, %381 : vector<8x256xf32>
    %c16_i32_96 = arith.constant 16 : i32
    %383 = tpu.dynamic_rotate %382 by %c16_i32_96 dim 1 : vector<8x256xf32>, i32 -> vector<8x256xf32>
    %c16_i32_97 = arith.constant 16 : i32
    %384 = vector.broadcast %c16_i32_97 : i32 to vector<8x256xi32>
    %385 = arith.cmpi sge, %0, %384 : vector<8x256xi32>
    %cst_98 = arith.constant 0.000000e+00 : f32
    %386 = vector.broadcast %cst_98 : f32 to vector<8x256xf32>
    %387 = arith.select %385, %383, %386 : vector<8x256xi1>, vector<8x256xf32>
    %c18_99 = arith.constant 18 : index
    %388 = memref.load %arg4[%c18_99] : memref<36xf32, #tpu.memory_space<smem>>
    %389 = vector.broadcast %388 : f32 to vector<8x256xf32>
    %390 = arith.mulf %389, %344 : vector<8x256xf32>
    %c19_100 = arith.constant 19 : index
    %391 = memref.load %arg4[%c19_100] : memref<36xf32, #tpu.memory_space<smem>>
    %392 = vector.broadcast %391 : f32 to vector<8x256xf32>
    %393 = arith.mulf %392, %295 : vector<8x256xf32>
    %394 = arith.addf %390, %393 : vector<8x256xf32>
    %c20_101 = arith.constant 20 : index
    %395 = memref.load %arg4[%c20_101] : memref<36xf32, #tpu.memory_space<smem>>
    %396 = vector.broadcast %395 : f32 to vector<8x256xf32>
    %397 = arith.mulf %396, %349 : vector<8x256xf32>
    %398 = arith.addf %394, %397 : vector<8x256xf32>
    %c27_102 = arith.constant 27 : index
    %399 = memref.load %arg4[%c27_102] : memref<36xf32, #tpu.memory_space<smem>>
    %400 = vector.broadcast %399 : f32 to vector<8x256xf32>
    %401 = arith.mulf %400, %354 : vector<8x256xf32>
    %402 = arith.addf %398, %401 : vector<8x256xf32>
    %c28_103 = arith.constant 28 : index
    %403 = memref.load %arg4[%c28_103] : memref<36xf32, #tpu.memory_space<smem>>
    %404 = vector.broadcast %403 : f32 to vector<8x256xf32>
    %405 = arith.mulf %404, %339 : vector<8x256xf32>
    %406 = arith.addf %402, %405 : vector<8x256xf32>
    %c29_104 = arith.constant 29 : index
    %407 = memref.load %arg4[%c29_104] : memref<36xf32, #tpu.memory_space<smem>>
    %408 = vector.broadcast %407 : f32 to vector<8x256xf32>
    %409 = arith.mulf %408, %359 : vector<8x256xf32>
    %410 = arith.addf %406, %409 : vector<8x256xf32>
    %c16_i32_105 = arith.constant 16 : i32
    %411 = tpu.dynamic_rotate %410 by %c16_i32_105 dim 1 : vector<8x256xf32>, i32 -> vector<8x256xf32>
    %c16_i32_106 = arith.constant 16 : i32
    %412 = vector.broadcast %c16_i32_106 : i32 to vector<8x256xi32>
    %413 = arith.cmpi sge, %0, %412 : vector<8x256xi32>
    %cst_107 = arith.constant 0.000000e+00 : f32
    %414 = vector.broadcast %cst_107 : f32 to vector<8x256xf32>
    %415 = arith.select %413, %411, %414 : vector<8x256xi1>, vector<8x256xf32>
    %c3_108 = arith.constant 3 : index
    %416 = memref.load %arg4[%c3_108] : memref<36xf32, #tpu.memory_space<smem>>
    %417 = vector.broadcast %416 : f32 to vector<8x256xf32>
    %418 = arith.mulf %417, %344 : vector<8x256xf32>
    %c4_109 = arith.constant 4 : index
    %419 = memref.load %arg4[%c4_109] : memref<36xf32, #tpu.memory_space<smem>>
    %420 = vector.broadcast %419 : f32 to vector<8x256xf32>
    %421 = arith.mulf %420, %295 : vector<8x256xf32>
    %422 = arith.addf %418, %421 : vector<8x256xf32>
    %c5_110 = arith.constant 5 : index
    %423 = memref.load %arg4[%c5_110] : memref<36xf32, #tpu.memory_space<smem>>
    %424 = vector.broadcast %423 : f32 to vector<8x256xf32>
    %425 = arith.mulf %424, %349 : vector<8x256xf32>
    %426 = arith.addf %422, %425 : vector<8x256xf32>
    %c12_111 = arith.constant 12 : index
    %427 = memref.load %arg4[%c12_111] : memref<36xf32, #tpu.memory_space<smem>>
    %428 = vector.broadcast %427 : f32 to vector<8x256xf32>
    %429 = arith.mulf %428, %354 : vector<8x256xf32>
    %430 = arith.addf %426, %429 : vector<8x256xf32>
    %c13_112 = arith.constant 13 : index
    %431 = memref.load %arg4[%c13_112] : memref<36xf32, #tpu.memory_space<smem>>
    %432 = vector.broadcast %431 : f32 to vector<8x256xf32>
    %433 = arith.mulf %432, %339 : vector<8x256xf32>
    %434 = arith.addf %430, %433 : vector<8x256xf32>
    %c14_113 = arith.constant 14 : index
    %435 = memref.load %arg4[%c14_113] : memref<36xf32, #tpu.memory_space<smem>>
    %436 = vector.broadcast %435 : f32 to vector<8x256xf32>
    %437 = arith.mulf %436, %359 : vector<8x256xf32>
    %438 = arith.addf %434, %437 : vector<8x256xf32>
    %439 = arith.addf %387, %438 : vector<8x256xf32>
    %c21_114 = arith.constant 21 : index
    %440 = memref.load %arg4[%c21_114] : memref<36xf32, #tpu.memory_space<smem>>
    %441 = vector.broadcast %440 : f32 to vector<8x256xf32>
    %442 = arith.mulf %441, %344 : vector<8x256xf32>
    %c22_115 = arith.constant 22 : index
    %443 = memref.load %arg4[%c22_115] : memref<36xf32, #tpu.memory_space<smem>>
    %444 = vector.broadcast %443 : f32 to vector<8x256xf32>
    %445 = arith.mulf %444, %295 : vector<8x256xf32>
    %446 = arith.addf %442, %445 : vector<8x256xf32>
    %c23_116 = arith.constant 23 : index
    %447 = memref.load %arg4[%c23_116] : memref<36xf32, #tpu.memory_space<smem>>
    %448 = vector.broadcast %447 : f32 to vector<8x256xf32>
    %449 = arith.mulf %448, %349 : vector<8x256xf32>
    %450 = arith.addf %446, %449 : vector<8x256xf32>
    %c30_117 = arith.constant 30 : index
    %451 = memref.load %arg4[%c30_117] : memref<36xf32, #tpu.memory_space<smem>>
    %452 = vector.broadcast %451 : f32 to vector<8x256xf32>
    %453 = arith.mulf %452, %354 : vector<8x256xf32>
    %454 = arith.addf %450, %453 : vector<8x256xf32>
    %c31_118 = arith.constant 31 : index
    %455 = memref.load %arg4[%c31_118] : memref<36xf32, #tpu.memory_space<smem>>
    %456 = vector.broadcast %455 : f32 to vector<8x256xf32>
    %457 = arith.mulf %456, %339 : vector<8x256xf32>
    %458 = arith.addf %454, %457 : vector<8x256xf32>
    %c32_119 = arith.constant 32 : index
    %459 = memref.load %arg4[%c32_119] : memref<36xf32, #tpu.memory_space<smem>>
    %460 = vector.broadcast %459 : f32 to vector<8x256xf32>
    %461 = arith.mulf %460, %359 : vector<8x256xf32>
    %462 = arith.addf %458, %461 : vector<8x256xf32>
    %463 = arith.addf %415, %462 : vector<8x256xf32>
    %c6_120 = arith.constant 6 : index
    %464 = memref.load %arg4[%c6_120] : memref<36xf32, #tpu.memory_space<smem>>
    %465 = vector.broadcast %464 : f32 to vector<8x256xf32>
    %466 = arith.mulf %465, %344 : vector<8x256xf32>
    %c7_121 = arith.constant 7 : index
    %467 = memref.load %arg4[%c7_121] : memref<36xf32, #tpu.memory_space<smem>>
    %468 = vector.broadcast %467 : f32 to vector<8x256xf32>
    %469 = arith.mulf %468, %295 : vector<8x256xf32>
    %470 = arith.addf %466, %469 : vector<8x256xf32>
    %c8_122 = arith.constant 8 : index
    %471 = memref.load %arg4[%c8_122] : memref<36xf32, #tpu.memory_space<smem>>
    %472 = vector.broadcast %471 : f32 to vector<8x256xf32>
    %473 = arith.mulf %472, %349 : vector<8x256xf32>
    %474 = arith.addf %470, %473 : vector<8x256xf32>
    %c15_123 = arith.constant 15 : index
    %475 = memref.load %arg4[%c15_123] : memref<36xf32, #tpu.memory_space<smem>>
    %476 = vector.broadcast %475 : f32 to vector<8x256xf32>
    %477 = arith.mulf %476, %354 : vector<8x256xf32>
    %478 = arith.addf %474, %477 : vector<8x256xf32>
    %c16_124 = arith.constant 16 : index
    %479 = memref.load %arg4[%c16_124] : memref<36xf32, #tpu.memory_space<smem>>
    %480 = vector.broadcast %479 : f32 to vector<8x256xf32>
    %481 = arith.mulf %480, %339 : vector<8x256xf32>
    %482 = arith.addf %478, %481 : vector<8x256xf32>
    %c17_125 = arith.constant 17 : index
    %483 = memref.load %arg4[%c17_125] : memref<36xf32, #tpu.memory_space<smem>>
    %484 = vector.broadcast %483 : f32 to vector<8x256xf32>
    %485 = arith.mulf %484, %359 : vector<8x256xf32>
    %486 = arith.addf %482, %485 : vector<8x256xf32>
    %c240_i32_126 = arith.constant 240 : i32
    %487 = tpu.dynamic_rotate %486 by %c240_i32_126 dim 1 : vector<8x256xf32>, i32 -> vector<8x256xf32>
    %c240_i32_127 = arith.constant 240 : i32
    %488 = vector.broadcast %c240_i32_127 : i32 to vector<8x256xi32>
    %489 = arith.cmpi slt, %0, %488 : vector<8x256xi32>
    %cst_128 = arith.constant 0.000000e+00 : f32
    %490 = vector.broadcast %cst_128 : f32 to vector<8x256xf32>
    %491 = arith.select %489, %487, %490 : vector<8x256xi1>, vector<8x256xf32>
    %492 = arith.addf %439, %491 : vector<8x256xf32>
    %c24_129 = arith.constant 24 : index
    %493 = memref.load %arg4[%c24_129] : memref<36xf32, #tpu.memory_space<smem>>
    %494 = vector.broadcast %493 : f32 to vector<8x256xf32>
    %495 = arith.mulf %494, %344 : vector<8x256xf32>
    %c25_130 = arith.constant 25 : index
    %496 = memref.load %arg4[%c25_130] : memref<36xf32, #tpu.memory_space<smem>>
    %497 = vector.broadcast %496 : f32 to vector<8x256xf32>
    %498 = arith.mulf %497, %295 : vector<8x256xf32>
    %499 = arith.addf %495, %498 : vector<8x256xf32>
    %c26_131 = arith.constant 26 : index
    %500 = memref.load %arg4[%c26_131] : memref<36xf32, #tpu.memory_space<smem>>
    %501 = vector.broadcast %500 : f32 to vector<8x256xf32>
    %502 = arith.mulf %501, %349 : vector<8x256xf32>
    %503 = arith.addf %499, %502 : vector<8x256xf32>
    %c33_132 = arith.constant 33 : index
    %504 = memref.load %arg4[%c33_132] : memref<36xf32, #tpu.memory_space<smem>>
    %505 = vector.broadcast %504 : f32 to vector<8x256xf32>
    %506 = arith.mulf %505, %354 : vector<8x256xf32>
    %507 = arith.addf %503, %506 : vector<8x256xf32>
    %c34_133 = arith.constant 34 : index
    %508 = memref.load %arg4[%c34_133] : memref<36xf32, #tpu.memory_space<smem>>
    %509 = vector.broadcast %508 : f32 to vector<8x256xf32>
    %510 = arith.mulf %509, %339 : vector<8x256xf32>
    %511 = arith.addf %507, %510 : vector<8x256xf32>
    %c35_134 = arith.constant 35 : index
    %512 = memref.load %arg4[%c35_134] : memref<36xf32, #tpu.memory_space<smem>>
    %513 = vector.broadcast %512 : f32 to vector<8x256xf32>
    %514 = arith.mulf %513, %359 : vector<8x256xf32>
    %515 = arith.addf %511, %514 : vector<8x256xf32>
    %c240_i32_135 = arith.constant 240 : i32
    %516 = tpu.dynamic_rotate %515 by %c240_i32_135 dim 1 : vector<8x256xf32>, i32 -> vector<8x256xf32>
    %c240_i32_136 = arith.constant 240 : i32
    %517 = vector.broadcast %c240_i32_136 : i32 to vector<8x256xi32>
    %518 = arith.cmpi slt, %0, %517 : vector<8x256xi32>
    %cst_137 = arith.constant 0.000000e+00 : f32
    %519 = vector.broadcast %cst_137 : f32 to vector<8x256xf32>
    %520 = arith.select %518, %516, %519 : vector<8x256xi1>, vector<8x256xf32>
    %521 = arith.addf %463, %520 : vector<8x256xf32>
    %cst_138 = arith.constant dense<0.000000e+00> : vector<8xf32>
    %522 = vector.multi_reduction <add>, %492, %cst_138 [1] : vector<8x256xf32> to vector<8xf32>
    %523 = vector.shape_cast %522 : vector<8xf32> to vector<8x1xf32>
    %cst_139 = arith.constant 2.560000e+02 : f32
    %524 = vector.broadcast %cst_139 : f32 to vector<8x1xf32>
    %525 = arith.divf %523, %524 : vector<8x1xf32>
    %526 = vector.broadcast %525 : vector<8x1xf32> to vector<8x256xf32>
    %527 = arith.subf %492, %526 : vector<8x256xf32>
    %528 = arith.mulf %527, %527 : vector<8x256xf32>
    %cst_140 = arith.constant dense<0.000000e+00> : vector<8xf32>
    %529 = vector.multi_reduction <add>, %528, %cst_140 [1] : vector<8x256xf32> to vector<8xf32>
    %530 = vector.shape_cast %529 : vector<8xf32> to vector<8x1xf32>
    %cst_141 = arith.constant 2.560000e+02 : f32
    %531 = vector.broadcast %cst_141 : f32 to vector<8x1xf32>
    %532 = arith.divf %530, %531 : vector<8x1xf32>
    %cst_142 = arith.constant 9.99999974E-6 : f32
    %533 = vector.broadcast %cst_142 : f32 to vector<8x1xf32>
    %534 = arith.addf %532, %533 : vector<8x1xf32>
    %535 = math.rsqrt %534 : vector<8x1xf32>
    %536 = vector.broadcast %535 : vector<8x1xf32> to vector<8x256xf32>
    %537 = arith.mulf %527, %536 : vector<8x256xf32>
    %cst_143 = arith.constant 0.000000e+00 : f32
    %538 = vector.broadcast %cst_143 : f32 to vector<8x256xf32>
    %539 = arith.cmpf oge, %537, %538 : vector<8x256xf32>
    %cst_144 = arith.constant 2.000000e-01 : f32
    %540 = vector.broadcast %cst_144 : f32 to vector<8x256xf32>
    %541 = arith.mulf %540, %537 : vector<8x256xf32>
    %542 = arith.select %539, %537, %541 : vector<8x256xi1>, vector<8x256xf32>
    %cst_145 = arith.constant dense<0.000000e+00> : vector<8xf32>
    %543 = vector.multi_reduction <add>, %521, %cst_145 [1] : vector<8x256xf32> to vector<8xf32>
    %544 = vector.shape_cast %543 : vector<8xf32> to vector<8x1xf32>
    %cst_146 = arith.constant 2.560000e+02 : f32
    %545 = vector.broadcast %cst_146 : f32 to vector<8x1xf32>
    %546 = arith.divf %544, %545 : vector<8x1xf32>
    %547 = vector.broadcast %546 : vector<8x1xf32> to vector<8x256xf32>
    %548 = arith.subf %521, %547 : vector<8x256xf32>
    %549 = arith.mulf %548, %548 : vector<8x256xf32>
    %cst_147 = arith.constant dense<0.000000e+00> : vector<8xf32>
    %550 = vector.multi_reduction <add>, %549, %cst_147 [1] : vector<8x256xf32> to vector<8xf32>
    %551 = vector.shape_cast %550 : vector<8xf32> to vector<8x1xf32>
    %cst_148 = arith.constant 2.560000e+02 : f32
    %552 = vector.broadcast %cst_148 : f32 to vector<8x1xf32>
    %553 = arith.divf %551, %552 : vector<8x1xf32>
    %cst_149 = arith.constant 9.99999974E-6 : f32
    %554 = vector.broadcast %cst_149 : f32 to vector<8x1xf32>
    %555 = arith.addf %553, %554 : vector<8x1xf32>
    %556 = math.rsqrt %555 : vector<8x1xf32>
    %557 = vector.broadcast %556 : vector<8x1xf32> to vector<8x256xf32>
    %558 = arith.mulf %548, %557 : vector<8x256xf32>
    %cst_150 = arith.constant 0.000000e+00 : f32
    %559 = vector.broadcast %cst_150 : f32 to vector<8x256xf32>
    %560 = arith.cmpf oge, %558, %559 : vector<8x256xf32>
    %cst_151 = arith.constant 2.000000e-01 : f32
    %561 = vector.broadcast %cst_151 : f32 to vector<8x256xf32>
    %562 = arith.mulf %561, %558 : vector<8x256xf32>
    %563 = arith.select %560, %558, %562 : vector<8x256xi1>, vector<8x256xf32>
    %c1_i32_152 = arith.constant 1 : i32
    %564 = tpu.dynamic_rotate %542 by %c1_i32_152 dim 0 : vector<8x256xf32>, i32 -> vector<8x256xf32>
    %c1_i32_153 = arith.constant 1 : i32
    %565 = vector.broadcast %c1_i32_153 : i32 to vector<8x256xi32>
    %566 = arith.cmpi sge, %1, %565 : vector<8x256xi32>
    %cst_154 = arith.constant 0.000000e+00 : f32
    %567 = vector.broadcast %cst_154 : f32 to vector<8x256xf32>
    %568 = arith.select %566, %564, %567 : vector<8x256xi1>, vector<8x256xf32>
    %c7_i32_155 = arith.constant 7 : i32
    %569 = tpu.dynamic_rotate %542 by %c7_i32_155 dim 0 : vector<8x256xf32>, i32 -> vector<8x256xf32>
    %c7_i32_156 = arith.constant 7 : i32
    %570 = vector.broadcast %c7_i32_156 : i32 to vector<8x256xi32>
    %571 = arith.cmpi slt, %1, %570 : vector<8x256xi32>
    %cst_157 = arith.constant 0.000000e+00 : f32
    %572 = vector.broadcast %cst_157 : f32 to vector<8x256xf32>
    %573 = arith.select %571, %569, %572 : vector<8x256xi1>, vector<8x256xf32>
    %c1_i32_158 = arith.constant 1 : i32
    %574 = tpu.dynamic_rotate %563 by %c1_i32_158 dim 0 : vector<8x256xf32>, i32 -> vector<8x256xf32>
    %c1_i32_159 = arith.constant 1 : i32
    %575 = vector.broadcast %c1_i32_159 : i32 to vector<8x256xi32>
    %576 = arith.cmpi sge, %1, %575 : vector<8x256xi32>
    %cst_160 = arith.constant 0.000000e+00 : f32
    %577 = vector.broadcast %cst_160 : f32 to vector<8x256xf32>
    %578 = arith.select %576, %574, %577 : vector<8x256xi1>, vector<8x256xf32>
    %c7_i32_161 = arith.constant 7 : i32
    %579 = tpu.dynamic_rotate %563 by %c7_i32_161 dim 0 : vector<8x256xf32>, i32 -> vector<8x256xf32>
    %c7_i32_162 = arith.constant 7 : i32
    %580 = vector.broadcast %c7_i32_162 : i32 to vector<8x256xi32>
    %581 = arith.cmpi slt, %1, %580 : vector<8x256xi32>
    %cst_163 = arith.constant 0.000000e+00 : f32
    %582 = vector.broadcast %cst_163 : f32 to vector<8x256xf32>
    %583 = arith.select %581, %579, %582 : vector<8x256xi1>, vector<8x256xf32>
    %c0_164 = arith.constant 0 : index
    %584 = memref.load %arg5[%c0_164] : memref<12xf32, #tpu.memory_space<smem>>
    %585 = vector.broadcast %584 : f32 to vector<8x256xf32>
    %586 = arith.mulf %585, %568 : vector<8x256xf32>
    %c1_165 = arith.constant 1 : index
    %587 = memref.load %arg5[%c1_165] : memref<12xf32, #tpu.memory_space<smem>>
    %588 = vector.broadcast %587 : f32 to vector<8x256xf32>
    %589 = arith.mulf %588, %542 : vector<8x256xf32>
    %590 = arith.addf %586, %589 : vector<8x256xf32>
    %c2_166 = arith.constant 2 : index
    %591 = memref.load %arg5[%c2_166] : memref<12xf32, #tpu.memory_space<smem>>
    %592 = vector.broadcast %591 : f32 to vector<8x256xf32>
    %593 = arith.mulf %592, %573 : vector<8x256xf32>
    %594 = arith.addf %590, %593 : vector<8x256xf32>
    %c3_167 = arith.constant 3 : index
    %595 = memref.load %arg5[%c3_167] : memref<12xf32, #tpu.memory_space<smem>>
    %596 = vector.broadcast %595 : f32 to vector<8x256xf32>
    %597 = arith.mulf %596, %578 : vector<8x256xf32>
    %598 = arith.addf %594, %597 : vector<8x256xf32>
    %c4_168 = arith.constant 4 : index
    %599 = memref.load %arg5[%c4_168] : memref<12xf32, #tpu.memory_space<smem>>
    %600 = vector.broadcast %599 : f32 to vector<8x256xf32>
    %601 = arith.mulf %600, %563 : vector<8x256xf32>
    %602 = arith.addf %598, %601 : vector<8x256xf32>
    %c5_169 = arith.constant 5 : index
    %603 = memref.load %arg5[%c5_169] : memref<12xf32, #tpu.memory_space<smem>>
    %604 = vector.broadcast %603 : f32 to vector<8x256xf32>
    %605 = arith.mulf %604, %583 : vector<8x256xf32>
    %606 = arith.addf %602, %605 : vector<8x256xf32>
    %cst_170 = arith.constant dense<0.000000e+00> : vector<256xf32>
    %607 = vector.multi_reduction <add>, %606, %cst_170 [0] : vector<8x256xf32> to vector<256xf32>
    %608 = vector.shape_cast %607 : vector<256xf32> to vector<1x256xf32>
    %cst_171 = arith.constant 8.000000e+00 : f32
    %609 = vector.broadcast %cst_171 : f32 to vector<1x256xf32>
    %610 = arith.divf %608, %609 : vector<1x256xf32>
    %611 = vector.broadcast %610 : vector<1x256xf32> to vector<8x256xf32>
    %612 = arith.subf %606, %611 : vector<8x256xf32>
    %613 = arith.mulf %612, %612 : vector<8x256xf32>
    %cst_172 = arith.constant dense<0.000000e+00> : vector<256xf32>
    %614 = vector.multi_reduction <add>, %613, %cst_172 [0] : vector<8x256xf32> to vector<256xf32>
    %615 = vector.shape_cast %614 : vector<256xf32> to vector<1x256xf32>
    %cst_173 = arith.constant 8.000000e+00 : f32
    %616 = vector.broadcast %cst_173 : f32 to vector<1x256xf32>
    %617 = arith.divf %615, %616 : vector<1x256xf32>
    %cst_174 = arith.constant 9.99999974E-6 : f32
    %618 = vector.broadcast %cst_174 : f32 to vector<1x256xf32>
    %619 = arith.addf %617, %618 : vector<1x256xf32>
    %620 = math.rsqrt %619 : vector<1x256xf32>
    %621 = vector.broadcast %620 : vector<1x256xf32> to vector<8x256xf32>
    %622 = arith.mulf %612, %621 : vector<8x256xf32>
    %cst_175 = arith.constant 0.000000e+00 : f32
    %623 = vector.broadcast %cst_175 : f32 to vector<8x256xf32>
    %624 = arith.cmpf oge, %622, %623 : vector<8x256xf32>
    %cst_176 = arith.constant 2.000000e-01 : f32
    %625 = vector.broadcast %cst_176 : f32 to vector<8x256xf32>
    %626 = arith.mulf %625, %622 : vector<8x256xf32>
    %627 = arith.select %624, %622, %626 : vector<8x256xi1>, vector<8x256xf32>
    %628 = arith.addf %627, %5 : vector<8x256xf32>
    %c6_177 = arith.constant 6 : index
    %629 = memref.load %arg5[%c6_177] : memref<12xf32, #tpu.memory_space<smem>>
    %630 = vector.broadcast %629 : f32 to vector<8x256xf32>
    %631 = arith.mulf %630, %568 : vector<8x256xf32>
    %c7_178 = arith.constant 7 : index
    %632 = memref.load %arg5[%c7_178] : memref<12xf32, #tpu.memory_space<smem>>
    %633 = vector.broadcast %632 : f32 to vector<8x256xf32>
    %634 = arith.mulf %633, %542 : vector<8x256xf32>
    %635 = arith.addf %631, %634 : vector<8x256xf32>
    %c8_179 = arith.constant 8 : index
    %636 = memref.load %arg5[%c8_179] : memref<12xf32, #tpu.memory_space<smem>>
    %637 = vector.broadcast %636 : f32 to vector<8x256xf32>
    %638 = arith.mulf %637, %573 : vector<8x256xf32>
    %639 = arith.addf %635, %638 : vector<8x256xf32>
    %c9_180 = arith.constant 9 : index
    %640 = memref.load %arg5[%c9_180] : memref<12xf32, #tpu.memory_space<smem>>
    %641 = vector.broadcast %640 : f32 to vector<8x256xf32>
    %642 = arith.mulf %641, %578 : vector<8x256xf32>
    %643 = arith.addf %639, %642 : vector<8x256xf32>
    %c10_181 = arith.constant 10 : index
    %644 = memref.load %arg5[%c10_181] : memref<12xf32, #tpu.memory_space<smem>>
    %645 = vector.broadcast %644 : f32 to vector<8x256xf32>
    %646 = arith.mulf %645, %563 : vector<8x256xf32>
    %647 = arith.addf %643, %646 : vector<8x256xf32>
    %c11_182 = arith.constant 11 : index
    %648 = memref.load %arg5[%c11_182] : memref<12xf32, #tpu.memory_space<smem>>
    %649 = vector.broadcast %648 : f32 to vector<8x256xf32>
    %650 = arith.mulf %649, %583 : vector<8x256xf32>
    %651 = arith.addf %647, %650 : vector<8x256xf32>
    %cst_183 = arith.constant dense<0.000000e+00> : vector<256xf32>
    %652 = vector.multi_reduction <add>, %651, %cst_183 [0] : vector<8x256xf32> to vector<256xf32>
    %653 = vector.shape_cast %652 : vector<256xf32> to vector<1x256xf32>
    %cst_184 = arith.constant 8.000000e+00 : f32
    %654 = vector.broadcast %cst_184 : f32 to vector<1x256xf32>
    %655 = arith.divf %653, %654 : vector<1x256xf32>
    %656 = vector.broadcast %655 : vector<1x256xf32> to vector<8x256xf32>
    %657 = arith.subf %651, %656 : vector<8x256xf32>
    %658 = arith.mulf %657, %657 : vector<8x256xf32>
    %cst_185 = arith.constant dense<0.000000e+00> : vector<256xf32>
    %659 = vector.multi_reduction <add>, %658, %cst_185 [0] : vector<8x256xf32> to vector<256xf32>
    %660 = vector.shape_cast %659 : vector<256xf32> to vector<1x256xf32>
    %cst_186 = arith.constant 8.000000e+00 : f32
    %661 = vector.broadcast %cst_186 : f32 to vector<1x256xf32>
    %662 = arith.divf %660, %661 : vector<1x256xf32>
    %cst_187 = arith.constant 9.99999974E-6 : f32
    %663 = vector.broadcast %cst_187 : f32 to vector<1x256xf32>
    %664 = arith.addf %662, %663 : vector<1x256xf32>
    %665 = math.rsqrt %664 : vector<1x256xf32>
    %666 = vector.broadcast %665 : vector<1x256xf32> to vector<8x256xf32>
    %667 = arith.mulf %657, %666 : vector<8x256xf32>
    %cst_188 = arith.constant 0.000000e+00 : f32
    %668 = vector.broadcast %cst_188 : f32 to vector<8x256xf32>
    %669 = arith.cmpf oge, %667, %668 : vector<8x256xf32>
    %cst_189 = arith.constant 2.000000e-01 : f32
    %670 = vector.broadcast %cst_189 : f32 to vector<8x256xf32>
    %671 = arith.mulf %670, %667 : vector<8x256xf32>
    %672 = arith.select %669, %667, %671 : vector<8x256xi1>, vector<8x256xf32>
    %673 = arith.addf %672, %7 : vector<8x256xf32>
    %674 = arith.addf %628, %673 : vector<8x256xf32>
    %675 = arith.maximumf %628, %673 : vector<8x256xf32>
    %cst_190 = arith.constant 5.000000e-01 : f32
    %676 = vector.broadcast %cst_190 : f32 to vector<8x256xf32>
    %677 = arith.mulf %674, %676 : vector<8x256xf32>
    %c3_i32 = arith.constant 3 : i32
    %678 = tpu.dynamic_rotate %677 by %c3_i32 dim 1 : vector<8x256xf32>, i32 -> vector<8x256xf32>
    %c3_i32_191 = arith.constant 3 : i32
    %679 = vector.broadcast %c3_i32_191 : i32 to vector<8x256xi32>
    %680 = arith.cmpi sge, %3, %679 : vector<8x256xi32>
    %cst_192 = arith.constant 0.000000e+00 : f32
    %681 = vector.broadcast %cst_192 : f32 to vector<8x256xf32>
    %682 = arith.select %680, %678, %681 : vector<8x256xi1>, vector<8x256xf32>
    %c2_i32 = arith.constant 2 : i32
    %683 = tpu.dynamic_rotate %677 by %c2_i32 dim 1 : vector<8x256xf32>, i32 -> vector<8x256xf32>
    %c2_i32_193 = arith.constant 2 : i32
    %684 = vector.broadcast %c2_i32_193 : i32 to vector<8x256xi32>
    %685 = arith.cmpi sge, %3, %684 : vector<8x256xi32>
    %cst_194 = arith.constant 0.000000e+00 : f32
    %686 = vector.broadcast %cst_194 : f32 to vector<8x256xf32>
    %687 = arith.select %685, %683, %686 : vector<8x256xi1>, vector<8x256xf32>
    %c1_i32_195 = arith.constant 1 : i32
    %688 = tpu.dynamic_rotate %677 by %c1_i32_195 dim 1 : vector<8x256xf32>, i32 -> vector<8x256xf32>
    %c1_i32_196 = arith.constant 1 : i32
    %689 = vector.broadcast %c1_i32_196 : i32 to vector<8x256xi32>
    %690 = arith.cmpi sge, %3, %689 : vector<8x256xi32>
    %cst_197 = arith.constant 0.000000e+00 : f32
    %691 = vector.broadcast %cst_197 : f32 to vector<8x256xf32>
    %692 = arith.select %690, %688, %691 : vector<8x256xi1>, vector<8x256xf32>
    %c255_i32_198 = arith.constant 255 : i32
    %693 = tpu.dynamic_rotate %677 by %c255_i32_198 dim 1 : vector<8x256xf32>, i32 -> vector<8x256xf32>
    %c15_i32_199 = arith.constant 15 : i32
    %694 = vector.broadcast %c15_i32_199 : i32 to vector<8x256xi32>
    %695 = arith.cmpi slt, %3, %694 : vector<8x256xi32>
    %cst_200 = arith.constant 0.000000e+00 : f32
    %696 = vector.broadcast %cst_200 : f32 to vector<8x256xf32>
    %697 = arith.select %695, %693, %696 : vector<8x256xi1>, vector<8x256xf32>
    %c254_i32 = arith.constant 254 : i32
    %698 = tpu.dynamic_rotate %677 by %c254_i32 dim 1 : vector<8x256xf32>, i32 -> vector<8x256xf32>
    %c14_i32 = arith.constant 14 : i32
    %699 = vector.broadcast %c14_i32 : i32 to vector<8x256xi32>
    %700 = arith.cmpi slt, %3, %699 : vector<8x256xi32>
    %cst_201 = arith.constant 0.000000e+00 : f32
    %701 = vector.broadcast %cst_201 : f32 to vector<8x256xf32>
    %702 = arith.select %700, %698, %701 : vector<8x256xi1>, vector<8x256xf32>
    %c253_i32 = arith.constant 253 : i32
    %703 = tpu.dynamic_rotate %677 by %c253_i32 dim 1 : vector<8x256xf32>, i32 -> vector<8x256xf32>
    %c13_i32 = arith.constant 13 : i32
    %704 = vector.broadcast %c13_i32 : i32 to vector<8x256xi32>
    %705 = arith.cmpi slt, %3, %704 : vector<8x256xi32>
    %cst_202 = arith.constant 0.000000e+00 : f32
    %706 = vector.broadcast %cst_202 : f32 to vector<8x256xf32>
    %707 = arith.select %705, %703, %706 : vector<8x256xi1>, vector<8x256xf32>
    %c3_i32_203 = arith.constant 3 : i32
    %708 = tpu.dynamic_rotate %675 by %c3_i32_203 dim 1 : vector<8x256xf32>, i32 -> vector<8x256xf32>
    %c3_i32_204 = arith.constant 3 : i32
    %709 = vector.broadcast %c3_i32_204 : i32 to vector<8x256xi32>
    %710 = arith.cmpi sge, %3, %709 : vector<8x256xi32>
    %cst_205 = arith.constant 0.000000e+00 : f32
    %711 = vector.broadcast %cst_205 : f32 to vector<8x256xf32>
    %712 = arith.select %710, %708, %711 : vector<8x256xi1>, vector<8x256xf32>
    %c2_i32_206 = arith.constant 2 : i32
    %713 = tpu.dynamic_rotate %675 by %c2_i32_206 dim 1 : vector<8x256xf32>, i32 -> vector<8x256xf32>
    %c2_i32_207 = arith.constant 2 : i32
    %714 = vector.broadcast %c2_i32_207 : i32 to vector<8x256xi32>
    %715 = arith.cmpi sge, %3, %714 : vector<8x256xi32>
    %cst_208 = arith.constant 0.000000e+00 : f32
    %716 = vector.broadcast %cst_208 : f32 to vector<8x256xf32>
    %717 = arith.select %715, %713, %716 : vector<8x256xi1>, vector<8x256xf32>
    %c1_i32_209 = arith.constant 1 : i32
    %718 = tpu.dynamic_rotate %675 by %c1_i32_209 dim 1 : vector<8x256xf32>, i32 -> vector<8x256xf32>
    %c1_i32_210 = arith.constant 1 : i32
    %719 = vector.broadcast %c1_i32_210 : i32 to vector<8x256xi32>
    %720 = arith.cmpi sge, %3, %719 : vector<8x256xi32>
    %cst_211 = arith.constant 0.000000e+00 : f32
    %721 = vector.broadcast %cst_211 : f32 to vector<8x256xf32>
    %722 = arith.select %720, %718, %721 : vector<8x256xi1>, vector<8x256xf32>
    %c255_i32_212 = arith.constant 255 : i32
    %723 = tpu.dynamic_rotate %675 by %c255_i32_212 dim 1 : vector<8x256xf32>, i32 -> vector<8x256xf32>
    %c15_i32_213 = arith.constant 15 : i32
    %724 = vector.broadcast %c15_i32_213 : i32 to vector<8x256xi32>
    %725 = arith.cmpi slt, %3, %724 : vector<8x256xi32>
    %cst_214 = arith.constant 0.000000e+00 : f32
    %726 = vector.broadcast %cst_214 : f32 to vector<8x256xf32>
    %727 = arith.select %725, %723, %726 : vector<8x256xi1>, vector<8x256xf32>
    %c254_i32_215 = arith.constant 254 : i32
    %728 = tpu.dynamic_rotate %675 by %c254_i32_215 dim 1 : vector<8x256xf32>, i32 -> vector<8x256xf32>
    %c14_i32_216 = arith.constant 14 : i32
    %729 = vector.broadcast %c14_i32_216 : i32 to vector<8x256xi32>
    %730 = arith.cmpi slt, %3, %729 : vector<8x256xi32>
    %cst_217 = arith.constant 0.000000e+00 : f32
    %731 = vector.broadcast %cst_217 : f32 to vector<8x256xf32>
    %732 = arith.select %730, %728, %731 : vector<8x256xi1>, vector<8x256xf32>
    %c253_i32_218 = arith.constant 253 : i32
    %733 = tpu.dynamic_rotate %675 by %c253_i32_218 dim 1 : vector<8x256xf32>, i32 -> vector<8x256xf32>
    %c13_i32_219 = arith.constant 13 : i32
    %734 = vector.broadcast %c13_i32_219 : i32 to vector<8x256xi32>
    %735 = arith.cmpi slt, %3, %734 : vector<8x256xi32>
    %cst_220 = arith.constant 0.000000e+00 : f32
    %736 = vector.broadcast %cst_220 : f32 to vector<8x256xf32>
    %737 = arith.select %735, %733, %736 : vector<8x256xi1>, vector<8x256xf32>
    %c0_221 = arith.constant 0 : index
    %738 = memref.load %arg6[%c0_221] : memref<99xf32, #tpu.memory_space<smem>>
    %739 = vector.broadcast %738 : f32 to vector<8x256xf32>
    %740 = arith.mulf %739, %682 : vector<8x256xf32>
    %c1_222 = arith.constant 1 : index
    %741 = memref.load %arg6[%c1_222] : memref<99xf32, #tpu.memory_space<smem>>
    %742 = vector.broadcast %741 : f32 to vector<8x256xf32>
    %743 = arith.mulf %742, %687 : vector<8x256xf32>
    %744 = arith.addf %740, %743 : vector<8x256xf32>
    %c2_223 = arith.constant 2 : index
    %745 = memref.load %arg6[%c2_223] : memref<99xf32, #tpu.memory_space<smem>>
    %746 = vector.broadcast %745 : f32 to vector<8x256xf32>
    %747 = arith.mulf %746, %692 : vector<8x256xf32>
    %748 = arith.addf %744, %747 : vector<8x256xf32>
    %c3_224 = arith.constant 3 : index
    %749 = memref.load %arg6[%c3_224] : memref<99xf32, #tpu.memory_space<smem>>
    %750 = vector.broadcast %749 : f32 to vector<8x256xf32>
    %751 = arith.mulf %750, %677 : vector<8x256xf32>
    %752 = arith.addf %748, %751 : vector<8x256xf32>
    %c4_225 = arith.constant 4 : index
    %753 = memref.load %arg6[%c4_225] : memref<99xf32, #tpu.memory_space<smem>>
    %754 = vector.broadcast %753 : f32 to vector<8x256xf32>
    %755 = arith.mulf %754, %697 : vector<8x256xf32>
    %756 = arith.addf %752, %755 : vector<8x256xf32>
    %c5_226 = arith.constant 5 : index
    %757 = memref.load %arg6[%c5_226] : memref<99xf32, #tpu.memory_space<smem>>
    %758 = vector.broadcast %757 : f32 to vector<8x256xf32>
    %759 = arith.mulf %758, %702 : vector<8x256xf32>
    %760 = arith.addf %756, %759 : vector<8x256xf32>
    %c6_227 = arith.constant 6 : index
    %761 = memref.load %arg6[%c6_227] : memref<99xf32, #tpu.memory_space<smem>>
    %762 = vector.broadcast %761 : f32 to vector<8x256xf32>
    %763 = arith.mulf %762, %707 : vector<8x256xf32>
    %764 = arith.addf %760, %763 : vector<8x256xf32>
    %c49 = arith.constant 49 : index
    %765 = memref.load %arg6[%c49] : memref<99xf32, #tpu.memory_space<smem>>
    %766 = vector.broadcast %765 : f32 to vector<8x256xf32>
    %767 = arith.mulf %766, %712 : vector<8x256xf32>
    %768 = arith.addf %764, %767 : vector<8x256xf32>
    %c50 = arith.constant 50 : index
    %769 = memref.load %arg6[%c50] : memref<99xf32, #tpu.memory_space<smem>>
    %770 = vector.broadcast %769 : f32 to vector<8x256xf32>
    %771 = arith.mulf %770, %717 : vector<8x256xf32>
    %772 = arith.addf %768, %771 : vector<8x256xf32>
    %c51 = arith.constant 51 : index
    %773 = memref.load %arg6[%c51] : memref<99xf32, #tpu.memory_space<smem>>
    %774 = vector.broadcast %773 : f32 to vector<8x256xf32>
    %775 = arith.mulf %774, %722 : vector<8x256xf32>
    %776 = arith.addf %772, %775 : vector<8x256xf32>
    %c52 = arith.constant 52 : index
    %777 = memref.load %arg6[%c52] : memref<99xf32, #tpu.memory_space<smem>>
    %778 = vector.broadcast %777 : f32 to vector<8x256xf32>
    %779 = arith.mulf %778, %675 : vector<8x256xf32>
    %780 = arith.addf %776, %779 : vector<8x256xf32>
    %c53 = arith.constant 53 : index
    %781 = memref.load %arg6[%c53] : memref<99xf32, #tpu.memory_space<smem>>
    %782 = vector.broadcast %781 : f32 to vector<8x256xf32>
    %783 = arith.mulf %782, %727 : vector<8x256xf32>
    %784 = arith.addf %780, %783 : vector<8x256xf32>
    %c54 = arith.constant 54 : index
    %785 = memref.load %arg6[%c54] : memref<99xf32, #tpu.memory_space<smem>>
    %786 = vector.broadcast %785 : f32 to vector<8x256xf32>
    %787 = arith.mulf %786, %732 : vector<8x256xf32>
    %788 = arith.addf %784, %787 : vector<8x256xf32>
    %c55 = arith.constant 55 : index
    %789 = memref.load %arg6[%c55] : memref<99xf32, #tpu.memory_space<smem>>
    %790 = vector.broadcast %789 : f32 to vector<8x256xf32>
    %791 = arith.mulf %790, %737 : vector<8x256xf32>
    %792 = arith.addf %788, %791 : vector<8x256xf32>
    %c48_i32 = arith.constant 48 : i32
    %793 = tpu.dynamic_rotate %792 by %c48_i32 dim 1 : vector<8x256xf32>, i32 -> vector<8x256xf32>
    %c48_i32_228 = arith.constant 48 : i32
    %794 = vector.broadcast %c48_i32_228 : i32 to vector<8x256xi32>
    %795 = arith.cmpi sge, %0, %794 : vector<8x256xi32>
    %cst_229 = arith.constant 0.000000e+00 : f32
    %796 = vector.broadcast %cst_229 : f32 to vector<8x256xf32>
    %797 = arith.select %795, %793, %796 : vector<8x256xi1>, vector<8x256xf32>
    %c7_230 = arith.constant 7 : index
    %798 = memref.load %arg6[%c7_230] : memref<99xf32, #tpu.memory_space<smem>>
    %799 = vector.broadcast %798 : f32 to vector<8x256xf32>
    %800 = arith.mulf %799, %682 : vector<8x256xf32>
    %c8_231 = arith.constant 8 : index
    %801 = memref.load %arg6[%c8_231] : memref<99xf32, #tpu.memory_space<smem>>
    %802 = vector.broadcast %801 : f32 to vector<8x256xf32>
    %803 = arith.mulf %802, %687 : vector<8x256xf32>
    %804 = arith.addf %800, %803 : vector<8x256xf32>
    %c9_232 = arith.constant 9 : index
    %805 = memref.load %arg6[%c9_232] : memref<99xf32, #tpu.memory_space<smem>>
    %806 = vector.broadcast %805 : f32 to vector<8x256xf32>
    %807 = arith.mulf %806, %692 : vector<8x256xf32>
    %808 = arith.addf %804, %807 : vector<8x256xf32>
    %c10_233 = arith.constant 10 : index
    %809 = memref.load %arg6[%c10_233] : memref<99xf32, #tpu.memory_space<smem>>
    %810 = vector.broadcast %809 : f32 to vector<8x256xf32>
    %811 = arith.mulf %810, %677 : vector<8x256xf32>
    %812 = arith.addf %808, %811 : vector<8x256xf32>
    %c11_234 = arith.constant 11 : index
    %813 = memref.load %arg6[%c11_234] : memref<99xf32, #tpu.memory_space<smem>>
    %814 = vector.broadcast %813 : f32 to vector<8x256xf32>
    %815 = arith.mulf %814, %697 : vector<8x256xf32>
    %816 = arith.addf %812, %815 : vector<8x256xf32>
    %c12_235 = arith.constant 12 : index
    %817 = memref.load %arg6[%c12_235] : memref<99xf32, #tpu.memory_space<smem>>
    %818 = vector.broadcast %817 : f32 to vector<8x256xf32>
    %819 = arith.mulf %818, %702 : vector<8x256xf32>
    %820 = arith.addf %816, %819 : vector<8x256xf32>
    %c13_236 = arith.constant 13 : index
    %821 = memref.load %arg6[%c13_236] : memref<99xf32, #tpu.memory_space<smem>>
    %822 = vector.broadcast %821 : f32 to vector<8x256xf32>
    %823 = arith.mulf %822, %707 : vector<8x256xf32>
    %824 = arith.addf %820, %823 : vector<8x256xf32>
    %c56 = arith.constant 56 : index
    %825 = memref.load %arg6[%c56] : memref<99xf32, #tpu.memory_space<smem>>
    %826 = vector.broadcast %825 : f32 to vector<8x256xf32>
    %827 = arith.mulf %826, %712 : vector<8x256xf32>
    %828 = arith.addf %824, %827 : vector<8x256xf32>
    %c57 = arith.constant 57 : index
    %829 = memref.load %arg6[%c57] : memref<99xf32, #tpu.memory_space<smem>>
    %830 = vector.broadcast %829 : f32 to vector<8x256xf32>
    %831 = arith.mulf %830, %717 : vector<8x256xf32>
    %832 = arith.addf %828, %831 : vector<8x256xf32>
    %c58 = arith.constant 58 : index
    %833 = memref.load %arg6[%c58] : memref<99xf32, #tpu.memory_space<smem>>
    %834 = vector.broadcast %833 : f32 to vector<8x256xf32>
    %835 = arith.mulf %834, %722 : vector<8x256xf32>
    %836 = arith.addf %832, %835 : vector<8x256xf32>
    %c59 = arith.constant 59 : index
    %837 = memref.load %arg6[%c59] : memref<99xf32, #tpu.memory_space<smem>>
    %838 = vector.broadcast %837 : f32 to vector<8x256xf32>
    %839 = arith.mulf %838, %675 : vector<8x256xf32>
    %840 = arith.addf %836, %839 : vector<8x256xf32>
    %c60 = arith.constant 60 : index
    %841 = memref.load %arg6[%c60] : memref<99xf32, #tpu.memory_space<smem>>
    %842 = vector.broadcast %841 : f32 to vector<8x256xf32>
    %843 = arith.mulf %842, %727 : vector<8x256xf32>
    %844 = arith.addf %840, %843 : vector<8x256xf32>
    %c61 = arith.constant 61 : index
    %845 = memref.load %arg6[%c61] : memref<99xf32, #tpu.memory_space<smem>>
    %846 = vector.broadcast %845 : f32 to vector<8x256xf32>
    %847 = arith.mulf %846, %732 : vector<8x256xf32>
    %848 = arith.addf %844, %847 : vector<8x256xf32>
    %c62 = arith.constant 62 : index
    %849 = memref.load %arg6[%c62] : memref<99xf32, #tpu.memory_space<smem>>
    %850 = vector.broadcast %849 : f32 to vector<8x256xf32>
    %851 = arith.mulf %850, %737 : vector<8x256xf32>
    %852 = arith.addf %848, %851 : vector<8x256xf32>
    %c32_i32 = arith.constant 32 : i32
    %853 = tpu.dynamic_rotate %852 by %c32_i32 dim 1 : vector<8x256xf32>, i32 -> vector<8x256xf32>
    %c32_i32_237 = arith.constant 32 : i32
    %854 = vector.broadcast %c32_i32_237 : i32 to vector<8x256xi32>
    %855 = arith.cmpi sge, %0, %854 : vector<8x256xi32>
    %cst_238 = arith.constant 0.000000e+00 : f32
    %856 = vector.broadcast %cst_238 : f32 to vector<8x256xf32>
    %857 = arith.select %855, %853, %856 : vector<8x256xi1>, vector<8x256xf32>
    %858 = arith.addf %797, %857 : vector<8x256xf32>
    %c14_239 = arith.constant 14 : index
    %859 = memref.load %arg6[%c14_239] : memref<99xf32, #tpu.memory_space<smem>>
    %860 = vector.broadcast %859 : f32 to vector<8x256xf32>
    %861 = arith.mulf %860, %682 : vector<8x256xf32>
    %c15_240 = arith.constant 15 : index
    %862 = memref.load %arg6[%c15_240] : memref<99xf32, #tpu.memory_space<smem>>
    %863 = vector.broadcast %862 : f32 to vector<8x256xf32>
    %864 = arith.mulf %863, %687 : vector<8x256xf32>
    %865 = arith.addf %861, %864 : vector<8x256xf32>
    %c16_241 = arith.constant 16 : index
    %866 = memref.load %arg6[%c16_241] : memref<99xf32, #tpu.memory_space<smem>>
    %867 = vector.broadcast %866 : f32 to vector<8x256xf32>
    %868 = arith.mulf %867, %692 : vector<8x256xf32>
    %869 = arith.addf %865, %868 : vector<8x256xf32>
    %c17_242 = arith.constant 17 : index
    %870 = memref.load %arg6[%c17_242] : memref<99xf32, #tpu.memory_space<smem>>
    %871 = vector.broadcast %870 : f32 to vector<8x256xf32>
    %872 = arith.mulf %871, %677 : vector<8x256xf32>
    %873 = arith.addf %869, %872 : vector<8x256xf32>
    %c18_243 = arith.constant 18 : index
    %874 = memref.load %arg6[%c18_243] : memref<99xf32, #tpu.memory_space<smem>>
    %875 = vector.broadcast %874 : f32 to vector<8x256xf32>
    %876 = arith.mulf %875, %697 : vector<8x256xf32>
    %877 = arith.addf %873, %876 : vector<8x256xf32>
    %c19_244 = arith.constant 19 : index
    %878 = memref.load %arg6[%c19_244] : memref<99xf32, #tpu.memory_space<smem>>
    %879 = vector.broadcast %878 : f32 to vector<8x256xf32>
    %880 = arith.mulf %879, %702 : vector<8x256xf32>
    %881 = arith.addf %877, %880 : vector<8x256xf32>
    %c20_245 = arith.constant 20 : index
    %882 = memref.load %arg6[%c20_245] : memref<99xf32, #tpu.memory_space<smem>>
    %883 = vector.broadcast %882 : f32 to vector<8x256xf32>
    %884 = arith.mulf %883, %707 : vector<8x256xf32>
    %885 = arith.addf %881, %884 : vector<8x256xf32>
    %c63 = arith.constant 63 : index
    %886 = memref.load %arg6[%c63] : memref<99xf32, #tpu.memory_space<smem>>
    %887 = vector.broadcast %886 : f32 to vector<8x256xf32>
    %888 = arith.mulf %887, %712 : vector<8x256xf32>
    %889 = arith.addf %885, %888 : vector<8x256xf32>
    %c64 = arith.constant 64 : index
    %890 = memref.load %arg6[%c64] : memref<99xf32, #tpu.memory_space<smem>>
    %891 = vector.broadcast %890 : f32 to vector<8x256xf32>
    %892 = arith.mulf %891, %717 : vector<8x256xf32>
    %893 = arith.addf %889, %892 : vector<8x256xf32>
    %c65 = arith.constant 65 : index
    %894 = memref.load %arg6[%c65] : memref<99xf32, #tpu.memory_space<smem>>
    %895 = vector.broadcast %894 : f32 to vector<8x256xf32>
    %896 = arith.mulf %895, %722 : vector<8x256xf32>
    %897 = arith.addf %893, %896 : vector<8x256xf32>
    %c66 = arith.constant 66 : index
    %898 = memref.load %arg6[%c66] : memref<99xf32, #tpu.memory_space<smem>>
    %899 = vector.broadcast %898 : f32 to vector<8x256xf32>
    %900 = arith.mulf %899, %675 : vector<8x256xf32>
    %901 = arith.addf %897, %900 : vector<8x256xf32>
    %c67 = arith.constant 67 : index
    %902 = memref.load %arg6[%c67] : memref<99xf32, #tpu.memory_space<smem>>
    %903 = vector.broadcast %902 : f32 to vector<8x256xf32>
    %904 = arith.mulf %903, %727 : vector<8x256xf32>
    %905 = arith.addf %901, %904 : vector<8x256xf32>
    %c68 = arith.constant 68 : index
    %906 = memref.load %arg6[%c68] : memref<99xf32, #tpu.memory_space<smem>>
    %907 = vector.broadcast %906 : f32 to vector<8x256xf32>
    %908 = arith.mulf %907, %732 : vector<8x256xf32>
    %909 = arith.addf %905, %908 : vector<8x256xf32>
    %c69 = arith.constant 69 : index
    %910 = memref.load %arg6[%c69] : memref<99xf32, #tpu.memory_space<smem>>
    %911 = vector.broadcast %910 : f32 to vector<8x256xf32>
    %912 = arith.mulf %911, %737 : vector<8x256xf32>
    %913 = arith.addf %909, %912 : vector<8x256xf32>
    %c16_i32_246 = arith.constant 16 : i32
    %914 = tpu.dynamic_rotate %913 by %c16_i32_246 dim 1 : vector<8x256xf32>, i32 -> vector<8x256xf32>
    %c16_i32_247 = arith.constant 16 : i32
    %915 = vector.broadcast %c16_i32_247 : i32 to vector<8x256xi32>
    %916 = arith.cmpi sge, %0, %915 : vector<8x256xi32>
    %cst_248 = arith.constant 0.000000e+00 : f32
    %917 = vector.broadcast %cst_248 : f32 to vector<8x256xf32>
    %918 = arith.select %916, %914, %917 : vector<8x256xi1>, vector<8x256xf32>
    %919 = arith.addf %858, %918 : vector<8x256xf32>
    %c21_249 = arith.constant 21 : index
    %920 = memref.load %arg6[%c21_249] : memref<99xf32, #tpu.memory_space<smem>>
    %921 = vector.broadcast %920 : f32 to vector<8x256xf32>
    %922 = arith.mulf %921, %682 : vector<8x256xf32>
    %c22_250 = arith.constant 22 : index
    %923 = memref.load %arg6[%c22_250] : memref<99xf32, #tpu.memory_space<smem>>
    %924 = vector.broadcast %923 : f32 to vector<8x256xf32>
    %925 = arith.mulf %924, %687 : vector<8x256xf32>
    %926 = arith.addf %922, %925 : vector<8x256xf32>
    %c23_251 = arith.constant 23 : index
    %927 = memref.load %arg6[%c23_251] : memref<99xf32, #tpu.memory_space<smem>>
    %928 = vector.broadcast %927 : f32 to vector<8x256xf32>
    %929 = arith.mulf %928, %692 : vector<8x256xf32>
    %930 = arith.addf %926, %929 : vector<8x256xf32>
    %c24_252 = arith.constant 24 : index
    %931 = memref.load %arg6[%c24_252] : memref<99xf32, #tpu.memory_space<smem>>
    %932 = vector.broadcast %931 : f32 to vector<8x256xf32>
    %933 = arith.mulf %932, %677 : vector<8x256xf32>
    %934 = arith.addf %930, %933 : vector<8x256xf32>
    %c25_253 = arith.constant 25 : index
    %935 = memref.load %arg6[%c25_253] : memref<99xf32, #tpu.memory_space<smem>>
    %936 = vector.broadcast %935 : f32 to vector<8x256xf32>
    %937 = arith.mulf %936, %697 : vector<8x256xf32>
    %938 = arith.addf %934, %937 : vector<8x256xf32>
    %c26_254 = arith.constant 26 : index
    %939 = memref.load %arg6[%c26_254] : memref<99xf32, #tpu.memory_space<smem>>
    %940 = vector.broadcast %939 : f32 to vector<8x256xf32>
    %941 = arith.mulf %940, %702 : vector<8x256xf32>
    %942 = arith.addf %938, %941 : vector<8x256xf32>
    %c27_255 = arith.constant 27 : index
    %943 = memref.load %arg6[%c27_255] : memref<99xf32, #tpu.memory_space<smem>>
    %944 = vector.broadcast %943 : f32 to vector<8x256xf32>
    %945 = arith.mulf %944, %707 : vector<8x256xf32>
    %946 = arith.addf %942, %945 : vector<8x256xf32>
    %c70 = arith.constant 70 : index
    %947 = memref.load %arg6[%c70] : memref<99xf32, #tpu.memory_space<smem>>
    %948 = vector.broadcast %947 : f32 to vector<8x256xf32>
    %949 = arith.mulf %948, %712 : vector<8x256xf32>
    %950 = arith.addf %946, %949 : vector<8x256xf32>
    %c71 = arith.constant 71 : index
    %951 = memref.load %arg6[%c71] : memref<99xf32, #tpu.memory_space<smem>>
    %952 = vector.broadcast %951 : f32 to vector<8x256xf32>
    %953 = arith.mulf %952, %717 : vector<8x256xf32>
    %954 = arith.addf %950, %953 : vector<8x256xf32>
    %c72 = arith.constant 72 : index
    %955 = memref.load %arg6[%c72] : memref<99xf32, #tpu.memory_space<smem>>
    %956 = vector.broadcast %955 : f32 to vector<8x256xf32>
    %957 = arith.mulf %956, %722 : vector<8x256xf32>
    %958 = arith.addf %954, %957 : vector<8x256xf32>
    %c73 = arith.constant 73 : index
    %959 = memref.load %arg6[%c73] : memref<99xf32, #tpu.memory_space<smem>>
    %960 = vector.broadcast %959 : f32 to vector<8x256xf32>
    %961 = arith.mulf %960, %675 : vector<8x256xf32>
    %962 = arith.addf %958, %961 : vector<8x256xf32>
    %c74 = arith.constant 74 : index
    %963 = memref.load %arg6[%c74] : memref<99xf32, #tpu.memory_space<smem>>
    %964 = vector.broadcast %963 : f32 to vector<8x256xf32>
    %965 = arith.mulf %964, %727 : vector<8x256xf32>
    %966 = arith.addf %962, %965 : vector<8x256xf32>
    %c75 = arith.constant 75 : index
    %967 = memref.load %arg6[%c75] : memref<99xf32, #tpu.memory_space<smem>>
    %968 = vector.broadcast %967 : f32 to vector<8x256xf32>
    %969 = arith.mulf %968, %732 : vector<8x256xf32>
    %970 = arith.addf %966, %969 : vector<8x256xf32>
    %c76 = arith.constant 76 : index
    %971 = memref.load %arg6[%c76] : memref<99xf32, #tpu.memory_space<smem>>
    %972 = vector.broadcast %971 : f32 to vector<8x256xf32>
    %973 = arith.mulf %972, %737 : vector<8x256xf32>
    %974 = arith.addf %970, %973 : vector<8x256xf32>
    %975 = arith.addf %919, %974 : vector<8x256xf32>
    %c28_256 = arith.constant 28 : index
    %976 = memref.load %arg6[%c28_256] : memref<99xf32, #tpu.memory_space<smem>>
    %977 = vector.broadcast %976 : f32 to vector<8x256xf32>
    %978 = arith.mulf %977, %682 : vector<8x256xf32>
    %c29_257 = arith.constant 29 : index
    %979 = memref.load %arg6[%c29_257] : memref<99xf32, #tpu.memory_space<smem>>
    %980 = vector.broadcast %979 : f32 to vector<8x256xf32>
    %981 = arith.mulf %980, %687 : vector<8x256xf32>
    %982 = arith.addf %978, %981 : vector<8x256xf32>
    %c30_258 = arith.constant 30 : index
    %983 = memref.load %arg6[%c30_258] : memref<99xf32, #tpu.memory_space<smem>>
    %984 = vector.broadcast %983 : f32 to vector<8x256xf32>
    %985 = arith.mulf %984, %692 : vector<8x256xf32>
    %986 = arith.addf %982, %985 : vector<8x256xf32>
    %c31_259 = arith.constant 31 : index
    %987 = memref.load %arg6[%c31_259] : memref<99xf32, #tpu.memory_space<smem>>
    %988 = vector.broadcast %987 : f32 to vector<8x256xf32>
    %989 = arith.mulf %988, %677 : vector<8x256xf32>
    %990 = arith.addf %986, %989 : vector<8x256xf32>
    %c32_260 = arith.constant 32 : index
    %991 = memref.load %arg6[%c32_260] : memref<99xf32, #tpu.memory_space<smem>>
    %992 = vector.broadcast %991 : f32 to vector<8x256xf32>
    %993 = arith.mulf %992, %697 : vector<8x256xf32>
    %994 = arith.addf %990, %993 : vector<8x256xf32>
    %c33_261 = arith.constant 33 : index
    %995 = memref.load %arg6[%c33_261] : memref<99xf32, #tpu.memory_space<smem>>
    %996 = vector.broadcast %995 : f32 to vector<8x256xf32>
    %997 = arith.mulf %996, %702 : vector<8x256xf32>
    %998 = arith.addf %994, %997 : vector<8x256xf32>
    %c34_262 = arith.constant 34 : index
    %999 = memref.load %arg6[%c34_262] : memref<99xf32, #tpu.memory_space<smem>>
    %1000 = vector.broadcast %999 : f32 to vector<8x256xf32>
    %1001 = arith.mulf %1000, %707 : vector<8x256xf32>
    %1002 = arith.addf %998, %1001 : vector<8x256xf32>
    %c77 = arith.constant 77 : index
    %1003 = memref.load %arg6[%c77] : memref<99xf32, #tpu.memory_space<smem>>
    %1004 = vector.broadcast %1003 : f32 to vector<8x256xf32>
    %1005 = arith.mulf %1004, %712 : vector<8x256xf32>
    %1006 = arith.addf %1002, %1005 : vector<8x256xf32>
    %c78 = arith.constant 78 : index
    %1007 = memref.load %arg6[%c78] : memref<99xf32, #tpu.memory_space<smem>>
    %1008 = vector.broadcast %1007 : f32 to vector<8x256xf32>
    %1009 = arith.mulf %1008, %717 : vector<8x256xf32>
    %1010 = arith.addf %1006, %1009 : vector<8x256xf32>
    %c79 = arith.constant 79 : index
    %1011 = memref.load %arg6[%c79] : memref<99xf32, #tpu.memory_space<smem>>
    %1012 = vector.broadcast %1011 : f32 to vector<8x256xf32>
    %1013 = arith.mulf %1012, %722 : vector<8x256xf32>
    %1014 = arith.addf %1010, %1013 : vector<8x256xf32>
    %c80 = arith.constant 80 : index
    %1015 = memref.load %arg6[%c80] : memref<99xf32, #tpu.memory_space<smem>>
    %1016 = vector.broadcast %1015 : f32 to vector<8x256xf32>
    %1017 = arith.mulf %1016, %675 : vector<8x256xf32>
    %1018 = arith.addf %1014, %1017 : vector<8x256xf32>
    %c81 = arith.constant 81 : index
    %1019 = memref.load %arg6[%c81] : memref<99xf32, #tpu.memory_space<smem>>
    %1020 = vector.broadcast %1019 : f32 to vector<8x256xf32>
    %1021 = arith.mulf %1020, %727 : vector<8x256xf32>
    %1022 = arith.addf %1018, %1021 : vector<8x256xf32>
    %c82 = arith.constant 82 : index
    %1023 = memref.load %arg6[%c82] : memref<99xf32, #tpu.memory_space<smem>>
    %1024 = vector.broadcast %1023 : f32 to vector<8x256xf32>
    %1025 = arith.mulf %1024, %732 : vector<8x256xf32>
    %1026 = arith.addf %1022, %1025 : vector<8x256xf32>
    %c83 = arith.constant 83 : index
    %1027 = memref.load %arg6[%c83] : memref<99xf32, #tpu.memory_space<smem>>
    %1028 = vector.broadcast %1027 : f32 to vector<8x256xf32>
    %1029 = arith.mulf %1028, %737 : vector<8x256xf32>
    %1030 = arith.addf %1026, %1029 : vector<8x256xf32>
    %c240_i32_263 = arith.constant 240 : i32
    %1031 = tpu.dynamic_rotate %1030 by %c240_i32_263 dim 1 : vector<8x256xf32>, i32 -> vector<8x256xf32>
    %c240_i32_264 = arith.constant 240 : i32
    %1032 = vector.broadcast %c240_i32_264 : i32 to vector<8x256xi32>
    %1033 = arith.cmpi slt, %0, %1032 : vector<8x256xi32>
    %cst_265 = arith.constant 0.000000e+00 : f32
    %1034 = vector.broadcast %cst_265 : f32 to vector<8x256xf32>
    %1035 = arith.select %1033, %1031, %1034 : vector<8x256xi1>, vector<8x256xf32>
    %1036 = arith.addf %975, %1035 : vector<8x256xf32>
    %c35_266 = arith.constant 35 : index
    %1037 = memref.load %arg6[%c35_266] : memref<99xf32, #tpu.memory_space<smem>>
    %1038 = vector.broadcast %1037 : f32 to vector<8x256xf32>
    %1039 = arith.mulf %1038, %682 : vector<8x256xf32>
    %c36 = arith.constant 36 : index
    %1040 = memref.load %arg6[%c36] : memref<99xf32, #tpu.memory_space<smem>>
    %1041 = vector.broadcast %1040 : f32 to vector<8x256xf32>
    %1042 = arith.mulf %1041, %687 : vector<8x256xf32>
    %1043 = arith.addf %1039, %1042 : vector<8x256xf32>
    %c37 = arith.constant 37 : index
    %1044 = memref.load %arg6[%c37] : memref<99xf32, #tpu.memory_space<smem>>
    %1045 = vector.broadcast %1044 : f32 to vector<8x256xf32>
    %1046 = arith.mulf %1045, %692 : vector<8x256xf32>
    %1047 = arith.addf %1043, %1046 : vector<8x256xf32>
    %c38 = arith.constant 38 : index
    %1048 = memref.load %arg6[%c38] : memref<99xf32, #tpu.memory_space<smem>>
    %1049 = vector.broadcast %1048 : f32 to vector<8x256xf32>
    %1050 = arith.mulf %1049, %677 : vector<8x256xf32>
    %1051 = arith.addf %1047, %1050 : vector<8x256xf32>
    %c39 = arith.constant 39 : index
    %1052 = memref.load %arg6[%c39] : memref<99xf32, #tpu.memory_space<smem>>
    %1053 = vector.broadcast %1052 : f32 to vector<8x256xf32>
    %1054 = arith.mulf %1053, %697 : vector<8x256xf32>
    %1055 = arith.addf %1051, %1054 : vector<8x256xf32>
    %c40 = arith.constant 40 : index
    %1056 = memref.load %arg6[%c40] : memref<99xf32, #tpu.memory_space<smem>>
    %1057 = vector.broadcast %1056 : f32 to vector<8x256xf32>
    %1058 = arith.mulf %1057, %702 : vector<8x256xf32>
    %1059 = arith.addf %1055, %1058 : vector<8x256xf32>
    %c41 = arith.constant 41 : index
    %1060 = memref.load %arg6[%c41] : memref<99xf32, #tpu.memory_space<smem>>
    %1061 = vector.broadcast %1060 : f32 to vector<8x256xf32>
    %1062 = arith.mulf %1061, %707 : vector<8x256xf32>
    %1063 = arith.addf %1059, %1062 : vector<8x256xf32>
    %c84 = arith.constant 84 : index
    %1064 = memref.load %arg6[%c84] : memref<99xf32, #tpu.memory_space<smem>>
    %1065 = vector.broadcast %1064 : f32 to vector<8x256xf32>
    %1066 = arith.mulf %1065, %712 : vector<8x256xf32>
    %1067 = arith.addf %1063, %1066 : vector<8x256xf32>
    %c85 = arith.constant 85 : index
    %1068 = memref.load %arg6[%c85] : memref<99xf32, #tpu.memory_space<smem>>
    %1069 = vector.broadcast %1068 : f32 to vector<8x256xf32>
    %1070 = arith.mulf %1069, %717 : vector<8x256xf32>
    %1071 = arith.addf %1067, %1070 : vector<8x256xf32>
    %c86 = arith.constant 86 : index
    %1072 = memref.load %arg6[%c86] : memref<99xf32, #tpu.memory_space<smem>>
    %1073 = vector.broadcast %1072 : f32 to vector<8x256xf32>
    %1074 = arith.mulf %1073, %722 : vector<8x256xf32>
    %1075 = arith.addf %1071, %1074 : vector<8x256xf32>
    %c87 = arith.constant 87 : index
    %1076 = memref.load %arg6[%c87] : memref<99xf32, #tpu.memory_space<smem>>
    %1077 = vector.broadcast %1076 : f32 to vector<8x256xf32>
    %1078 = arith.mulf %1077, %675 : vector<8x256xf32>
    %1079 = arith.addf %1075, %1078 : vector<8x256xf32>
    %c88 = arith.constant 88 : index
    %1080 = memref.load %arg6[%c88] : memref<99xf32, #tpu.memory_space<smem>>
    %1081 = vector.broadcast %1080 : f32 to vector<8x256xf32>
    %1082 = arith.mulf %1081, %727 : vector<8x256xf32>
    %1083 = arith.addf %1079, %1082 : vector<8x256xf32>
    %c89 = arith.constant 89 : index
    %1084 = memref.load %arg6[%c89] : memref<99xf32, #tpu.memory_space<smem>>
    %1085 = vector.broadcast %1084 : f32 to vector<8x256xf32>
    %1086 = arith.mulf %1085, %732 : vector<8x256xf32>
    %1087 = arith.addf %1083, %1086 : vector<8x256xf32>
    %c90 = arith.constant 90 : index
    %1088 = memref.load %arg6[%c90] : memref<99xf32, #tpu.memory_space<smem>>
    %1089 = vector.broadcast %1088 : f32 to vector<8x256xf32>
    %1090 = arith.mulf %1089, %737 : vector<8x256xf32>
    %1091 = arith.addf %1087, %1090 : vector<8x256xf32>
    %c224_i32 = arith.constant 224 : i32
    %1092 = tpu.dynamic_rotate %1091 by %c224_i32 dim 1 : vector<8x256xf32>, i32 -> vector<8x256xf32>
    %c224_i32_267 = arith.constant 224 : i32
    %1093 = vector.broadcast %c224_i32_267 : i32 to vector<8x256xi32>
    %1094 = arith.cmpi slt, %0, %1093 : vector<8x256xi32>
    %cst_268 = arith.constant 0.000000e+00 : f32
    %1095 = vector.broadcast %cst_268 : f32 to vector<8x256xf32>
    %1096 = arith.select %1094, %1092, %1095 : vector<8x256xi1>, vector<8x256xf32>
    %1097 = arith.addf %1036, %1096 : vector<8x256xf32>
    %c42 = arith.constant 42 : index
    %1098 = memref.load %arg6[%c42] : memref<99xf32, #tpu.memory_space<smem>>
    %1099 = vector.broadcast %1098 : f32 to vector<8x256xf32>
    %1100 = arith.mulf %1099, %682 : vector<8x256xf32>
    %c43 = arith.constant 43 : index
    %1101 = memref.load %arg6[%c43] : memref<99xf32, #tpu.memory_space<smem>>
    %1102 = vector.broadcast %1101 : f32 to vector<8x256xf32>
    %1103 = arith.mulf %1102, %687 : vector<8x256xf32>
    %1104 = arith.addf %1100, %1103 : vector<8x256xf32>
    %c44 = arith.constant 44 : index
    %1105 = memref.load %arg6[%c44] : memref<99xf32, #tpu.memory_space<smem>>
    %1106 = vector.broadcast %1105 : f32 to vector<8x256xf32>
    %1107 = arith.mulf %1106, %692 : vector<8x256xf32>
    %1108 = arith.addf %1104, %1107 : vector<8x256xf32>
    %c45 = arith.constant 45 : index
    %1109 = memref.load %arg6[%c45] : memref<99xf32, #tpu.memory_space<smem>>
    %1110 = vector.broadcast %1109 : f32 to vector<8x256xf32>
    %1111 = arith.mulf %1110, %677 : vector<8x256xf32>
    %1112 = arith.addf %1108, %1111 : vector<8x256xf32>
    %c46 = arith.constant 46 : index
    %1113 = memref.load %arg6[%c46] : memref<99xf32, #tpu.memory_space<smem>>
    %1114 = vector.broadcast %1113 : f32 to vector<8x256xf32>
    %1115 = arith.mulf %1114, %697 : vector<8x256xf32>
    %1116 = arith.addf %1112, %1115 : vector<8x256xf32>
    %c47 = arith.constant 47 : index
    %1117 = memref.load %arg6[%c47] : memref<99xf32, #tpu.memory_space<smem>>
    %1118 = vector.broadcast %1117 : f32 to vector<8x256xf32>
    %1119 = arith.mulf %1118, %702 : vector<8x256xf32>
    %1120 = arith.addf %1116, %1119 : vector<8x256xf32>
    %c48 = arith.constant 48 : index
    %1121 = memref.load %arg6[%c48] : memref<99xf32, #tpu.memory_space<smem>>
    %1122 = vector.broadcast %1121 : f32 to vector<8x256xf32>
    %1123 = arith.mulf %1122, %707 : vector<8x256xf32>
    %1124 = arith.addf %1120, %1123 : vector<8x256xf32>
    %c91 = arith.constant 91 : index
    %1125 = memref.load %arg6[%c91] : memref<99xf32, #tpu.memory_space<smem>>
    %1126 = vector.broadcast %1125 : f32 to vector<8x256xf32>
    %1127 = arith.mulf %1126, %712 : vector<8x256xf32>
    %1128 = arith.addf %1124, %1127 : vector<8x256xf32>
    %c92 = arith.constant 92 : index
    %1129 = memref.load %arg6[%c92] : memref<99xf32, #tpu.memory_space<smem>>
    %1130 = vector.broadcast %1129 : f32 to vector<8x256xf32>
    %1131 = arith.mulf %1130, %717 : vector<8x256xf32>
    %1132 = arith.addf %1128, %1131 : vector<8x256xf32>
    %c93 = arith.constant 93 : index
    %1133 = memref.load %arg6[%c93] : memref<99xf32, #tpu.memory_space<smem>>
    %1134 = vector.broadcast %1133 : f32 to vector<8x256xf32>
    %1135 = arith.mulf %1134, %722 : vector<8x256xf32>
    %1136 = arith.addf %1132, %1135 : vector<8x256xf32>
    %c94 = arith.constant 94 : index
    %1137 = memref.load %arg6[%c94] : memref<99xf32, #tpu.memory_space<smem>>
    %1138 = vector.broadcast %1137 : f32 to vector<8x256xf32>
    %1139 = arith.mulf %1138, %675 : vector<8x256xf32>
    %1140 = arith.addf %1136, %1139 : vector<8x256xf32>
    %c95 = arith.constant 95 : index
    %1141 = memref.load %arg6[%c95] : memref<99xf32, #tpu.memory_space<smem>>
    %1142 = vector.broadcast %1141 : f32 to vector<8x256xf32>
    %1143 = arith.mulf %1142, %727 : vector<8x256xf32>
    %1144 = arith.addf %1140, %1143 : vector<8x256xf32>
    %c96 = arith.constant 96 : index
    %1145 = memref.load %arg6[%c96] : memref<99xf32, #tpu.memory_space<smem>>
    %1146 = vector.broadcast %1145 : f32 to vector<8x256xf32>
    %1147 = arith.mulf %1146, %732 : vector<8x256xf32>
    %1148 = arith.addf %1144, %1147 : vector<8x256xf32>
    %c97 = arith.constant 97 : index
    %1149 = memref.load %arg6[%c97] : memref<99xf32, #tpu.memory_space<smem>>
    %1150 = vector.broadcast %1149 : f32 to vector<8x256xf32>
    %1151 = arith.mulf %1150, %737 : vector<8x256xf32>
    %1152 = arith.addf %1148, %1151 : vector<8x256xf32>
    %c208_i32 = arith.constant 208 : i32
    %1153 = tpu.dynamic_rotate %1152 by %c208_i32 dim 1 : vector<8x256xf32>, i32 -> vector<8x256xf32>
    %c208_i32_269 = arith.constant 208 : i32
    %1154 = vector.broadcast %c208_i32_269 : i32 to vector<8x256xi32>
    %1155 = arith.cmpi slt, %0, %1154 : vector<8x256xi32>
    %cst_270 = arith.constant 0.000000e+00 : f32
    %1156 = vector.broadcast %cst_270 : f32 to vector<8x256xf32>
    %1157 = arith.select %1155, %1153, %1156 : vector<8x256xi1>, vector<8x256xf32>
    %1158 = arith.addf %1097, %1157 : vector<8x256xf32>
    %c98 = arith.constant 98 : index
    %1159 = memref.load %arg6[%c98] : memref<99xf32, #tpu.memory_space<smem>>
    %1160 = vector.broadcast %1159 : f32 to vector<8x256xf32>
    %1161 = arith.addf %1158, %1160 : vector<8x256xf32>
    %1162 = arith.negf %1161 : vector<8x256xf32>
    %1163 = math.exp %1162 : vector<8x256xf32>
    %cst_271 = arith.constant 1.000000e+00 : f32
    %1164 = vector.broadcast %cst_271 : f32 to vector<8x256xf32>
    %1165 = arith.addf %1164, %1163 : vector<8x256xf32>
    %1166 = arith.divf %1164, %1165 : vector<8x256xf32>
    %c0_272 = arith.constant 0 : index
    %1167 = memref.load %arg7[%c0_272] : memref<4xf32, #tpu.memory_space<smem>>
    %c1_i32_273 = arith.constant 1 : i32
    %1168 = tpu.dynamic_rotate %1166 by %c1_i32_273 dim 0 : vector<8x256xf32>, i32 -> vector<8x256xf32>
    %c1_i32_274 = arith.constant 1 : i32
    %1169 = vector.broadcast %c1_i32_274 : i32 to vector<8x256xi32>
    %1170 = arith.cmpi sge, %1, %1169 : vector<8x256xi32>
    %cst_275 = arith.constant 0.000000e+00 : f32
    %1171 = vector.broadcast %cst_275 : f32 to vector<8x256xf32>
    %1172 = arith.select %1170, %1168, %1171 : vector<8x256xi1>, vector<8x256xf32>
    %1173 = vector.broadcast %1167 : f32 to vector<8x256xf32>
    %1174 = arith.mulf %1173, %1172 : vector<8x256xf32>
    %c1_276 = arith.constant 1 : index
    %1175 = memref.load %arg7[%c1_276] : memref<4xf32, #tpu.memory_space<smem>>
    %1176 = vector.broadcast %1175 : f32 to vector<8x256xf32>
    %1177 = arith.mulf %1176, %1166 : vector<8x256xf32>
    %1178 = arith.addf %1174, %1177 : vector<8x256xf32>
    %c2_277 = arith.constant 2 : index
    %1179 = memref.load %arg7[%c2_277] : memref<4xf32, #tpu.memory_space<smem>>
    %c7_i32_278 = arith.constant 7 : i32
    %1180 = tpu.dynamic_rotate %1166 by %c7_i32_278 dim 0 : vector<8x256xf32>, i32 -> vector<8x256xf32>
    %c7_i32_279 = arith.constant 7 : i32
    %1181 = vector.broadcast %c7_i32_279 : i32 to vector<8x256xi32>
    %1182 = arith.cmpi slt, %1, %1181 : vector<8x256xi32>
    %cst_280 = arith.constant 0.000000e+00 : f32
    %1183 = vector.broadcast %cst_280 : f32 to vector<8x256xf32>
    %1184 = arith.select %1182, %1180, %1183 : vector<8x256xi1>, vector<8x256xf32>
    %1185 = vector.broadcast %1179 : f32 to vector<8x256xf32>
    %1186 = arith.mulf %1185, %1184 : vector<8x256xf32>
    %1187 = arith.addf %1178, %1186 : vector<8x256xf32>
    %c3_281 = arith.constant 3 : index
    %1188 = memref.load %arg7[%c3_281] : memref<4xf32, #tpu.memory_space<smem>>
    %1189 = vector.broadcast %1188 : f32 to vector<8x256xf32>
    %1190 = arith.addf %1187, %1189 : vector<8x256xf32>
    %1191 = arith.negf %1190 : vector<8x256xf32>
    %1192 = math.exp %1191 : vector<8x256xf32>
    %cst_282 = arith.constant 1.000000e+00 : f32
    %1193 = vector.broadcast %cst_282 : f32 to vector<8x256xf32>
    %1194 = arith.addf %1193, %1192 : vector<8x256xf32>
    %1195 = arith.divf %1193, %1194 : vector<8x256xf32>
    %1196 = arith.mulf %1195, %628 : vector<8x256xf32>
    %1197 = arith.mulf %1195, %673 : vector<8x256xf32>
    %c0_283 = arith.constant 0 : index
    %c0_284 = arith.constant 0 : index
    %c0_285 = arith.constant 0 : index
    %c0_286 = arith.constant 0 : index
    %1198 = vector.load %arg8[%c0_283, %c0_284, %c0_285, %c0_286] : memref<1x2x8x256xf32, #tpu.memory_space<vmem>>, vector<1x1x8x256xf32>
    %1199 = vector.shape_cast %1198 : vector<1x1x8x256xf32> to vector<8x256xf32>
    %1200 = vector.shape_cast %1196 : vector<8x256xf32> to vector<1x1x8x256xf32>
    tpu.vector_store %arg8[%c0_283, %c0_284, %c0_285, %c0_286], %1200 {strides = array<i32>} : memref<1x2x8x256xf32, #tpu.memory_space<vmem>>, vector<1x1x8x256xf32>,
    %c0_287 = arith.constant 0 : index
    %c1_288 = arith.constant 1 : index
    %c0_289 = arith.constant 0 : index
    %c0_290 = arith.constant 0 : index
    %1201 = vector.load %arg8[%c0_287, %c1_288, %c0_289, %c0_290] : memref<1x2x8x256xf32, #tpu.memory_space<vmem>>, vector<1x1x8x256xf32>
    %1202 = vector.shape_cast %1201 : vector<1x1x8x256xf32> to vector<8x256xf32>
    %1203 = vector.shape_cast %1197 : vector<8x256xf32> to vector<1x1x8x256xf32>
    tpu.vector_store %arg8[%c0_287, %c1_288, %c0_289, %c0_290], %1203 {strides = array<i32>} : memref<1x2x8x256xf32, #tpu.memory_space<vmem>>, vector<1x1x8x256xf32>,
    return
  }
  func.func @transform_0(%arg0: i32) -> (i32, i32, i32, i32) {
    %c0_i32 = arith.constant 0 : i32
    %c0_i32_0 = arith.constant 0 : i32
    %c0_i32_1 = arith.constant 0 : i32
    %c0_i32_2 = arith.constant 0 : i32
    return %arg0, %c0_i32, %c0_i32_0, %c0_i32_1 : i32, i32, i32, i32
  }
  func.func @transform_1(%arg0: i32) -> i32 {
    %c0_i32 = arith.constant 0 : i32
    %c0_i32_0 = arith.constant 0 : i32
    return %c0_i32 : i32
  }
  func.func @transform_2(%arg0: i32) -> i32 {
    %c0_i32 = arith.constant 0 : i32
    %c0_i32_0 = arith.constant 0 : i32
    return %c0_i32 : i32
  }
  func.func @transform_3(%arg0: i32) -> i32 {
    %c0_i32 = arith.constant 0 : i32
    %c0_i32_0 = arith.constant 0 : i32
    return %c0_i32 : i32
  }
  func.func @transform_4(%arg0: i32) -> i32 {
    %c0_i32 = arith.constant 0 : i32
    %c0_i32_0 = arith.constant 0 : i32
    return %c0_i32 : i32
  }
  func.func @transform_5(%arg0: i32) -> i32 {
    %c0_i32 = arith.constant 0 : i32
    %c0_i32_0 = arith.constant 0 : i32
    return %c0_i32 : i32
  }
  func.func @transform_6(%arg0: i32) -> i32 {
    %c0_i32 = arith.constant 0 : i32
    %c0_i32_0 = arith.constant 0 : i32
    return %c0_i32 : i32
  }
  func.func @transform_7(%arg0: i32) -> (i32, i32, i32, i32) {
    %c0_i32 = arith.constant 0 : i32
    %c0_i32_0 = arith.constant 0 : i32
    %c0_i32_1 = arith.constant 0 : i32
    %c0_i32_2 = arith.constant 0 : i32
    return %arg0, %c0_i32, %c0_i32_0, %c0_i32_1 : i32, i32, i32, i32
  }
}

</mosaic_0001>

<bundles_post_ra>
// kernel: conv_block_sm2d_t_forward.1
= control target key start
LH: loop header
LB: loop body
LE: loop exit
PB: predicated region body
PF: predicated region fallthrough
CT: control target
= control target key end

     0   :  { %s5094_s0 = inlined_call_operand.vmem [shape: f32[2,2,8,256], index: 0, kind: input, shape index: {}]   ;;  %s5095_s1 = inlined_call_operand.vmem [shape: f32[36], index: 1, kind: input, shape index: {}]   ;;  %s5096_s2 = inlined_call_operand.vmem [shape: f32[12], index: 2, kind: input, shape index: {}]   ;;  %s5097_s3 = inlined_call_operand.vmem [shape: f32[36], index: 3, kind: input, shape index: {}]   ;;  %s5098_s4 = inlined_call_operand.vmem [shape: f32[12], index: 4, kind: input, shape index: {}]   ;;  %s5099_s5 = inlined_call_operand.vmem [shape: f32[99], index: 5, kind: input, shape index: {}]   ;;  %s5100_s6 = inlined_call_operand.vmem [shape: f32[4], index: 6, kind: input, shape index: {}]   ;;  %s5101_s7 = inlined_call_operand.vmem [shape: f32[2,2,8,256], index: 7, kind: output, shape index: {}]  }
   0x1   :  { %5232 = sst [smem:[#allocation132_spill]] %s5094_s0 }
   0x2   :  { %5233 = sst [smem:[#allocation133_spill]] %s5095_s1 }
   0x3   :  { %5234 = sst [smem:[#allocation134_spill]] %s5096_s2 }
   0x4   :  { %5235 = sst [smem:[#allocation135_spill]] %s5097_s3 }
   0x5   :  { %5236 = sst [smem:[#allocation136_spill]] %s5098_s4 }
   0x6   :  { %5237 = sst [smem:[#allocation137_spill]] %s5099_s5 }
   0x7   :  { %5238 = sst [smem:[#allocation138_spill]] %s5100_s6 }
   0x8   :  { %5239 = sst [smem:[#allocation139_spill]] %s5101_s7 }
   0x9   :  { %12 = vsyncpa [#allocation3], 0 }
   0xa   :  { %13 = vsyncpa [#allocation5], 0 }
   0xb   :  { %14 = vsyncpa [#allocation8], 0 }
   0xc   :  { %15 = vsyncpa [#allocation11], 0  ;;  %s2835_s24 = smov 0  }
   0xd LB: > { %5240 = sst [smem:[#allocation16_spill]] %s2775_s24  ;;  %s2844_s28 = sadd.s32 4294967295, %s2775_s24   ;;  %s2775_s24 = sphi %s2835_s24, %s21_s24  }
   0xe   : > { %s5241_s2 = sld [smem:[#allocation134_spill]]  ;;  %p2314_p0 = scmp.ge.s32.totalorder %s2775_s24, 1 }
   0xf   : > { %p204_p1 = scmp.lt.s32.totalorder %s2775_s24, 3  ;;  %p5102_p2 = scmp.eq.s32.totalorder %s2844_s28, 0 }
  0x10   : > { %s5243_s4 = sld [smem:[#allocation136_spill]] }
  0x11   : > { %p2849_p3 = pnand %p2314_p0, %p204_p1  ;;  %s5244_s1 = sld [smem:[#allocation133_spill]] }
  0x12   : > { %s5246_s3 = sld [smem:[#allocation135_spill]] }
  0x13   : > { %p2562_p4 = pneg %p2849_p3  ;;  %s5247_s5 = sld [smem:[#allocation137_spill]] }
  0x14   : > { %s228_s27 = sshll.u32 %s5241_s2, 4  ;;  %s229_s27 = int_to_ptr.vmem [resolvable:$true] %s228_s27 }
  0x15   : > { %p2867_p5 = pnand %p5102_p2, %p2562_p4  ;;  %s2663_s20 = scalar_lea.vmem %s229_s27, 16 }
  0x16   : > { %s250_s9 = sshll.u32 %s5243_s4, 4  ;;  %p2664_p6 = scmp.ne.s32.totalorder %s229_s27, %s2663_s20  ;;  %s2856_s9 = int_to_ptr.vmem [resolvable:$true] %s250_s9 }
  0x17   : > { %s217_s12 = sshll.u32 %s5244_s1, 4  ;;  %p2881_p7 = pneg %p2867_p5  ;;  %s2863_s12 = int_to_ptr.vmem [resolvable:$true] %s217_s12 }
  0x18   : > { %s239_s16 = sshll.u32 %s5246_s3, 4  ;;  %p2671_p10 = scmp.lt.s32.totalorder %s229_s27, %s229_s27  ;;  %s2874_s16 = int_to_ptr.vmem [resolvable:$true] %s239_s16 }
  0x19   : > { %s261_s19 = sshll.u32 %s5247_s5, 4  ;;  %p2666_p8 = pnand %p2881_p7, %p2664_p6  ;;  %s262_s19 = int_to_ptr.vmem [resolvable:$true] %s261_s19 }
  0x1a   : > { %p2672_p11 = scmp.lt.s32.totalorder %s2663_s20, %s2663_s20 }
  0x1b   : > { %p2667_p9 = pneg %p2666_p8 }
  0x1c   : > { %p2673_p12 = por %p2672_p11, %p2671_p10 }
  0x1e   : > { %p2674_p13 = pnand %p2673_p12, %p2667_p9 }
  0x20   : > { %2677 = shalt.err (!%p2674_p13)
}
  0x21   : > { %s2777_s22 = smov [#allocation4]   ;;  %s2678_s23 = scalar_lea.vmem %s2856_s9, 16 }
  0x22   : > { %2568 = dma.vmem_to_smem (!%p2867_p5), %s229_s27, 16, %s2777_s22, [#allocation5]  }
  0x23   : > { %p2679_p0 = scmp.ne.s32.totalorder %s2856_s9, %s2678_s23  ;;  %p2686_p6 = scmp.lt.s32.totalorder %s2856_s9, %s2856_s9 }
  0x24   : > { %p2687_p8 = scmp.lt.s32.totalorder %s2678_s23, %s2678_s23 }
  0x25   : > { %p2681_p1 = pnand %p2679_p0, %p2881_p7 }
  0x26   : > { %p2688_p2 = por %p2687_p8, %p2686_p6 }
  0x27   : > { %p2682_p4 = pneg %p2681_p1 }
  0x29   : > { %p2689_p10 = pnand %p2688_p2, %p2682_p4 }
  0x2b   : > { %2692 = shalt.err (!%p2689_p10)
}
  0x2c   : > { %s2778_s25 = smov [#allocation7]   ;;  %s2693_s26 = scalar_lea.vmem %s2863_s12, 16 }
  0x2d   : > { %2574 = dma.vmem_to_smem (!%p2867_p5), %s2856_s9, 16, %s2778_s25, [#allocation8]  }
  0x2e   : > { %p2694_p9 = scmp.ne.s32.totalorder %s2863_s12, %s2693_s26  ;;  %p2701_p13 = scmp.lt.s32.totalorder %s2863_s12, %s2863_s12 }
  0x2f   : > { %p2702_p0 = scmp.lt.s32.totalorder %s2693_s26, %s2693_s26 }
  0x30   : > { %p2696_p11 = pnand %p2694_p9, %p2881_p7 }
  0x31   : > { %p2703_p1 = por %p2702_p0, %p2701_p13 }
  0x32   : > { %p2697_p12 = pneg %p2696_p11 }
  0x34   : > { %p2704_p2 = pnand %p2703_p1, %p2697_p12 }
  0x36   : > { %2707 = shalt.err (!%p2704_p2)
}
  0x37   : > { %s2779_s27 = smov [#allocation2]   ;;  %s2708_s30 = scalar_lea.vmem %s2874_s16, 16 }
  0x38   : > { %2565 = dma.vmem_to_smem (!%p2867_p5), %s2863_s12, 16, %s2779_s27, [#allocation3]  }
  0x39   : > { %p2709_p4 = scmp.ne.s32.totalorder %s2874_s16, %s2708_s30  ;;  %p2716_p10 = scmp.lt.s32.totalorder %s2874_s16, %s2874_s16 }
  0x3a   : > { %p2717_p9 = scmp.lt.s32.totalorder %s2708_s30, %s2708_s30 }
  0x3b   : > { %p2711_p6 = pnand %p2709_p4, %p2881_p7 }
  0x3c   : > { %p2718_p11 = por %p2717_p9, %p2716_p10 }
  0x3d   : > { %p2712_p8 = pneg %p2711_p6 }
  0x3f   : > { %p2719_p12 = pnand %p2718_p11, %p2712_p8 }
  0x41   : > { %2722 = shalt.err (!%p2719_p12)
}
  0x42   : > { %s2780_s8 = smov [#allocation6]   ;;  %s2723_s11 = scalar_lea.vmem %s262_s19, 16 }
  0x43   : > { %2571 = dma.vmem_to_smem (!%p2867_p5), %s2874_s16, 16, %s2780_s8, [#allocation5]  }
  0x44   : > { %p2724_p13 = scmp.ne.s32.totalorder %s262_s19, %s2723_s11  ;;  %p2731_p2 = scmp.lt.s32.totalorder %s262_s19, %s262_s19 }
  0x45   : > { %p2732_p4 = scmp.lt.s32.totalorder %s2723_s11, %s2723_s11 }
  0x46   : > { %p2726_p0 = pnand %p2724_p13, %p2881_p7 }
  0x47   : > { %p2733_p6 = por %p2732_p4, %p2731_p2 }
  0x48   : > { %p2727_p1 = pneg %p2726_p0 }
  0x4a   : > { %p2734_p8 = pnand %p2733_p6, %p2727_p1 }
  0x4c   : > { %2737 = shalt.err (!%p2734_p8)
}
  0x4d   : > { %s2781_s12 = smov [#allocation9]   ;;  %s5249_s6 = sld [smem:[#allocation138_spill]] }
  0x4e   : > { %2577 = dma.vmem_to_smem (!%p2867_p5), %s262_s19, 16, %s2781_s12, [#allocation8]  }
  0x53   : > { %s272_s16 = sshll.u32 %s5249_s6, 4  ;;  %s273_s16 = int_to_ptr.vmem [resolvable:$true] %s272_s16 }
  0x54   : > { %s2738_s17 = scalar_lea.vmem %s273_s16, 16  ;;  %p2746_p12 = scmp.lt.s32.totalorder %s273_s16, %s273_s16 }
  0x55   : > { %p2739_p10 = scmp.ne.s32.totalorder %s273_s16, %s2738_s17  ;;  %p2747_p13 = scmp.lt.s32.totalorder %s2738_s17, %s2738_s17 }
  0x57   : > { %p2741_p9 = pnand %p2739_p10, %p2881_p7  ;;  %p2748_p0 = por %p2747_p13, %p2746_p12 }
  0x59   : > { %p2742_p11 = pneg %p2741_p9 }
  0x5b   : > { %p2749_p1 = pnand %p2748_p0, %p2742_p11 }
  0x5d   : > { %2752 = shalt.err (!%p2749_p1)
}
  0x5e   : > { %s2782_s18 = smov [#allocation10]   ;;  %293 = sbr.rel (%p2849_p3) target bundleno = 1872 (0x750), region = 48 }
  0x5f   : > { %2580 = dma.vmem_to_smem (!%p2867_p5), %s273_s16, 16, %s2782_s18, [#allocation11]  }
  0x63   : > { %p5250_p2 = scmp.eq.s32.totalorder %s2844_s28, 0 }
  0x65   : > { %2758 = dma.done.wait (%p5250_p2), [#allocation3], 16   ;;  %p5251_p4 = pmov %p5250_p2 }
  0x66   : > { %p5252_p7 = pmov %p5250_p2 }
  0x67   : > { %2760 = vsyncadd (%p5251_p4), [#allocation3], 4294967280 }
  0x68   : > { %2762 = dma.done.wait (%p5252_p7), [#allocation5], 32   ;;  %p5253_p6 = pmov %p5250_p2 }
  0x69   : > { %p5254_p8 = pmov %p5250_p2 }
  0x6a   : > { %2764 = vsyncadd (%p5253_p6), [#allocation5], 4294967264 }
  0x6b   : > { %2766 = dma.done.wait (%p5254_p8), [#allocation8], 32   ;;  %p5255_p5 = pmov %p5250_p2 }
  0x6c   : > { %p5256_p3 = pmov %p5250_p2 }
  0x6d   : > { %2768 = vsyncadd (%p5255_p5), [#allocation8], 4294967264 }
  0x6e   : > { %2770 = dma.done.wait (%p5256_p3), [#allocation11], 16   ;;  %p5257_p10 = pmov %p5250_p2 }
  0x70   : > { %2772 = vsyncadd (%p5257_p10), [#allocation11], 4294967280 }
  0x71   : > { %319 = sfence }
  0x72   : > { %p346_p9 = scmp.lt.s32.totalorder %s2844_s28, 1  ;;  %s5259_s0 = sld [smem:[#allocation132_spill]]  ;;  %v5112_v4 = vlaneseq }
  0x73   : > { %s5104_s21 = smov 127   ;;  %s5106_s22 = smov 1  }
  0x74   : > { %s5750_s28 = smov (!%p346_p9, %s2844_s28), 1  ;;  %s2989_s23 = sld [smem:[#allocation2 + $0x2]]  ;;  %v3030_v5 = vand.u32 127, %v5112_v4 }
  0x75   : > { %5258 = sst [smem:[#allocation17_spill]] %s5750_s28  ;;  %s5103_s29 = sshll.u32 %s5750_s28, 5 }
  0x76   : > { %s2991_s25 = sld [smem:[#allocation2 + $0x14]]  ;;  %5261 = vst [vmem:[#allocation19_spill] sm:$0xff] %v3030_v5  ;;  %v3041_v6 = vadd.s32 128, %v3030_v5  ;;  %v3052_v7 = vand.u32 15, %v3030_v5  ;;  %vm383_vm0 = vcmp.lt.s32.totalorder %v3030_v5, 127  ;;  %vm372_vm1 = vcmp.lt.s32.totalorder %v3030_v5, 1 }
  0x77   : > { %s2993_s26 = sld [smem:[#allocation2 + $0x5]] }
  0x78   : > { %s2959_s20 = scalar_lea.vmem %s5259_s0, %s5103_s29  ;;  %s2995_s27 = sld [smem:[#allocation2 + $0x17]]  ;;  %5262 = vst [vmem:[#allocation20_spill] sm:$0xff] %v3041_v6  ;;  %5263 = vst [vmem:[#allocation21_spill] sm:$0xff] %v3052_v7  ;;  %v3055_v8 = vand.u32 15, %v3041_v6  ;;  %vm386_vm2 = vcmp.lt.s32.totalorder %v3052_v7, 15  ;;  %vm375_vm4 = vcmp.ge.s32.totalorder %v3052_v7, 1 }
  0x79   : > { %5260 = sst [smem:[#allocation18_spill]] %s2959_s20  ;;  %v2962_v0 = vld [vmem:[%s2959_s20] sm:$0xff]  ;;  %v2969_v1 = vld [vmem:[%s2959_s20 + $0x8] sm:$0xff]  ;;  %v2976_v2 = vld [vmem:[%s2959_s20 + $0x18] sm:$0xff] }
  0x7a   : > { %379 = vrot.lane.b32.xlu1 %v2962_v0, %s5104_s21  ;;  %368 = vrot.lane.b32.xlu0 %v2962_v0, %s5106_s22  ;;  %v2979_v3 = vld [vmem:[%s2959_s20 + $0x10] sm:$0xff]  ;;  %s2997_s30 = sld [smem:[#allocation2 + $0x8]]  ;;  %5264 = vst [vmem:[#allocation22_spill] sm:$0xff] %v3055_v8  ;;  %v417_v9 = vstv %s2989_s23  ;;  %vm387_vm3 = vcmp.lt.s32.totalorder %v3055_v8, 15  ;;  %vm376_vm5 = vcmp.ge.s32.totalorder %v3055_v8, 1 }
  0x7b   : > { %s2999_s8 = sld [smem:[#allocation2 + $0x1a]] }
  0x7c   : > { %s3001_s9 = sld [smem:[#allocation2]]  ;;  %v462_v10 = vstv %s2991_s25 }
  0x7d   : > { %s3003_s10 = sld [smem:[#allocation2 + $0x12]]  ;;  %v504_v11 = vstv %s2993_s26  ;;  %s5291_s26 = smov 1  }
  0x7e   : > { %381 = vrot.lane.b32.xlu1 %v2969_v1, %s5104_s21  ;;  %370 = vrot.lane.b32.xlu0 %v2969_v1, %s5106_s22  ;;  %s3005_s11 = sld [smem:[#allocation2 + $0x3]]  ;;  %v540_v12 = vstv %s2995_s27  ;;  %s5292_s27 = smov 127  }
  0x7f   : > { %s3007_s12 = sld [smem:[#allocation2 + $0x15]] }
  0x80   : > { %s3009_s14 = sld [smem:[#allocation2 + $0x6]]  ;;  %v576_v13 = vstv %s2997_s30 }
  0x81   : > { %s3011_s15 = sld [smem:[#allocation2 + $0x18]]  ;;  %v623_v15 = vstv %s2999_s8 }
  0x82   : > { %392 = vrot.lane.b32.xlu1 %v2976_v2, %s5106_s22  ;;  %390 = vrot.lane.b32.xlu0 %v2979_v3, %s5106_s22  ;;  %s3013_s16 = sld [smem:[#allocation2 + $0x1]]  ;;  %v407_v16 = vstv %s3001_s9 }
  0x83   : > { %s3015_s17 = sld [smem:[#allocation2 + $0x9]]  ;;  %v452_v17 = vstv %s3003_s10 }
  0x84   : > { %s3017_s18 = sld [smem:[#allocation2 + $0xa]]  ;;  %v494_v19 = vstv %s3005_s11 }
  0x85   : > { %s3019_s13 = sld [smem:[#allocation2 + $0xb]]  ;;  %v5114_v20 = vstv %s3007_s12 }
  0x86   : > { %400 = vrot.lane.b32.xlu1 %v2976_v2, %s5104_s21  ;;  %398 = vrot.lane.b32.xlu0 %v2979_v3, %s5104_s21  ;;  %s3021_s19 = sld [smem:[#allocation2 + $0x7]]  ;;  %v566_v21 = vstv %s3009_s14 }
  0x87   : > { %s3023_s29 = sld [smem:[#allocation2 + $0xf]]  ;;  %v613_v23 = vstv %s3011_s15 }
  0x88   : > { %s3025_s21 = sld [smem:[#allocation2 + $0x10]]  ;;  %v411_v14 = vstv %s3013_s16 }
  0x89   : > { %s3027_s22 = sld [smem:[#allocation2 + $0x11]]  ;;  %v3085_v24 = vmul.f32 %v411_v14, %v2969_v1  ;;  %v423_v25 = vstv %s3015_s17  ;;  %v3098_v29 = vmul.f32 %v411_v14, %v2962_v0 }
  0x8a   : > { %s3032_s0 = sld [smem:[#allocation2 + $0x13]]  ;;  %v429_v18 = vstv %s3017_s18 }
  0x8b   : > { %s3034_s1 = sld [smem:[#allocation2 + $0x1b]]  ;;  %v3094_v27 = vmul.f32 %v2976_v2, %v429_v18  ;;  %v3104_v31 = vmul.f32 %v2979_v3, %v429_v18 }
  0x8c   : > { %s3036_s2 = sld [smem:[#allocation2 + $0x1c]]  ;;  %v570_v22 = vstv %s3021_s19 }
  0x8d   : > { %s3038_s3 = sld [smem:[#allocation2 + $0x1d]]  ;;  %v3107_v32 = vmul.f32 %v570_v22, %v2969_v1  ;;  %v3116_v37 = vmul.f32 %v570_v22, %v2962_v0  ;;  %v5266_v8 = vstv %s3023_s29 }
  0x8e   : > { %s3043_s4 = sld [smem:[#allocation2 + $0x19]]  ;;  %v588_v26 = vstv %s3025_s21 }
  0x8f   : > { %s3045_s5 = sld [smem:[#allocation2 + $0x21]]  ;;  %v3112_v35 = vmul.f32 %v2976_v2, %v588_v26  ;;  %v3120_v39 = vmul.f32 %v2979_v3, %v588_v26 }
  0x90   : > { %s3047_s6 = sld [smem:[#allocation2 + $0x22]]  ;;  %v456_v30 = vstv %s3032_s0 }
  0x91   : > { %s3049_s24 = sld [smem:[#allocation2 + $0x23]]  ;;  %v3123_v40 = vmul.f32 %v456_v30, %v2969_v1  ;;  %v3132_v47 = vmul.f32 %v456_v30, %v2962_v0 }
  0x92   : > { %s3059_s7 = sld [smem:[#allocation2 + $0x4]]  ;;  %v474_v34 = vstv %s3036_s2 }
  0x93   : > { %s3065_s28 = sld [smem:[#allocation2 + $0xc]]  ;;  %v3128_v45 = vmul.f32 %v2976_v2, %v474_v34  ;;  %v3136_v49 = vmul.f32 %v2979_v3, %v474_v34 }
  0x94   : > { %s3071_s20 = sld [smem:[#allocation2 + $0xd]]  ;;  %v617_v38 = vstv %s3043_s4 }
  0x95   : > { %s3079_s16 = sld [smem:[#allocation2 + $0xe]]  ;;  %v3139_v50 = vmul.f32 %v617_v38, %v2969_v1  ;;  %v3148_v55 = vmul.f32 %v617_v38, %v2962_v0 }
  0x96   : > { %s3089_s18 = sld [smem:[#allocation2 + $0x16]]  ;;  %v635_v42 = vstv %s3047_s6 }
  0x97   : > { %s3101_s19 = sld [smem:[#allocation2 + $0x1f]]  ;;  %v3144_v53 = vmul.f32 %v2976_v2, %v635_v42  ;;  %v3151_v56 = vmul.f32 %v2979_v3, %v635_v42 }
  0x98   : > { %v498_v48 = vstv %s3059_s7  ;;  %s3309_s0 = sld [smem:[#allocation2 + $0x1e]] }
  0x99   : > { %v3154_v57 = vmul.f32 %v498_v48, %v2962_v0  ;;  %v3157_v58 = vmul.f32 %v498_v48, %v2969_v1  ;;  %s3330_s2 = sld [smem:[#allocation2 + $0x20]] }
  0x9a   : > { %v516_v52 = vstv %s3071_s20  ;;  %s3438_s4 = sld [smem:[#allocation4]] }
  0x9b   : > { %v3162_v63 = vmul.f32 %v2979_v3, %v516_v52  ;;  %v3165_v14 = vmul.f32 %v2976_v2, %v516_v52  ;;  %s3442_s6 = sld [smem:[#allocation4 + $0x2]] }
  0x9c   : > { %v534_v60 = vstv %s3089_s18  ;;  %s3444_s7 = sld [smem:[#allocation4 + $0x6]] }
  0x9d   : > { %v5113_v22 = vstv %s3101_s19  ;;  %v3182_v52 = vmul.f32 %v534_v60, %v2962_v0  ;;  %s3450_s29 = sld [smem:[#allocation4 + $0x3]] }
  0x9e   : > { %v3198_v0 = vmul.f32 %v2979_v3, %v5113_v22  ;;  %s3452_s20 = sld [smem:[#allocation4 + $0x4]] }
  0x9f   : > { %s3457_s21 = sld [smem:[#allocation4 + $0x5]] }
  0xa0   : > { %5265 = vst [vmem:[#allocation23_spill] sm:$0xff] %v3198_v0  ;;  %s3473_s23 = sld [smem:[#allocation4 + $0xa]] }
  0xa1   : > { %s3479_s25 = sld [smem:[#allocation4 + $0xb]] }
  0xa2   : > { %s3519_s30 = sld [smem:[#allocation6 + $0x1]] }
  0xa3   : > { %s3521_s8 = sld [smem:[#allocation6 + $0xa]] }
  0xa4   : > { %s3523_s9 = sld [smem:[#allocation6 + $0x7]] }
  0xa5   : > { %s3525_s10 = sld [smem:[#allocation6 + $0x10]] }
  0xa6   : > { %s3527_s11 = sld [smem:[#allocation6 + $0x13]] }
  0xa7   : > { %s3531_s14 = sld [smem:[#allocation6 + $0x19]] }
  0xa8   : > { %s3533_s15 = sld [smem:[#allocation6 + $0x22]] }
  0xa9   : > { %s3535_s17 = sld [smem:[#allocation6 + $0x4]] }
  0xaa   : > { %s3541_s18 = sld [smem:[#allocation6 + $0x1f]] }
  0xec   : > { %v380_v43 = vpop.permute.xlu1 %379  ;;  %v369_v44 = vpop.permute.xlu0 %368 }
  0xf0   : > { %v382_v61 = vpop.permute.xlu1 %381  ;;  %v371_v62 = vpop.permute.xlu0 %370 }
  0xf1   : > { %v384_v26 = vsel %vm383_vm0, %v380_v43, %v382_v61  ;;  %v385_v30 = vsel %vm383_vm0, %v382_v61, %v380_v43  ;;  %v373_v34 = vsel %vm372_vm1, %v369_v44, %v371_v62  ;;  %v374_v38 = vsel %vm372_vm1, %v371_v62, %v369_v44 }
  0xf2   : > { %v388_v42 = vsel %vm386_vm2, %v384_v26, 0.0  ;;  %v389_v48 = vsel %vm387_vm3, %v385_v30, 0.0  ;;  %v3185_v43 = vmul.f32 %v534_v60, %v2969_v1  ;;  %v377_v44 = vsel %vm375_vm4, %v374_v38, 0.0 }
  0xf3   : > { %v418_v61 = vmul.f32 %v417_v9, %v388_v42  ;;  %v3193_v62 = vsel %vm376_vm5, %v373_v34, 0.0  ;;  %v419_v1 = vmul.f32 %v417_v9, %v389_v48  ;;  %v3204_v60 = vmul.f32 %v462_v10, %v388_v42 }
  0xf4   : > { %v464_v26 = vmul.f32 %v462_v10, %v389_v48  ;;  %v3210_v30 = vmul.f32 %v504_v11, %v388_v42  ;;  %v393_v34 = vpop.permute.xlu1 %392  ;;  %v391_v38 = vpop.permute.xlu0 %390  ;;  %v3214_v3 = vmul.f32 %v504_v11, %v389_v48  ;;  %v3218_v9 = vmul.f32 %v540_v12, %v388_v42 }
  0xf5   : > { %v3222_v4 = vmul.f32 %v540_v12, %v389_v48  ;;  %v577_v10 = vmul.f32 %v576_v13, %v388_v42  ;;  %v578_v22 = vmul.f32 %v576_v13, %v389_v48  ;;  %v3230_v18 = vmul.f32 %v623_v15, %v388_v42 }
  0xf6   : > { %v3234_v59 = vmul.f32 %v623_v15, %v389_v48  ;;  %v408_v11 = vmul.f32 %v407_v16, %v377_v44  ;;  %v409_v54 = vmul.f32 %v407_v16, %v3193_v62  ;;  %v453_v51 = vmul.f32 %v452_v17, %v377_v44 }
  0xf7   : > { %v454_v12 = vmul.f32 %v452_v17, %v3193_v62  ;;  %v3248_v46 = vmul.f32 %v494_v19, %v377_v44  ;;  %v3253_v13 = vmul.f32 %v494_v19, %v3193_v62  ;;  %v3257_v15 = vmul.f32 %v5114_v20, %v377_v44 }
  0xf8   : > { %v567_v42 = vmul.f32 %v566_v21, %v377_v44  ;;  %v568_v16 = vmul.f32 %v566_v21, %v3193_v62  ;;  %v401_v48 = vpop.permute.xlu1 %400  ;;  %v399_v17 = vpop.permute.xlu0 %398  ;;  %v394_v36 = vsel %vm372_vm1, %v391_v38, %v393_v34  ;;  %v395_v19 = vsel %vm372_vm1, %v393_v34, %v391_v38 }
  0xf9   : > { %v402_v20 = vsel %vm383_vm0, %v399_v17, %v401_v48  ;;  %v403_v41 = vsel %vm383_vm0, %v401_v48, %v399_v17  ;;  %v614_v28 = vmul.f32 %v613_v23, %v377_v44  ;;  %v3276_v21 = vsel %vm375_vm4, %v395_v19, 0.0 }
  0xfa   : > { %v3280_v33 = vsel %vm376_vm5, %v394_v36, 0.0  ;;  %v3284_v34 = vsel %vm387_vm3, %v403_v41, 0.0  ;;  %v3288_v38 = vsel %vm386_vm2, %v402_v20, 0.0  ;;  %v415_v44 = vadd.f32 %v3085_v24, %v409_v54 }
  0xfb   : > { %v425_v48 = vmul.f32 %v423_v25, %v3280_v33  ;;  %v414_v17 = vadd.f32 %v3098_v29, %v408_v11  ;;  %v615_v36 = vmul.f32 %v613_v23, %v3193_v62  ;;  %v424_v41 = vmul.f32 %v423_v25, %v3276_v21 }
  0xfc   : > { %v574_v19 = vadd.f32 %v3107_v32, %v568_v16  ;;  %v584_v20 = vmul.f32 %v5266_v8, %v3280_v33  ;;  %v421_v7 = vadd.f32 %v419_v1, %v415_v44  ;;  %v5267_v24 = vstv %s3019_s13  ;;  %s3537_s13 = sld [smem:[#allocation6 + $0xd]] }
  0xfd   : > { %v437_v54 = vmul.f32 %v5267_v24, %v3284_v34  ;;  %v420_v6 = vadd.f32 %v418_v61, %v414_v17  ;;  %v573_v29 = vadd.f32 %v3116_v37, %v567_v42  ;;  %v5268_v23 = vmov %v5267_v24 }
  0xfe   : > { %v436_v11 = vmul.f32 %v5268_v23, %v3288_v38  ;;  %v580_v25 = vadd.f32 %v578_v22, %v574_v19  ;;  %v5269_v32 = vmov %v5266_v8  ;;  %v460_v8 = vadd.f32 %v3123_v40, %v454_v12 }
  0xff   : > { %v583_v16 = vmul.f32 %v5269_v32, %v3276_v21  ;;  %v427_v1 = vadd.f32 %v425_v48, %v421_v7  ;;  %v426_v44 = vadd.f32 %v424_v41, %v420_v6  ;;  %v579_v5 = vadd.f32 %v577_v10, %v573_v29 }
 0x100   : > { %v5270_v61 = vstv %s3034_s1  ;;  %v586_v37 = vadd.f32 %v584_v20, %v580_v25  ;;  %v5271_v42 = vstv %s3027_s22  ;;  %v466_v0 = vadd.f32 %v464_v26, %v460_v8  ;;  %s5125_s1 = smov 16   ;;  %s3459_s22 = sld [smem:[#allocation4 + $0x9]] }
 0x101   : > { %v470_v17 = vmul.f32 %v5270_v61, %v3280_v33  ;;  %v596_v24 = vmul.f32 %v5271_v42, %v3284_v34  ;;  %v459_v22 = vadd.f32 %v3132_v47, %v453_v51  ;;  %v433_v19 = vadd.f32 %v3094_v27, %v427_v1 }
 0x102   : > { %v432_v23 = vadd.f32 %v3104_v31, %v426_v44  ;;  %v585_v7 = vadd.f32 %v583_v16, %v579_v5  ;;  %v5272_v6 = vmov %v5270_v61  ;;  %v592_v10 = vadd.f32 %v3112_v35, %v586_v37 }
 0x103   : > { %v469_v40 = vmul.f32 %v5272_v6, %v3276_v21  ;;  %v5273_v12 = vmov %v5271_v42  ;;  %v472_v48 = vadd.f32 %v470_v17, %v466_v0  ;;  %v465_v27 = vadd.f32 %v3204_v60, %v459_v22 }
 0x104   : > { %v595_v26 = vmul.f32 %v5273_v12, %v3288_v38  ;;  %v439_v47 = vadd.f32 %v437_v54, %v433_v19  ;;  %v438_v51 = vadd.f32 %v436_v11, %v432_v23  ;;  %v591_v31 = vadd.f32 %v3120_v39, %v585_v7 }
 0x105   : > { %v621_v5 = vadd.f32 %v3139_v50, %v615_v36  ;;  %v478_v41 = vadd.f32 %v3128_v45, %v472_v48  ;;  %v5274_v20 = vstv %s3038_s3  ;;  %v471_v29 = vadd.f32 %v469_v40, %v465_v27  ;;  %s5123_s3 = smov 112  }
 0x106   : > { %v482_v35 = vmul.f32 %v5274_v20, %v3284_v34  ;;  %v5275_v25 = vstv %s3045_s5  ;;  %v5276_v32 = vstv %s3007_s12  ;;  %442 = vrot.lane.b32.xlu1 %v439_v47, %s5125_s1  ;;  %440 = vrot.lane.b32.xlu0 %v438_v51, %s5125_s1  ;;  %v5277_v39 = vmov %v5274_v20  ;;  %s3440_s5 = sld [smem:[#allocation4 + $0x1]] }
 0x107   : > { %v631_v0 = vmul.f32 %v5275_v25, %v3280_v33  ;;  %v532_v60 = vmul.f32 %v5276_v32, %v3193_v62  ;;  %v481_v45 = vmul.f32 %v5277_v39, %v3288_v38  ;;  %v627_v50 = vadd.f32 %v3234_v59, %v621_v5  ;;  %v5287_v32 = vld [vmem:[#allocation19_spill] sm:$0xff]  ;;  %s3529_s12 = sld [smem:[#allocation6 + $0x1c]] }
 0x108   : > { %v546_v36 = vstv %s3309_s0  ;;  %v598_v54 = vadd.f32 %v596_v24, %v592_v10  ;;  %v477_v11 = vadd.f32 %v3136_v49, %v471_v29  ;;  %v620_v16 = vadd.f32 %v3148_v55, %v614_v28  ;;  %s3545_s0 = sld [smem:[#allocation6 + $0x12]] }
 0x109   : > { %v5278_v62 = vmov %v5275_v25  ;;  %v597_v1 = vadd.f32 %v595_v26, %v591_v31  ;;  %v633_v44 = vadd.f32 %v631_v0, %v627_v50  ;;  %v5279_v61 = vstv %s3049_s24  ;;  %v5288_v50 = vld [vmem:[#allocation20_spill] sm:$0xff]  ;;  %s3446_s24 = sld [smem:[#allocation4 + $0x7]] }
 0x10a   : > { %v630_v8 = vmul.f32 %v5278_v62, %v3276_v21  ;;  %v643_v17 = vmul.f32 %v5279_v61, %v3284_v34  ;;  %v501_v59 = vadd.f32 %v3154_v57, %v3248_v46  ;;  %v484_v37 = vadd.f32 %v482_v35, %v478_v41  ;;  %601 = vrot.lane.b32.xlu1 %v598_v54, %s5123_s3 }
 0x10b   : > { %v626_v42 = vadd.f32 %v3230_v18, %v620_v16  ;;  %v502_v28 = vadd.f32 %v3157_v58, %v3253_v13  ;;  %v5280_v49 = vstv %s3065_s28  ;;  %599 = vrot.lane.b32.xlu0 %v597_v1, %s5123_s3  ;;  %v5281_v24 = vmov %v5279_v61  ;;  %s3448_s28 = sld [smem:[#allocation4 + $0x8]] }
 0x10c   : > { %v511_v55 = vmul.f32 %v5280_v49, %v3276_v21  ;;  %v642_v22 = vmul.f32 %v5281_v24, %v3288_v38  ;;  %v507_v46 = vadd.f32 %v3210_v30, %v501_v59  ;;  %v5282_v57 = vmov %v5280_v49 }
 0x10d   : > { %v512_v18 = vmul.f32 %v5282_v57, %v3280_v33  ;;  %v558_v19 = vstv %s3330_s2  ;;  %v483_v23 = vadd.f32 %v481_v45, %v477_v11  ;;  %v639_v58 = vadd.f32 %v3144_v53, %v633_v44  ;;  %s3547_s2 = sld [smem:[#allocation6 + $0x3]] }
 0x10e   : > { %v632_v13 = vadd.f32 %v630_v8, %v626_v42  ;;  %v508_v7 = vadd.f32 %v3214_v3, %v502_v28  ;;  %v513_v6 = vadd.f32 %v511_v55, %v507_v46  ;;  %v5283_v40 = vstv %s3079_s16  ;;  %487 = vrot.lane.b32.xlu1 %v484_v37, %s5125_s1  ;;  %s3539_s16 = sld [smem:[#allocation6 + $0x16]] }
 0x10f   : > { %v523_v10 = vmul.f32 %v5283_v40, %v3288_v38  ;;  %v5284_v12 = vmov %v5283_v40  ;;  %v537_v30 = vadd.f32 %v3182_v52, %v3257_v15  ;;  %v538_v47 = vadd.f32 %v3185_v43, %v532_v60  ;;  %485 = vrot.lane.b32.xlu0 %v483_v23, %s5125_s1 }
 0x110   : > { %v524_v26 = vmul.f32 %v5284_v12, %v3284_v34  ;;  %v638_v48 = vadd.f32 %v3151_v56, %v632_v13  ;;  %v514_v27 = vadd.f32 %v512_v18, %v508_v7  ;;  %v547_v53 = vmul.f32 %v546_v36, %v3276_v21 }
 0x111   : > { %v519_v3 = vadd.f32 %v3162_v63, %v513_v6  ;;  %v543_v51 = vadd.f32 %v3218_v9, %v537_v30  ;;  %v548_v31 = vmul.f32 %v546_v36, %v3280_v33  ;;  %v645_v5 = vadd.f32 %v643_v17, %v639_v58  ;;  %v5286_v33 = vld [vmem:[#allocation23_spill] sm:$0xff] }
 0x112   : > { %v520_v52 = vadd.f32 %v3165_v14, %v514_v27  ;;  %v544_v56 = vadd.f32 %v3222_v4, %v538_v47  ;;  %v5285_v15 = vstv %s3101_s19  ;;  %v644_v41 = vadd.f32 %v642_v22, %v638_v48  ;;  %s3543_s19 = sld [smem:[#allocation6]] }
 0x113   : > { %v554_v43 = vmul.f32 %v2976_v2, %v5285_v15  ;;  %v525_v21 = vadd.f32 %v523_v10, %v519_v3  ;;  %v549_v20 = vadd.f32 %v547_v53, %v543_v51  ;;  %v559_v35 = vmul.f32 %v558_v19, %v3288_v38  ;;  %648 = vrot.lane.b32.xlu1 %v645_v5, %s5123_s3 }
 0x114   : > { %v526_v29 = vadd.f32 %v524_v26, %v520_v52  ;;  %v550_v25 = vadd.f32 %v548_v31, %v544_v56  ;;  %v560_v63 = vmul.f32 %v558_v19, %v3284_v34  ;;  %646 = vrot.lane.b32.xlu0 %v644_v41, %s5123_s3  ;;  %vm444_vm6 = vcmp.lt.s32.totalorder %v5287_v32, 16 }
 0x115   : > { %v555_v14 = vadd.f32 %v5286_v33, %v549_v20  ;;  %vm447_vm7 = vcmp.ge.s32.totalorder %v5287_v32, 16  ;;  %vm603_vm8 = vcmp.lt.s32.totalorder %v5287_v32, 112  ;;  %vm607_vm9 = vcmp.lt.s32.totalorder %v5288_v50, 240 }
 0x116   : > { %v556_v9 = vadd.f32 %v554_v43, %v550_v25 }
 0x117   : > { %v561_v4 = vadd.f32 %v559_v35, %v555_v14 }
 0x118   : > { %v562_v0 = vadd.f32 %v560_v63, %v556_v9 }
 0x178   : > { %v443_v2 = vpop.permute.xlu1 %442  ;;  %v441_v60 = vpop.permute.xlu0 %440 }
 0x179   : > { %v446_v38 = vsel %vm444_vm6, %v443_v2, %v441_v60  ;;  %v445_v34 = vsel %vm444_vm6, %v441_v60, %v443_v2  ;;  %v724_v2 = vstv %s3440_s5  ;;  %s3551_s5 = sld [smem:[#allocation6 + $0x6]] }
 0x17a   : > { %v449_v39 = vsel %vm447_vm7, %v446_v38, 0.0  ;;  %v528_v11 = vadd.f32 %v526_v29, %v445_v34 }
 0x17b   : > { %v527_v45 = vadd.f32 %v525_v21, %v449_v39  ;;  %v5289_v21 = vlaneseq }
 0x17c   : > { %v602_v36 = vpop.permute.xlu1 %601 }
 0x17d   : > { %v600_v54 = vpop.permute.xlu0 %599  ;;  %v3455_v20 = vshrl.u32 %v5289_v21, 7 }
 0x17e   : > { %v604_v16 = vsel %vm603_vm8, %v600_v54, %v602_v36  ;;  %v605_v62 = vsel %vm603_vm8, %v602_v36, %v600_v54  ;;  %v730_v36 = vstv %s3442_s6  ;;  %v799_v54 = vstv %s3444_s7  ;;  %s3553_s6 = sld [smem:[#allocation6 + $0x18]] }
 0x17f   : > { %v609_v8 = vsel %vm607_vm9, %v605_v62, 0.0  ;;  %v610_v1 = vadd.f32 %v604_v16, %v527_v45  ;;  %5290 = vst [vmem:[#allocation23_spill] sm:$0xff] %v3455_v20  ;;  %vm5202_vm12 = vcmp.ge.s32.totalorder %v3455_v20, 1  ;;  %vm5199_vm13 = vcmp.lt.s32.totalorder %v3455_v20, 7  ;;  %s3555_s7 = sld [smem:[#allocation6 + $0x2]] }
 0x180   : > { %v611_v44 = vadd.f32 %v609_v8, %v528_v11  ;;  %v488_v61 = vpop.permute.xlu1 %487  ;;  %v803_v11 = vstv %s3446_s24  ;;  %v809_v16 = vstv %s3448_s28  ;;  %v736_v62 = vstv %s3450_s29  ;;  %s3557_s24 = sld [smem:[#allocation6 + $0x14]] }
 0x181   : > { %v486_v17 = vpop.permute.xlu0 %485  ;;  %v742_v8 = vstv %s3452_s20  ;;  %s3559_s28 = sld [smem:[#allocation6 + $0x5]] }
 0x182   : > { %v490_v59 = vsel %vm444_vm6, %v488_v61, %v486_v17  ;;  %v656_v37 = vadd.f32 %v611_v44, %v610_v1  ;;  %v489_v42 = vsel %vm444_vm6, %v486_v17, %v488_v61  ;;  %s3561_s29 = sld [smem:[#allocation6 + $0x17]] }
 0x183   : > { %v491_v28 = vsel %vm447_vm7, %v490_v59, 0.0  ;;  %v564_v22 = vadd.f32 %v562_v0, %v489_v42  ;;  %v720_v0 = vstv %s3438_s4  ;;  %s3549_s4 = sld [smem:[#allocation6 + $0x15]] }
 0x184   : > { %v563_v49 = vadd.f32 %v561_v4, %v491_v28  ;;  %657 = vadd.xlane.f32.xlu0 %v656_v37  ;;  %s3563_s20 = sld [smem:[#allocation6 + $0x8]] }
 0x185   : > { %v649_v55 = vpop.permute.xlu1 %648 }
 0x186   : > { %v647_v24 = vpop.permute.xlu0 %646 }
 0x187   : > { %v650_v46 = vsel %vm603_vm8, %v647_v24, %v649_v55  ;;  %v651_v57 = vsel %vm603_vm8, %v649_v55, %v647_v24 }
 0x188   : > { %v653_v18 = vsel %vm607_vm9, %v651_v57, 0.0  ;;  %v654_v19 = vadd.f32 %v650_v46, %v563_v49 }
 0x189   : > { %v655_v23 = vadd.f32 %v653_v18, %v564_v22 }
 0x18b   : > { %v679_v58 = vadd.f32 %v655_v23, %v654_v19 }
 0x18d   : > { %680 = vadd.xlane.f32.xlu1 %v679_v58 }
 0x20d   : > { %v658_v13 = vpop.xlane.xlu0 %657 }
 0x20e   : > { %v660_v7 = vmul.f32 0.00390625, %v658_v13 }
 0x210   : > { %v661_v6 = vsub.f32 %v610_v1, %v660_v7  ;;  %v662_v40 = vsub.f32 %v611_v44, %v660_v7  ;;  %v748_v1 = vstv %s3457_s21  ;;  %v815_v44 = vstv %s3459_s22  ;;  %s3565_s21 = sld [smem:[#allocation6 + $0x1a]] }
 0x211   : > { %s3568_s22 = sld [smem:[#allocation6 + $0x9]] }
 0x212   : > { %v663_v10 = vmul.f32 %v661_v6, %v661_v6  ;;  %v664_v12 = vmul.f32 %v662_v40, %v662_v40 }
 0x214   : > { %v665_v26 = vadd.f32 %v664_v12, %v663_v10 }
 0x216   : > { %v681_v30 = vpop.xlane.xlu1 %680  ;;  %666 = vadd.xlane.f32.xlu0 %v665_v26 }
 0x217   : > { %v682_v48 = vmul.f32 0.00390625, %v681_v30 }
 0x219   : > { %v683_v27 = vsub.f32 %v654_v19, %v682_v48  ;;  %v684_v47 = vsub.f32 %v655_v23, %v682_v48 }
 0x21b   : > { %v685_v53 = vmul.f32 %v683_v27, %v683_v27  ;;  %v686_v3 = vmul.f32 %v684_v47, %v684_v47 }
 0x21d   : > { %v687_v51 = vadd.f32 %v686_v3, %v685_v53  ;;  %v821_v3 = vstv %s3473_s23  ;;  %s3572_s23 = sld [smem:[#allocation6 + $0xb]] }
 0x21f   : > { %688 = vadd.xlane.f32.xlu0 %v687_v51  ;;  %v827_v51 = vstv %s3479_s25  ;;  %s3578_s25 = sld [smem:[#allocation6 + $0xf]] }
 0x29f   : > { %v667_v31 = vpop.xlane.xlu0 %666 }
 0x2a0   : > { %v668_v5 = vmul.f32 0.00390625, %v667_v31 }
 0x2a2   : > { %v669_v52 = vadd.f32 1e-05, %v668_v5 }
 0x2a4   : > { %2619 = vrsqrt.f32 %v669_v52 }
 0x2a8   : > { %v689_v56 = vpop.xlane.xlu0 %688 }
 0x2a9   : > { %v690_v15 = vmul.f32 0.00390625, %v689_v56 }
 0x2ab   : > { %v691_v43 = vadd.f32 1e-05, %v690_v15 }
 0x2ad   : > { %2621 = vrsqrt.f32 %v691_v43 }
 0x2b1   : > { %v2620_v41 = vpop.eup %2619 }
 0x2b2   : > { %v671_v35 = vmul.f32 %v2620_v41, %v661_v6  ;;  %v672_v29 = vmul.f32 %v2620_v41, %v662_v40 }
 0x2b4   : > { %vm673_vm10 = vcmp.ge.f32.partialorder %v671_v35, 0.0  ;;  %vm674_vm11 = vcmp.ge.f32.partialorder %v672_v29, 0.0  ;;  %v675_v25 = vmul.f32 0.2, %v671_v35  ;;  %v676_v63 = vmul.f32 0.2, %v672_v29 }
 0x2b6   : > { %v677_v33 = vsel %vm673_vm10, %v671_v35, %v675_v25  ;;  %v678_v14 = vsel %vm674_vm11, %v672_v29, %v676_v63 }
 0x2b7   : > { %v701_v9 = vrot.slane %v677_v33, 7  ;;  %v702_v4 = vrot.slane %v678_v14, 7  ;;  %v706_v39 = vrot.slane %v677_v33, 1  ;;  %v707_v45 = vrot.slane %v678_v14, 1 }
 0x2b8   : > { %v725_v24 = vmul.f32 %v724_v2, %v677_v33  ;;  %v726_v22 = vmul.f32 %v724_v2, %v678_v14  ;;  %v804_v46 = vmul.f32 %v803_v11, %v677_v33  ;;  %v805_v57 = vmul.f32 %v803_v11, %v678_v14 }
 0x2b9   : > { %v704_v38 = vsel %vm5202_vm12, %v701_v9, 0.0  ;;  %v705_v34 = vsel %vm5202_vm12, %v702_v4, 0.0  ;;  %v709_v42 = vsel %vm5199_vm13, %v706_v39, 0.0  ;;  %v710_v28 = vsel %vm5199_vm13, %v707_v45, 0.0 }
 0x2ba   : > { %v2622_v60 = vpop.eup %2621  ;;  %v721_v61 = vmul.f32 %v720_v0, %v704_v38  ;;  %v722_v17 = vmul.f32 %v720_v0, %v705_v34  ;;  %v800_v49 = vmul.f32 %v799_v54, %v704_v38  ;;  %v801_v55 = vmul.f32 %v799_v54, %v705_v34 }
 0x2bb   : > { %v693_v59 = vmul.f32 %v2622_v60, %v683_v27  ;;  %v694_v37 = vmul.f32 %v2622_v60, %v684_v47  ;;  %v731_v13 = vmul.f32 %v730_v36, %v709_v42  ;;  %v732_v7 = vmul.f32 %v730_v36, %v710_v28 }
 0x2bc   : > { %v727_v23 = vadd.f32 %v725_v24, %v721_v61  ;;  %v728_v58 = vadd.f32 %v726_v22, %v722_v17  ;;  %v806_v6 = vadd.f32 %v804_v46, %v800_v49  ;;  %v807_v40 = vadd.f32 %v805_v57, %v801_v55 }
 0x2bd   : > { %vm695_vm14 = vcmp.ge.f32.partialorder %v693_v59, 0.0  ;;  %vm696_vm15 = vcmp.ge.f32.partialorder %v694_v37, 0.0  ;;  %v697_v18 = vmul.f32 0.2, %v693_v59  ;;  %v698_v19 = vmul.f32 0.2, %v694_v37 }
 0x2be   : > { %v810_v47 = vmul.f32 %v809_v16, %v709_v42  ;;  %v811_v53 = vmul.f32 %v809_v16, %v710_v28  ;;  %v733_v31 = vadd.f32 %v731_v13, %v727_v23  ;;  %v734_v5 = vadd.f32 %v732_v7, %v728_v58 }
 0x2bf   : > { %v699_v10 = vsel %vm695_vm14, %v693_v59, %v697_v18  ;;  %v700_v12 = vsel %vm696_vm15, %v694_v37, %v698_v19 }
 0x2c0   : > { %v711_v26 = vrot.slane %v699_v10, 7  ;;  %v712_v30 = vrot.slane %v700_v12, 7  ;;  %v715_v48 = vrot.slane %v699_v10, 1  ;;  %v716_v27 = vrot.slane %v700_v12, 1 }
 0x2c1   : > { %v812_v15 = vadd.f32 %v810_v47, %v806_v6  ;;  %v813_v43 = vadd.f32 %v811_v53, %v807_v40  ;;  %v743_v9 = vmul.f32 %v742_v8, %v699_v10  ;;  %v744_v4 = vmul.f32 %v742_v8, %v700_v12 }
 0x2c2   : > { %v713_v52 = vsel %vm5202_vm12, %v711_v26, 0.0  ;;  %v714_v56 = vsel %vm5202_vm12, %v712_v30, 0.0  ;;  %v717_v35 = vsel %vm5199_vm13, %v715_v48, 0.0  ;;  %v718_v29 = vsel %vm5199_vm13, %v716_v27, 0.0 }
 0x2c3   : > { %v737_v41 = vmul.f32 %v736_v62, %v713_v52  ;;  %v738_v21 = vmul.f32 %v736_v62, %v714_v56  ;;  %v816_v25 = vmul.f32 %v815_v44, %v713_v52  ;;  %v817_v63 = vmul.f32 %v815_v44, %v714_v56 }
 0x2c4   : > { %v822_v60 = vmul.f32 %v821_v3, %v699_v10  ;;  %v823_v38 = vmul.f32 %v821_v3, %v700_v12  ;;  %v749_v45 = vmul.f32 %v748_v1, %v717_v35  ;;  %v750_v36 = vmul.f32 %v748_v1, %v718_v29 }
 0x2c5   : > { %v739_v33 = vadd.f32 %v737_v41, %v733_v31  ;;  %v740_v14 = vadd.f32 %v738_v21, %v734_v5  ;;  %v818_v0 = vadd.f32 %v816_v25, %v812_v15  ;;  %v819_v2 = vadd.f32 %v817_v63, %v813_v43 }
 0x2c6   : > { %v828_v16 = vmul.f32 %v827_v51, %v717_v35  ;;  %v829_v62 = vmul.f32 %v827_v51, %v718_v29 }
 0x2c7   : > { %v745_v34 = vadd.f32 %v743_v9, %v739_v33  ;;  %v746_v39 = vadd.f32 %v744_v4, %v740_v14  ;;  %v824_v54 = vadd.f32 %v822_v60, %v818_v0  ;;  %v825_v11 = vadd.f32 %v823_v38, %v819_v2 }
 0x2c9   : > { %v752_v61 = vadd.f32 %v750_v36, %v746_v39  ;;  %v751_v17 = vadd.f32 %v749_v45, %v745_v34  ;;  %v830_v59 = vadd.f32 %v828_v16, %v824_v54  ;;  %v831_v44 = vadd.f32 %v829_v62, %v825_v11 }
 0x2cb   : > { %v759_v37 = vrot.slane %v752_v61, 4  ;;  %v753_v42 = vrot.slane %v751_v17, 4  ;;  %v832_v28 = vrot.slane %v830_v59, 4  ;;  %v838_v8 = vrot.slane %v831_v44, 4 }
 0x2cd   : > { %v760_v49 = vadd.f32 %v759_v37, %v752_v61  ;;  %v754_v55 = vadd.f32 %v753_v42, %v751_v17  ;;  %v833_v24 = vadd.f32 %v832_v28, %v830_v59  ;;  %v839_v22 = vadd.f32 %v838_v8, %v831_v44 }
 0x2cf   : > { %v761_v46 = vrot.slane %v760_v49, 2  ;;  %v755_v57 = vrot.slane %v754_v55, 2  ;;  %v834_v18 = vrot.slane %v833_v24, 2  ;;  %v840_v1 = vrot.slane %v839_v22, 2 }
 0x2d1   : > { %v762_v19 = vadd.f32 %v761_v46, %v760_v49  ;;  %v756_v23 = vadd.f32 %v755_v57, %v754_v55  ;;  %v835_v58 = vadd.f32 %v834_v18, %v833_v24  ;;  %v841_v13 = vadd.f32 %v840_v1, %v839_v22 }
 0x2d3   : > { %v763_v7 = vrot.slane %v762_v19, 1  ;;  %v757_v6 = vrot.slane %v756_v23, 1  ;;  %v836_v40 = vrot.slane %v835_v58, 1  ;;  %v842_v10 = vrot.slane %v841_v13, 1 }
 0x2d5   : > { %v764_v12 = vadd.f32 %v763_v7, %v762_v19  ;;  %v758_v26 = vadd.f32 %v757_v6, %v756_v23  ;;  %v837_v30 = vadd.f32 %v836_v40, %v835_v58  ;;  %v843_v48 = vadd.f32 %v842_v10, %v841_v13 }
 0x2d7   : > { %v767_v27 = vmul.f32 0.125, %v764_v12  ;;  %v766_v47 = vmul.f32 0.125, %v758_v26  ;;  %v844_v53 = vmul.f32 0.125, %v837_v30  ;;  %v845_v3 = vmul.f32 0.125, %v843_v48 }
 0x2d8   : > { %v913_v48 = vstv %s3519_s30  ;;  %s3587_s30 = sld [smem:[#allocation6 + $0x1b]] }
 0x2d9   : > { %v769_v51 = vsub.f32 %v752_v61, %v767_v27  ;;  %v768_v31 = vsub.f32 %v751_v17, %v766_v47  ;;  %v846_v5 = vsub.f32 %v830_v59, %v844_v53  ;;  %v847_v52 = vsub.f32 %v831_v44, %v845_v3 }
 0x2da   : > { %v931_v27 = vstv %s3521_s8  ;;  %v1069_v47 = vstv %s3523_s9  ;;  %v1087_v53 = vstv %s3525_s10  ;;  %v955_v3 = vstv %s3527_s11  ;;  %s3594_s8 = sld [smem:[#allocation6 + $0x21]] }
 0x2db   : > { %v771_v56 = vmul.f32 %v769_v51, %v769_v51  ;;  %v770_v15 = vmul.f32 %v768_v31, %v768_v31  ;;  %v848_v43 = vmul.f32 %v846_v5, %v846_v5  ;;  %v849_v41 = vmul.f32 %v847_v52, %v847_v52  ;;  %s3600_s9 = sld [smem:[#allocation6 + $0x11]] }
 0x2dc   : > { %s3612_s10 = sld [smem:[#allocation6 + $0x1d]] }
 0x2dd   : > { %v778_v21 = vrot.slane %v771_v56, 4  ;;  %v772_v35 = vrot.slane %v770_v15, 4  ;;  %v850_v29 = vrot.slane %v848_v43, 4  ;;  %v856_v25 = vrot.slane %v849_v41, 4  ;;  %s3624_s11 = sld [smem:[#allocation6 + $0x23]] }
 0x2df   : > { %v779_v63 = vadd.f32 %v778_v21, %v771_v56  ;;  %v773_v33 = vadd.f32 %v772_v35, %v770_v15  ;;  %v851_v14 = vadd.f32 %v850_v29, %v848_v43  ;;  %v857_v9 = vadd.f32 %v856_v25, %v849_v41 }
 0x2e0   : > { %v1015_v56 = vstv %s3537_s13  ;;  %v1033_v15 = vstv %s3539_s16  ;;  %v909_v43 = vstv %s3543_s19  ;;  %v951_v41 = vstv %s3545_s0  ;;  %s3876_s13 = sld [smem:[#allocation7]] }
 0x2e1   : > { %v780_v4 = vrot.slane %v779_v63, 2  ;;  %v774_v0 = vrot.slane %v773_v33, 2  ;;  %v852_v2 = vrot.slane %v851_v14, 2  ;;  %v858_v60 = vrot.slane %v857_v9, 2  ;;  %s3878_s16 = sld [smem:[#allocation7 + $0x1]] }
 0x2e2   : > { %v993_v21 = vstv %s3547_s2  ;;  %v1029_v29 = vstv %s3549_s4  ;;  %v1065_v25 = vstv %s3551_s5  ;;  %s3882_s19 = sld [smem:[#allocation7 + $0x6]] }
 0x2e3   : > { %v781_v38 = vadd.f32 %v780_v4, %v779_v63  ;;  %v775_v34 = vadd.f32 %v774_v0, %v773_v33  ;;  %v853_v39 = vadd.f32 %v852_v2, %v851_v14  ;;  %v859_v45 = vadd.f32 %v858_v60, %v857_v9  ;;  %s3884_s0 = sld [smem:[#allocation7 + $0x7]] }
 0x2e4   : > { %v1109_v63 = vstv %s3553_s6  ;;  %v919_v33 = vstv %s3555_s7  ;;  %v961_v14 = vstv %s3557_s24  ;;  %v1003_v9 = vstv %s3559_s28  ;;  %s3886_s2 = sld [smem:[#allocation7 + $0x8]] }
 0x2e5   : > { %v782_v36 = vrot.slane %v781_v38, 1  ;;  %v776_v54 = vrot.slane %v775_v34, 1  ;;  %v854_v11 = vrot.slane %v853_v39, 1  ;;  %v860_v16 = vrot.slane %v859_v45, 1  ;;  %s3888_s4 = sld [smem:[#allocation7 + $0x3]] }
 0x2e6   : > { %v1039_v2 = vstv %s3561_s29  ;;  %s3890_s5 = sld [smem:[#allocation7 + $0x4]] }
 0x2e7   : > { %v783_v62 = vadd.f32 %v782_v36, %v781_v38  ;;  %v777_v61 = vadd.f32 %v776_v54, %v775_v34  ;;  %v855_v17 = vadd.f32 %v854_v11, %v853_v39  ;;  %v861_v59 = vadd.f32 %v860_v16, %v859_v45  ;;  %s3892_s6 = sld [smem:[#allocation7 + $0x5]] }
 0x2e8   : > { %v1075_v39 = vstv %s3563_s20  ;;  %v1119_v11 = vstv %s3565_s21  ;;  %s3894_s7 = sld [smem:[#allocation7 + $0x9]]  ;;  %s2787_s20 = smov 3  }
 0x2e9   : > { %v785_v44 = vmul.f32 0.125, %v783_v62  ;;  %v784_v37 = vmul.f32 0.125, %v777_v61  ;;  %v862_v42 = vmul.f32 0.125, %v855_v17  ;;  %v863_v55 = vmul.f32 0.125, %v861_v59  ;;  %s3906_s24 = sld [smem:[#allocation7 + $0xa]]  ;;  %s2788_s21 = smov 2  }
 0x2ea   : > { %s3912_s28 = sld [smem:[#allocation7 + $0xb]] }
 0x2eb   : > { %v787_v28 = vadd.f32 1e-05, %v785_v44  ;;  %v786_v8 = vadd.f32 1e-05, %v784_v37  ;;  %v864_v49 = vadd.f32 1e-05, %v862_v42 }
 0x2ec   : > { %v865_v24 = vadd.f32 1e-05, %v863_v55  ;;  %s5307_s29 = sld [smem:[#allocation18_spill]] }
 0x2ed   : > { %2623 = vrsqrt.f32 %v787_v28 }
 0x2ee   : > { %2625 = vrsqrt.f32 %v786_v8 }
 0x2ef   : > { %2627 = vrsqrt.f32 %v864_v49 }
 0x2f0   : > { %2629 = vrsqrt.f32 %v865_v24 }
 0x2fa   : > { %v2624_v22 = vpop.eup %2623 }
 0x2fb   : > { %v2626_v46 = vpop.eup %2625  ;;  %v791_v57 = vmul.f32 %v2624_v22, %v769_v51  ;;  %v973_v51 = vstv %s3529_s12  ;;  %s3632_s12 = sld [smem:[#allocation6 + $0xc]]  ;;  %v925_v22 = vstv %s3568_s22  ;;  %s2789_s22 = smov 126  }
 0x2fc   : > { %v2628_v18 = vpop.eup %2627  ;;  %v790_v1 = vmul.f32 %v2626_v46, %v768_v31  ;;  %v1113_v31 = vstv %s3531_s14  ;;  %s3642_s14 = sld [smem:[#allocation6 + $0xe]] }
 0x2fd   : > { %vm793_vm10 = vcmp.ge.f32.partialorder %v791_v57, 0.0  ;;  %v795_v19 = vmul.f32 0.2, %v791_v57  ;;  %v868_v23 = vmul.f32 %v2628_v18, %v846_v5  ;;  %v2630_v40 = vpop.eup %2629  ;;  %v1131_v5 = vstv %s3533_s15  ;;  %s3749_s15 = sld [smem:[#allocation6 + $0x1e]] }
 0x2fe   : > { %vm792_vm11 = vcmp.ge.f32.partialorder %v790_v1, 0.0  ;;  %v794_v58 = vmul.f32 0.2, %v790_v1  ;;  %v869_v12 = vmul.f32 %v2630_v40, %v847_v52  ;;  %v997_v52 = vstv %s3535_s17  ;;  %s3780_s17 = sld [smem:[#allocation6 + $0x20]] }
 0x2ff   : > { %v3495_v13 = vsel %vm793_vm10, %v791_v57, %v795_v19  ;;  %v872_v7 = vmul.f32 0.2, %v868_v23  ;;  %vm870_vm14 = vcmp.ge.f32.partialorder %v868_v23, 0.0 }
 0x300   : > { %878 = vrot.lane.b32.xlu0 %v3495_v13, %s5291_s26  ;;  %v3499_v6 = vsel %vm792_vm11, %v790_v1, %v794_v58  ;;  %v873_v26 = vmul.f32 0.2, %v869_v12  ;;  %vm871_vm15 = vcmp.ge.f32.partialorder %v869_v12, 0.0  ;;  %v915_v4 = vmul.f32 %v913_v48, %v3495_v13 }
 0x301   : > { %876 = vrot.lane.b32.xlu1 %v3499_v6, %s5291_s26  ;;  %v3503_v10 = vsel %vm870_vm14, %v868_v23, %v872_v7  ;;  %v914_v0 = vmul.f32 %v913_v48, %v3499_v6  ;;  %v3610_v34 = vmul.f32 %v1069_v47, %v3495_v13  ;;  %v3619_v36 = vmul.f32 %v1069_v47, %v3499_v6  ;;  %v5293_v7 = vld [vmem:[#allocation21_spill] sm:$0xff] }
 0x302   : > { %v3513_v30 = vsel %vm871_vm15, %v869_v12, %v873_v26  ;;  %v3607_v38 = vmul.f32 %v931_v27, %v3503_v10  ;;  %v3622_v54 = vmul.f32 %v1087_v53, %v3503_v10  ;;  %v957_v16 = vmul.f32 %v955_v3, %v3495_v13  ;;  %v5294_v12 = vld [vmem:[#allocation22_spill] sm:$0xff] }
 0x303   : > { %v3604_v60 = vmul.f32 %v931_v27, %v3513_v30  ;;  %v3616_v45 = vmul.f32 %v1087_v53, %v3513_v30  ;;  %v3629_v62 = vmul.f32 %v973_v51, %v3513_v30  ;;  %v956_v61 = vmul.f32 %v955_v3, %v3499_v6 }
 0x304   : > { %892 = vrot.lane.b32.xlu0 %v3503_v10, %s5291_s26  ;;  %v3635_v17 = vmul.f32 %v973_v51, %v3503_v10  ;;  %v1115_v59 = vmul.f32 %v1113_v31, %v3495_v13  ;;  %v3639_v44 = vmul.f32 %v1131_v5, %v3513_v30  ;;  %v1114_v37 = vmul.f32 %v1113_v31, %v3499_v6 }
 0x305   : > { %884 = vrot.lane.b32.xlu1 %v3499_v6, %s5292_s27  ;;  %v3645_v28 = vmul.f32 %v1131_v5, %v3503_v10  ;;  %v998_v8 = vmul.f32 %v997_v52, %v3499_v6  ;;  %v999_v49 = vmul.f32 %v997_v52, %v3495_v13  ;;  %v3650_v55 = vmul.f32 %v1015_v56, %v3503_v10 }
 0x306   : > { %v3654_v46 = vmul.f32 %v1015_v56, %v3513_v30  ;;  %v1034_v57 = vmul.f32 %v1033_v15, %v3499_v6  ;;  %v1035_v18 = vmul.f32 %v1033_v15, %v3495_v13  ;;  %v1081_v58 = vstv %s3578_s25  ;;  %s3974_s25 = sld [smem:[#allocation9 + $0xa]] }
 0x307   : > { %v1009_v35 = vstv %s3632_s12  ;;  %v1021_v6 = vstv %s3642_s14  ;;  %s3988_s12 = sld [smem:[#allocation9 + $0x2d]] }
 0x308   : > { %900 = vrot.lane.b32.xlu0 %v3503_v10, %s5292_s27  ;;  %s3990_s14 = sld [smem:[#allocation9 + $0x34]] }
 0x309   : > { %886 = vrot.lane.b32.xlu1 %v3495_v13, %s5292_s27 }
 0x30d   : > { %894 = vrot.lane.b32.xlu1 %v3513_v30, %s5291_s26 }
 0x311   : > { %902 = vrot.lane.b32.xlu1 %v3513_v30, %s5292_s27 }
 0x372   : > { %v879_v42 = vpop.permute.xlu0 %878 }
 0x373   : > { %v877_v24 = vpop.permute.xlu1 %876 }
 0x374   : > { %v880_v1 = vsel %vm372_vm1, %v877_v24, %v879_v42  ;;  %v881_v19 = vsel %vm372_vm1, %v879_v42, %v877_v24  ;;  %v979_v42 = vstv %s3612_s10  ;;  %s3982_s10 = sld [smem:[#allocation9 + $0x1f]] }
 0x375   : > { %v882_v40 = vsel %vm375_vm4, %v881_v19, 0.0  ;;  %v883_v26 = vsel %vm376_vm5, %v880_v1, 0.0 }
 0x376   : > { %v910_v13 = vmul.f32 %v909_v43, %v882_v40  ;;  %v911_v27 = vmul.f32 %v909_v43, %v883_v26  ;;  %v953_v47 = vmul.f32 %v951_v41, %v883_v26  ;;  %v994_v3 = vmul.f32 %v993_v21, %v882_v40 }
 0x377   : > { %v995_v51 = vmul.f32 %v993_v21, %v883_v26  ;;  %v1030_v31 = vmul.f32 %v1029_v29, %v882_v40  ;;  %v1031_v5 = vmul.f32 %v1029_v29, %v883_v26  ;;  %v885_v52 = vpop.permute.xlu1 %884  ;;  %v952_v56 = vmul.f32 %v951_v41, %v882_v40 }
 0x378   : > { %v1067_v15 = vmul.f32 %v1065_v25, %v883_v26  ;;  %v1066_v1 = vmul.f32 %v1065_v25, %v882_v40  ;;  %v1111_v19 = vmul.f32 %v1109_v63, %v883_v26  ;;  %v1110_v23 = vmul.f32 %v1109_v63, %v882_v40 }
 0x379   : > { %v917_v43 = vadd.f32 %v915_v4, %v911_v27  ;;  %v916_v48 = vadd.f32 %v914_v0, %v910_v13  ;;  %v959_v53 = vadd.f32 %v957_v16, %v953_v47  ;;  %v3679_v29 = vadd.f32 %v998_v8, %v994_v3  ;;  %v893_v8 = vpop.permute.xlu0 %892 }
 0x37a   : > { %v3681_v41 = vadd.f32 %v999_v49, %v995_v51  ;;  %v3683_v24 = vadd.f32 %v1034_v57, %v1030_v31  ;;  %v3685_v25 = vadd.f32 %v1035_v18, %v1031_v5  ;;  %v1073_v0 = vadd.f32 %v3610_v34, %v1067_v15 }
 0x37b   : > { %v887_v21 = vpop.permute.xlu1 %886  ;;  %v958_v16 = vadd.f32 %v956_v61, %v952_v56  ;;  %v1072_v18 = vadd.f32 %v3619_v36, %v1066_v1  ;;  %v1117_v40 = vadd.f32 %v1115_v59, %v1111_v19  ;;  %v1116_v61 = vadd.f32 %v1114_v37, %v1110_v23 }
 0x37c   : > { %v888_v63 = vsel %vm383_vm0, %v885_v52, %v887_v21  ;;  %v889_v4 = vsel %vm383_vm0, %v887_v21, %v885_v52 }
 0x37d   : > { %v890_v49 = vsel %vm386_vm2, %v888_v63, 0.0  ;;  %v891_v57 = vsel %vm387_vm3, %v889_v4, 0.0 }
 0x37e   : > { %v920_v26 = vmul.f32 %v919_v33, %v890_v49  ;;  %v921_v13 = vmul.f32 %v919_v33, %v891_v57  ;;  %v962_v34 = vmul.f32 %v961_v14, %v890_v49  ;;  %v963_v27 = vmul.f32 %v961_v14, %v891_v57 }
 0x37f   : > { %v3707_v47 = vmul.f32 %v1003_v9, %v890_v49  ;;  %v3711_v3 = vmul.f32 %v1003_v9, %v891_v57  ;;  %v3715_v51 = vmul.f32 %v1039_v2, %v890_v49  ;;  %v895_v36 = vpop.permute.xlu1 %894  ;;  %v1076_v59 = vmul.f32 %v1075_v39, %v890_v49 }
 0x380   : > { %v1077_v33 = vmul.f32 %v1075_v39, %v891_v57  ;;  %v1120_v14 = vmul.f32 %v1119_v11, %v890_v49  ;;  %v1121_v37 = vmul.f32 %v1119_v11, %v891_v57  ;;  %v896_v9 = vsel %vm372_vm1, %v893_v8, %v895_v36  ;;  %v901_v11 = vpop.permute.xlu0 %900 }
 0x381   : > { %v897_v23 = vsel %vm372_vm1, %v895_v36, %v893_v8  ;;  %v923_v31 = vadd.f32 %v921_v13, %v917_v43  ;;  %v922_v5 = vadd.f32 %v920_v26, %v916_v48  ;;  %v3735_v39 = vsel %vm376_vm5, %v896_v9, 0.0 }
 0x382   : > { %v3731_v52 = vsel %vm375_vm4, %v897_v23, 0.0  ;;  %v1079_v56 = vadd.f32 %v1077_v33, %v1073_v0  ;;  %v1078_v15 = vadd.f32 %v1076_v59, %v1072_v18  ;;  %v927_v19 = vmul.f32 %v925_v22, %v3735_v39 }
 0x383   : > { %v903_v1 = vpop.permute.xlu1 %902  ;;  %v926_v48 = vmul.f32 %v925_v22, %v3731_v52  ;;  %v1083_v43 = vmul.f32 %v1081_v58, %v3735_v39  ;;  %v1082_v21 = vmul.f32 %v1081_v58, %v3731_v52  ;;  %v965_v0 = vadd.f32 %v963_v27, %v959_v53 }
 0x384   : > { %v904_v63 = vsel %vm383_vm0, %v901_v11, %v903_v1  ;;  %v905_v4 = vsel %vm383_vm0, %v903_v1, %v901_v11  ;;  %v5295_v8 = vstv %s3587_s30  ;;  %v929_v18 = vadd.f32 %v927_v19, %v923_v31  ;;  %s3976_s30 = sld [smem:[#allocation9 + $0x11]] }
 0x385   : > { %v969_v49 = vmul.f32 %v5295_v8, %v3735_v39  ;;  %v3760_v22 = vsel %vm386_vm2, %v904_v63, 0.0  ;;  %v3764_v58 = vsel %vm387_vm3, %v905_v4, 0.0  ;;  %v928_v26 = vadd.f32 %v926_v48, %v922_v5 }
 0x386   : > { %v5296_v13 = vstv %s3572_s23  ;;  %v1085_v27 = vadd.f32 %v1083_v43, %v1079_v56  ;;  %v5298_v33 = vstv %s3600_s9  ;;  %v935_v23 = vadd.f32 %v3604_v60, %v929_v18  ;;  %s3970_s23 = sld [smem:[#allocation9 + $0x3]]  ;;  %s5127_s9 = smov 125  }
 0x387   : > { %v939_v36 = vmul.f32 %v5296_v13, %v3764_v58  ;;  %v5297_v59 = vmov %v5296_v13  ;;  %v1095_v9 = vmul.f32 %v5298_v33, %v3764_v58  ;;  %v934_v11 = vadd.f32 %v3607_v38, %v928_v26 }
 0x388   : > { %v938_v53 = vmul.f32 %v5297_v59, %v3760_v22  ;;  %v1084_v1 = vadd.f32 %v1082_v21, %v1078_v15  ;;  %v5299_v31 = vmov %v5298_v33  ;;  %v1091_v19 = vadd.f32 %v3616_v45, %v1085_v27 }
 0x389   : > { %v1094_v5 = vmul.f32 %v5299_v31, %v3760_v22  ;;  %v971_v48 = vadd.f32 %v969_v49, %v965_v0  ;;  %v981_v56 = vmul.f32 %v979_v42, %v3764_v58  ;;  %v964_v43 = vadd.f32 %v962_v34, %v958_v16 }
 0x38a   : > { %v941_v63 = vadd.f32 %v939_v36, %v935_v23  ;;  %v940_v60 = vadd.f32 %v938_v53, %v934_v11  ;;  %v1090_v38 = vadd.f32 %v3622_v54, %v1084_v1  ;;  %v5300_v15 = vmov %v5295_v8 }
 0x38b   : > { %v968_v21 = vmul.f32 %v5300_v15, %v3731_v52  ;;  %v1041_v4 = vmul.f32 %v1039_v2, %v891_v57  ;;  %v1097_v8 = vadd.f32 %v1095_v9, %v1091_v19  ;;  %v977_v45 = vadd.f32 %v3629_v62, %v971_v48 }
 0x38c   : > { %v980_v0 = vmul.f32 %v979_v42, %v3760_v22  ;;  %944 = vrot.lane.b32.xlu1 %v941_v63, %s5125_s1  ;;  %942 = vrot.lane.b32.xlu0 %v940_v60, %s5125_s1  ;;  %v1123_v54 = vadd.f32 %v1121_v37, %v1117_v40  ;;  %v5301_v34 = vstv %s3594_s8  ;;  %v1045_v18 = vstv %s3749_s15  ;;  %s3978_s8 = sld [smem:[#allocation9 + $0x18]] }
 0x38d   : > { %v970_v16 = vadd.f32 %v968_v21, %v964_v43  ;;  %v1127_v49 = vmul.f32 %v5301_v34, %v3735_v39  ;;  %v1096_v2 = vadd.f32 %v1094_v5, %v1090_v38  ;;  %v983_v57 = vadd.f32 %v981_v56, %v977_v45  ;;  %s3994_s15 = sld [smem:[#allocation9 + $0x3b]] }
 0x38e   : > { %v1122_v62 = vadd.f32 %v1120_v14, %v1116_v61  ;;  %v5302_v42 = vmov %v5301_v34  ;;  %v5303_v59 = vstv %s3624_s11  ;;  %v1006_v37 = vadd.f32 %v3707_v47, %v3679_v29  ;;  %s3986_s11 = sld [smem:[#allocation9 + $0x26]] }
 0x38f   : > { %v1126_v26 = vmul.f32 %v5302_v42, %v3731_v52  ;;  %v976_v13 = vadd.f32 %v3635_v17, %v970_v16  ;;  %v1129_v36 = vadd.f32 %v1127_v49, %v1123_v54  ;;  %v1139_v40 = vmul.f32 %v5303_v59, %v3764_v58 }
 0x390   : > { %v1007_v27 = vadd.f32 %v3711_v3, %v3681_v41  ;;  %v1010_v61 = vmul.f32 %v1009_v35, %v3731_v52  ;;  %v1011_v14 = vmul.f32 %v1009_v35, %v3735_v39  ;;  %1100 = vrot.lane.b32.xlu1 %v1097_v8, %s5123_s3  ;;  %1098 = vrot.lane.b32.xlu0 %v1096_v2, %s5123_s3  ;;  %v1057_v41 = vstv %s3780_s17  ;;  %s3998_s17 = sld [smem:[#allocation9 + $0x42]] }
 0x391   : > { %v1128_v53 = vadd.f32 %v1126_v26, %v1122_v62  ;;  %v1135_v17 = vadd.f32 %v3639_v44, %v1129_v36  ;;  %v5304_v33 = vmov %v5303_v59  ;;  %v1022_v47 = vmul.f32 %v1021_v6, %v3760_v22 }
 0x392   : > { %v1138_v29 = vmul.f32 %v5304_v33, %v3760_v22  ;;  %v1012_v9 = vadd.f32 %v1010_v61, %v1006_v37  ;;  %v1013_v23 = vadd.f32 %v1011_v14, %v1007_v27  ;;  %v1023_v35 = vmul.f32 %v1021_v6, %v3764_v58 }
 0x393   : > { %v1134_v3 = vadd.f32 %v3645_v28, %v1128_v53  ;;  %v982_v11 = vadd.f32 %v980_v0, %v976_v13  ;;  %v1042_v1 = vadd.f32 %v3715_v51, %v3683_v24  ;;  %v1043_v44 = vadd.f32 %v1041_v4, %v3685_v25 }
 0x394   : > { %v1046_v31 = vmul.f32 %v1045_v18, %v3731_v52  ;;  %v1018_v5 = vadd.f32 %v3650_v55, %v1012_v9  ;;  %v1019_v19 = vadd.f32 %v3654_v46, %v1013_v23  ;;  %v1047_v48 = vmul.f32 %v1045_v18, %v3735_v39  ;;  %986 = vrot.lane.b32.xlu1 %v983_v57, %s5125_s1 }
 0x395   : > { %v5305_v28 = vstv %s3541_s18  ;;  %984 = vrot.lane.b32.xlu0 %v982_v11, %s5125_s1  ;;  %v1058_v25 = vmul.f32 %v1057_v41, %v3760_v22  ;;  %v1059_v46 = vmul.f32 %v1057_v41, %v3764_v58  ;;  %v1141_v63 = vadd.f32 %v1139_v40, %v1135_v17  ;;  %s3880_s18 = sld [smem:[#allocation7 + $0x2]] }
 0x396   : > { %v1052_v56 = vmul.f32 %v5305_v28, %v3503_v10  ;;  %v1048_v6 = vadd.f32 %v1046_v31, %v1042_v1  ;;  %v5306_v24 = vmov %v5305_v28  ;;  %v1024_v52 = vadd.f32 %v1022_v47, %v1018_v5  ;;  %s4048_s1 = sld [smem:[#allocation9 + $0x5c]] }
 0x397   : > { %v1053_v51 = vmul.f32 %v5306_v24, %v3513_v30  ;;  %v1025_v43 = vadd.f32 %v1023_v35, %v1019_v19  ;;  %v1049_v55 = vadd.f32 %v1047_v48, %v1043_v44  ;;  %v1140_v39 = vadd.f32 %v1138_v29, %v1134_v3 }
 0x398   : > { %v1054_v60 = vadd.f32 %v1052_v56, %v1048_v6  ;;  %1144 = vrot.lane.b32.xlu1 %v1141_v63, %s5123_s3 }
 0x399   : > { %v1055_v38 = vadd.f32 %v1053_v51, %v1049_v55  ;;  %1142 = vrot.lane.b32.xlu0 %v1140_v39, %s5123_s3  ;;  %s4046_s3 = sld [smem:[#allocation9 + $0x55]] }
 0x39a   : > { %v1060_v10 = vadd.f32 %v1058_v25, %v1054_v60 }
 0x39b   : > { %v1061_v15 = vadd.f32 %v1059_v46, %v1055_v38 }
 0x39c   : > { %5328 = sst [smem:[#allocation40_spill]] %s4048_s1 }
 0x39d   : > { %s4068_s1 = sld [smem:[#allocation9 + $0x8]] }
 0x39f   : > { %5327 = sst [smem:[#allocation39_spill]] %s4046_s3 }
 0x3a0   : > { %s4066_s3 = sld [smem:[#allocation9 + $0x1]] }
 0x3a3   : > { %5338 = sst [smem:[#allocation49_spill]] %s4068_s1 }
 0x3a4   : > { %s4090_s1 = sld [smem:[#allocation9 + $0x25]] }
 0x3a6   : > { %5337 = sst [smem:[#allocation48_spill]] %s4066_s3 }
 0x3a7   : > { %s4088_s3 = sld [smem:[#allocation9 + $0x1e]] }
 0x3aa   : > { %5348 = sst [smem:[#allocation59_spill]] %s4090_s1 }
 0x3ab   : > { %s4110_s1 = sld [smem:[#allocation9 + $0xc]] }
 0x3ad   : > { %5347 = sst [smem:[#allocation58_spill]] %s4088_s3 }
 0x3ae   : > { %s4108_s3 = sld [smem:[#allocation9 + $0x5]] }
 0x3b1   : > { %5358 = sst [smem:[#allocation69_spill]] %s4110_s1 }
 0x3b2   : > { %s4126_s1 = sld [smem:[#allocation9 + $0x14]] }
 0x3b4   : > { %5357 = sst [smem:[#allocation68_spill]] %s4108_s3 }
 0x3b5   : > { %s4124_s3 = sld [smem:[#allocation9 + $0xd]] }
 0x3b8   : > { %5366 = sst [smem:[#allocation77_spill]] %s4126_s1 }
 0x3b9   : > { %s5479_s1 = sld [smem:[#allocation40_spill]] }
 0x3bb   : > { %5365 = sst [smem:[#allocation76_spill]] %s4124_s3 }
 0x3bc   : > { %s4140_s3 = sld [smem:[#allocation9 + $0x33]] }
 0x3c2   : > { %5370 = sst [smem:[#allocation81_spill]] %s4140_s3 }
 0x3fe   : > { %v945_v21 = vpop.permute.xlu1 %944  ;;  %v943_v4 = vpop.permute.xlu0 %942 }
 0x3ff   : > { %v947_v30 = vsel %vm444_vm6, %v945_v21, %v943_v4  ;;  %v946_v22 = vsel %vm444_vm6, %v943_v4, %v945_v21  ;;  %v1213_v21 = vstv %s3876_s13  ;;  %v1217_v4 = vstv %s3878_s16  ;;  %s4000_s13 = sld [smem:[#allocation9 + $0x50]] }
 0x400   : > { %v948_v58 = vsel %vm447_vm7, %v947_v30, 0.0  ;;  %v1027_v16 = vadd.f32 %v1025_v43, %v946_v22  ;;  %s4002_s16 = sld [smem:[#allocation9 + $0x57]] }
 0x401   : > { %v1026_v8 = vadd.f32 %v1024_v52, %v948_v58 }
 0x402   : > { %v1101_v45 = vpop.permute.xlu1 %1100  ;;  %v1099_v0 = vpop.permute.xlu0 %1098 }
 0x403   : > { %v1102_v54 = vsel %vm603_vm8, %v1099_v0, %v1101_v45  ;;  %v1103_v34 = vsel %vm603_vm8, %v1101_v45, %v1099_v0  ;;  %v1223_v0 = vstv %s3880_s18  ;;  %s4006_s18 = sld [smem:[#allocation9 + $0x5e]] }
 0x404   : > { %v1105_v49 = vsel %vm607_vm9, %v1103_v34, 0.0  ;;  %v1106_v18 = vadd.f32 %v1102_v54, %v1026_v8  ;;  %v1297_v54 = vstv %s3884_s0  ;;  %v1303_v34 = vstv %s3886_s2  ;;  %s4012_s0 = sld [smem:[#allocation9 + $0x31]] }
 0x405   : > { %v1107_v2 = vadd.f32 %v1105_v49, %v1027_v16  ;;  %v1293_v16 = vstv %s3882_s19  ;;  %v1229_v49 = vstv %s3888_s4  ;;  %s4010_s19 = sld [smem:[#allocation9 + $0x49]] }
 0x406   : > { %v987_v57 = vpop.permute.xlu1 %986  ;;  %s4014_s2 = sld [smem:[#allocation9 + $0x38]] }
 0x407   : > { %v985_v62 = vpop.permute.xlu0 %984  ;;  %v1152_v26 = vadd.f32 %v1107_v2, %v1106_v18  ;;  %s4018_s4 = sld [smem:[#allocation9 + $0x3f]] }
 0x408   : > { %v989_v42 = vsel %vm444_vm6, %v987_v57, %v985_v62  ;;  %v988_v13 = vsel %vm444_vm6, %v985_v62, %v987_v57  ;;  %v1309_v57 = vstv %s3894_s7  ;;  %s4026_s7 = sld [smem:[#allocation9 + $0x54]] }
 0x409   : > { %v990_v36 = vsel %vm447_vm7, %v989_v42, 0.0  ;;  %1153 = vadd.xlane.f32.xlu0 %v1152_v26  ;;  %v1063_v53 = vadd.f32 %v1061_v15, %v988_v13 }
 0x40a   : > { %v1062_v59 = vadd.f32 %v1060_v10, %v990_v36  ;;  %v1145_v40 = vpop.permute.xlu1 %1144  ;;  %5315 = sst [smem:[#allocation27_spill]] %s4012_s0 }
 0x40b   : > { %v1143_v37 = vpop.permute.xlu0 %1142  ;;  %5314 = sst [smem:[#allocation18_spill]] %s4010_s19 }
 0x40c   : > { %v1146_v27 = vsel %vm603_vm8, %v1143_v37, %v1145_v40  ;;  %v1147_v61 = vsel %vm603_vm8, %v1145_v40, %v1143_v37  ;;  %5316 = sst [smem:[#allocation28_spill]] %s4014_s2 }
 0x40d   : > { %v1149_v14 = vsel %vm607_vm9, %v1147_v61, 0.0  ;;  %v1150_v17 = vadd.f32 %v1146_v27, %v1062_v59  ;;  %5317 = sst [smem:[#allocation29_spill]] %s4018_s4 }
 0x40e   : > { %v1151_v33 = vadd.f32 %v1149_v14, %v1063_v53  ;;  %5320 = sst [smem:[#allocation32_spill]] %s4026_s7 }
 0x40f   : > { %s4329_s19 = sld [smem:[#allocation9 + $0x60]] }
 0x410   : > { %v1174_v29 = vadd.f32 %v1151_v33, %v1150_v17 }
 0x412   : > { %1175 = vadd.xlane.f32.xlu1 %v1174_v29 }
 0x492   : > { %v1154_v47 = vpop.xlane.xlu0 %1153 }
 0x493   : > { %v1155_v41 = vmul.f32 0.00390625, %v1154_v47 }
 0x495   : > { %v1156_v3 = vsub.f32 %v1106_v18, %v1155_v41  ;;  %v1157_v9 = vsub.f32 %v1107_v2, %v1155_v41  ;;  %v1235_v18 = vstv %s3890_s5  ;;  %v1241_v2 = vstv %s3892_s6  ;;  %s4022_s5 = sld [smem:[#allocation9 + $0x46]] }
 0x496   : > { %s4024_s6 = sld [smem:[#allocation9 + $0x4d]] }
 0x497   : > { %v1158_v23 = vmul.f32 %v1156_v3, %v1156_v3  ;;  %v1159_v35 = vmul.f32 %v1157_v9, %v1157_v9 }
 0x499   : > { %v1160_v11 = vadd.f32 %v1159_v35, %v1158_v23 }
 0x49b   : > { %v1176_v1 = vpop.xlane.xlu1 %1175  ;;  %1161 = vadd.xlane.f32.xlu0 %v1160_v11  ;;  %5318 = sst [smem:[#allocation30_spill]] %s4022_s5 }
 0x49c   : > { %v1177_v44 = vmul.f32 0.00390625, %v1176_v1  ;;  %5319 = sst [smem:[#allocation31_spill]] %s4024_s6 }
 0x49e   : > { %v1178_v31 = vsub.f32 %v1150_v17, %v1177_v44  ;;  %v1179_v5 = vsub.f32 %v1151_v33, %v1177_v44 }
 0x4a0   : > { %v1180_v19 = vmul.f32 %v1178_v31, %v1178_v31  ;;  %v1181_v48 = vmul.f32 %v1179_v5, %v1179_v5 }
 0x4a2   : > { %v1182_v28 = vadd.f32 %v1181_v48, %v1180_v19 }
 0x4a4   : > { %1183 = vadd.xlane.f32.xlu0 %v1182_v28  ;;  %v1315_v28 = vstv %s3906_s24  ;;  %s4030_s24 = sld [smem:[#allocation9 + $0x5b]] }
 0x4aa   : > { %5321 = sst [smem:[#allocation33_spill]] %s4030_s24 }
 0x4ab   : > { %s4072_s24 = sld [smem:[#allocation9 + $0x16]] }
 0x4b1   : > { %5340 = sst [smem:[#allocation51_spill]] %s4072_s24 }
 0x4b2   : > { %s4094_s24 = sld [smem:[#allocation9 + $0x4]] }
 0x4b8   : > { %5350 = sst [smem:[#allocation61_spill]] %s4094_s24 }
 0x4b9   : > { %s4322_s24 = sld [smem:[#allocation9 + $0x5a]] }
 0x524   : > { %v1162_v56 = vpop.xlane.xlu0 %1161 }
 0x525   : > { %v1163_v6 = vmul.f32 0.00390625, %v1162_v56  ;;  %v1321_v56 = vstv %s3912_s28  ;;  %s4034_s28 = sld [smem:[#allocation9 + $0x32]] }
 0x527   : > { %v1164_v24 = vadd.f32 1e-05, %v1163_v6 }
 0x529   : > { %2631 = vrsqrt.f32 %v1164_v24 }
 0x52b   : > { %5322 = sst [smem:[#allocation34_spill]] %s4034_s28 }
 0x52c   : > { %s4054_s28 = sld [smem:[#allocation9 + $0x7]] }
 0x52d   : > { %v1184_v51 = vpop.xlane.xlu0 %1183 }
 0x52e   : > { %v1185_v25 = vmul.f32 0.00390625, %v1184_v51 }
 0x530   : > { %v1186_v52 = vadd.f32 1e-05, %v1185_v25 }
 0x532   : > { %2633 = vrsqrt.f32 %v1186_v52  ;;  %5331 = sst [smem:[#allocation42_spill]] %s4054_s28 }
 0x533   : > { %s4076_s28 = sld [smem:[#allocation9 + $0x24]] }
 0x536   : > { %v2632_v43 = vpop.eup %2631 }
 0x537   : > { %v1166_v55 = vmul.f32 %v2632_v43, %v1156_v3  ;;  %v1167_v46 = vmul.f32 %v2632_v43, %v1157_v9 }
 0x539   : > { %vm1168_vm10 = vcmp.ge.f32.partialorder %v1166_v55, 0.0  ;;  %vm1169_vm11 = vcmp.ge.f32.partialorder %v1167_v46, 0.0  ;;  %v1170_v63 = vmul.f32 0.2, %v1166_v55  ;;  %v1171_v39 = vmul.f32 0.2, %v1167_v46 }
 0x53a   : > { %5342 = sst [smem:[#allocation53_spill]] %s4076_s28 }
 0x53b   : > { %v1172_v60 = vsel %vm1168_vm10, %v1166_v55, %v1170_v63  ;;  %v1173_v38 = vsel %vm1169_vm11, %v1167_v46, %v1171_v39  ;;  %s4098_s28 = sld [smem:[#allocation9 + $0x12]] }
 0x53c   : > { %v1196_v10 = vrot.slane %v1172_v60, 7  ;;  %v1197_v15 = vrot.slane %v1173_v38, 7  ;;  %v1200_v8 = vrot.slane %v1172_v60, 1  ;;  %v1201_v45 = vrot.slane %v1173_v38, 1 }
 0x53d   : > { %v1218_v53 = vmul.f32 %v1217_v4, %v1172_v60  ;;  %v1219_v27 = vmul.f32 %v1217_v4, %v1173_v38  ;;  %v1298_v61 = vmul.f32 %v1297_v54, %v1172_v60  ;;  %v1299_v14 = vmul.f32 %v1297_v54, %v1173_v38 }
 0x53e   : > { %v1198_v22 = vsel %vm5202_vm12, %v1196_v10, 0.0  ;;  %v1199_v58 = vsel %vm5202_vm12, %v1197_v15, 0.0  ;;  %v1202_v36 = vsel %vm5199_vm13, %v1200_v8, 0.0  ;;  %v1203_v59 = vsel %vm5199_vm13, %v1201_v45, 0.0 }
 0x53f   : > { %v2634_v30 = vpop.eup %2633  ;;  %v1214_v62 = vmul.f32 %v1213_v21, %v1198_v22  ;;  %v1215_v42 = vmul.f32 %v1213_v21, %v1199_v58  ;;  %v1294_v40 = vmul.f32 %v1293_v16, %v1198_v22  ;;  %v1295_v37 = vmul.f32 %v1293_v16, %v1199_v58 }
 0x540   : > { %v1188_v26 = vmul.f32 %v2634_v30, %v1178_v31  ;;  %v1189_v13 = vmul.f32 %v2634_v30, %v1179_v5  ;;  %v1224_v41 = vmul.f32 %v1223_v0, %v1202_v36  ;;  %v1225_v3 = vmul.f32 %v1223_v0, %v1203_v59 }
 0x541   : > { %v1220_v29 = vadd.f32 %v1218_v53, %v1214_v62  ;;  %v1221_v47 = vadd.f32 %v1219_v27, %v1215_v42  ;;  %v1300_v9 = vadd.f32 %v1298_v61, %v1294_v40  ;;  %v1301_v23 = vadd.f32 %v1299_v14, %v1295_v37  ;;  %5352 = sst [smem:[#allocation63_spill]] %s4098_s28 }
 0x542   : > { %vm1190_vm14 = vcmp.ge.f32.partialorder %v1188_v26, 0.0  ;;  %vm1191_vm15 = vcmp.ge.f32.partialorder %v1189_v13, 0.0  ;;  %v1192_v17 = vmul.f32 0.2, %v1188_v26  ;;  %v1193_v33 = vmul.f32 0.2, %v1189_v13 }
 0x543   : > { %v1304_v19 = vmul.f32 %v1303_v34, %v1202_v36  ;;  %v1305_v48 = vmul.f32 %v1303_v34, %v1203_v59  ;;  %v1226_v6 = vadd.f32 %v1224_v41, %v1220_v29  ;;  %v1227_v24 = vadd.f32 %v1225_v3, %v1221_v47  ;;  %s4116_s28 = sld [smem:[#allocation9 + $0x21]] }
 0x544   : > { %v1194_v35 = vsel %vm1190_vm14, %v1188_v26, %v1192_v17  ;;  %v1195_v11 = vsel %vm1191_vm15, %v1189_v13, %v1193_v33 }
 0x545   : > { %v1204_v1 = vrot.slane %v1194_v35, 7  ;;  %v1205_v44 = vrot.slane %v1195_v11, 7  ;;  %v1208_v31 = vrot.slane %v1194_v35, 1  ;;  %v1209_v5 = vrot.slane %v1195_v11, 1 }
 0x546   : > { %v1306_v52 = vadd.f32 %v1304_v19, %v1300_v9  ;;  %v1307_v43 = vadd.f32 %v1305_v48, %v1301_v23  ;;  %v1236_v21 = vmul.f32 %v1235_v18, %v1194_v35  ;;  %v1237_v4 = vmul.f32 %v1235_v18, %v1195_v11 }
 0x547   : > { %v1206_v51 = vsel %vm5202_vm12, %v1204_v1, 0.0  ;;  %v1207_v25 = vsel %vm5202_vm12, %v1205_v44, 0.0  ;;  %v1210_v63 = vsel %vm5199_vm13, %v1208_v31, 0.0  ;;  %v1211_v39 = vsel %vm5199_vm13, %v1209_v5, 0.0 }
 0x548   : > { %v1230_v55 = vmul.f32 %v1229_v49, %v1206_v51  ;;  %v1231_v46 = vmul.f32 %v1229_v49, %v1207_v25  ;;  %v1310_v60 = vmul.f32 %v1309_v57, %v1206_v51  ;;  %v1311_v38 = vmul.f32 %v1309_v57, %v1207_v25 }
 0x549   : > { %v1316_v58 = vmul.f32 %v1315_v28, %v1194_v35  ;;  %v1317_v8 = vmul.f32 %v1315_v28, %v1195_v11  ;;  %v1242_v16 = vmul.f32 %v1241_v2, %v1210_v63  ;;  %v1243_v54 = vmul.f32 %v1241_v2, %v1211_v39  ;;  %5361 = sst [smem:[#allocation72_spill]] %s4116_s28 }
 0x54a   : > { %v1232_v10 = vadd.f32 %v1230_v55, %v1226_v6  ;;  %v1233_v15 = vadd.f32 %v1231_v46, %v1227_v24  ;;  %v1312_v30 = vadd.f32 %v1310_v60, %v1306_v52  ;;  %v1313_v22 = vadd.f32 %v1311_v38, %v1307_v43  ;;  %s4132_s28 = sld [smem:[#allocation9 + $0x29]] }
 0x54b   : > { %v1322_v62 = vmul.f32 %v1321_v56, %v1210_v63  ;;  %v1323_v42 = vmul.f32 %v1321_v56, %v1211_v39  ;;  %vm1396_vm13 = vcmp.ge.s32.totalorder %v5293_v7, 2  ;;  %vm1397_vm12 = vcmp.ge.s32.totalorder %v5294_v12, 2 }
 0x54c   : > { %v1238_v45 = vadd.f32 %v1236_v21, %v1232_v10  ;;  %v1239_v0 = vadd.f32 %v1237_v4, %v1233_v15  ;;  %v1318_v34 = vadd.f32 %v1316_v58, %v1312_v30  ;;  %v1319_v49 = vadd.f32 %v1317_v8, %v1313_v22 }
 0x54e   : > { %v1244_v26 = vadd.f32 %v1242_v16, %v1238_v45  ;;  %v1245_v13 = vadd.f32 %v1243_v54, %v1239_v0  ;;  %v1324_v36 = vadd.f32 %v1322_v62, %v1318_v34  ;;  %v1325_v57 = vadd.f32 %v1323_v42, %v1319_v49 }
 0x550   : > { %v1246_v59 = vrot.slane %v1244_v26, 4  ;;  %v1252_v40 = vrot.slane %v1245_v13, 4  ;;  %v1326_v37 = vrot.slane %v1324_v36, 4  ;;  %v1332_v18 = vrot.slane %v1325_v57, 4  ;;  %5368 = sst [smem:[#allocation79_spill]] %s4132_s28 }
 0x551   : > { %s4146_s28 = sld [smem:[#allocation9 + $0x3a]] }
 0x552   : > { %v1247_v53 = vadd.f32 %v1246_v59, %v1244_v26  ;;  %v1253_v27 = vadd.f32 %v1252_v40, %v1245_v13  ;;  %v1327_v61 = vadd.f32 %v1326_v37, %v1324_v36  ;;  %v1333_v14 = vadd.f32 %v1332_v18, %v1325_v57 }
 0x554   : > { %v1248_v17 = vrot.slane %v1247_v53, 2  ;;  %v1254_v33 = vrot.slane %v1253_v27, 2  ;;  %v1328_v29 = vrot.slane %v1327_v61, 2  ;;  %v1334_v2 = vrot.slane %v1333_v14, 2 }
 0x556   : > { %v1249_v47 = vadd.f32 %v1248_v17, %v1247_v53  ;;  %v1255_v41 = vadd.f32 %v1254_v33, %v1253_v27  ;;  %v1329_v3 = vadd.f32 %v1328_v29, %v1327_v61  ;;  %v1335_v9 = vadd.f32 %v1334_v2, %v1333_v14 }
 0x558   : > { %v1250_v23 = vrot.slane %v1249_v47, 1  ;;  %v1256_v35 = vrot.slane %v1255_v41, 1  ;;  %v1330_v11 = vrot.slane %v1329_v3, 1  ;;  %v1336_v1 = vrot.slane %v1335_v9, 1 }
 0x55a   : > { %v1251_v44 = vadd.f32 %v1250_v23, %v1249_v47  ;;  %v1257_v31 = vadd.f32 %v1256_v35, %v1255_v41  ;;  %v1331_v5 = vadd.f32 %v1330_v11, %v1329_v3  ;;  %v1337_v19 = vadd.f32 %v1336_v1, %v1335_v9 }
 0x55c   : > { %v1258_v48 = vmul.f32 0.125, %v1251_v44  ;;  %v1259_v28 = vmul.f32 0.125, %v1257_v31  ;;  %v1338_v56 = vmul.f32 0.125, %v1331_v5  ;;  %v1339_v6 = vmul.f32 0.125, %v1337_v19  ;;  %v2659_v5 = vld [vmem:[%s5307_s29] sm:$0xff] }
 0x55e   : > { %v1260_v24 = vsub.f32 %v1244_v26, %v1258_v48  ;;  %v1261_v51 = vsub.f32 %v1245_v13, %v1259_v28  ;;  %v1340_v25 = vsub.f32 %v1324_v36, %v1338_v56  ;;  %v1341_v52 = vsub.f32 %v1325_v57, %v1339_v6  ;;  %v2660_v28 = vld [vmem:[%s5307_s29 + $0x8] sm:$0xff] }
 0x560   : > { %v1262_v43 = vmul.f32 %v1260_v24, %v1260_v24  ;;  %v1263_v55 = vmul.f32 %v1261_v51, %v1261_v51  ;;  %v1342_v46 = vmul.f32 %v1340_v25, %v1340_v25  ;;  %v1343_v63 = vmul.f32 %v1341_v52, %v1341_v52 }
 0x562   : > { %v1264_v39 = vrot.slane %v1262_v43, 4  ;;  %v1270_v60 = vrot.slane %v1263_v55, 4  ;;  %v1344_v38 = vrot.slane %v1342_v46, 4  ;;  %v1350_v10 = vrot.slane %v1343_v63, 4 }
 0x564   : > { %v1265_v15 = vadd.f32 %v1264_v39, %v1262_v43  ;;  %v1271_v21 = vadd.f32 %v1270_v60, %v1263_v55  ;;  %v1345_v4 = vadd.f32 %v1344_v38, %v1342_v46  ;;  %v1351_v30 = vadd.f32 %v1350_v10, %v1343_v63  ;;  %v2662_v43 = vld [vmem:[%s5307_s29 + $0x18] sm:$0xff] }
 0x565   : > { %v1503_v10 = vstv %s3970_s23  ;;  %s5371_s23 = sld [smem:[#allocation33_spill]] }
 0x566   : > { %v1266_v22 = vrot.slane %v1265_v15, 2  ;;  %v1272_v58 = vrot.slane %v1271_v21, 2  ;;  %v1346_v8 = vrot.slane %v1345_v4, 2  ;;  %v1352_v45 = vrot.slane %v1351_v30, 2 }
 0x568   : > { %v1267_v0 = vadd.f32 %v1266_v22, %v1265_v15  ;;  %v1273_v16 = vadd.f32 %v1272_v58, %v1271_v21  ;;  %v1347_v54 = vadd.f32 %v1346_v8, %v1345_v4  ;;  %v1353_v34 = vadd.f32 %v1352_v45, %v1351_v30 }
 0x569   : > { %v1596_v15 = vstv %s3974_s25  ;;  %v1691_v21 = vstv %s3976_s30  ;;  %v1783_v4 = vstv %s3978_s8  ;;  %v1867_v30 = vstv %s3982_s10  ;;  %s5372_s25 = sld [smem:[#allocation34_spill]] }
 0x56a   : > { %v1268_v49 = vrot.slane %v1267_v0, 1  ;;  %v1274_v62 = vrot.slane %v1273_v16, 1  ;;  %v1348_v42 = vrot.slane %v1347_v54, 1  ;;  %v1354_v26 = vrot.slane %v1353_v34, 1  ;;  %s4154_s30 = sld [smem:[#allocation9 + $0x3c]] }
 0x56b   : > { %v1959_v22 = vstv %s3986_s11  ;;  %v2054_v58 = vstv %s3988_s12  ;;  %v1545_v8 = vstv %s3990_s14  ;;  %v1638_v45 = vstv %s3994_s15  ;;  %s4164_s10 = sld [smem:[#allocation9 + $0x36]] }
 0x56c   : > { %v1269_v13 = vadd.f32 %v1268_v49, %v1267_v0  ;;  %v1275_v36 = vadd.f32 %v1274_v62, %v1273_v16  ;;  %v1349_v57 = vadd.f32 %v1348_v42, %v1347_v54  ;;  %v1355_v59 = vadd.f32 %v1354_v26, %v1353_v34  ;;  %s4170_s12 = sld [smem:[#allocation9 + $0x41]] }
 0x56d   : > { %v1733_v0 = vstv %s3998_s17  ;;  %v1909_v16 = vstv %s4000_s13  ;;  %v2001_v54 = vstv %s4002_s16  ;;  %v2096_v34 = vstv %s4006_s18  ;;  %s4179_s15 = sld [smem:[#allocation9 + $0x3d]] }
 0x56e   : > { %v1276_v40 = vmul.f32 0.125, %v1269_v13  ;;  %v1277_v37 = vmul.f32 0.125, %v1275_v36  ;;  %v1356_v18 = vmul.f32 0.125, %v1349_v57  ;;  %v1357_v53 = vmul.f32 0.125, %v1355_v59  ;;  %s4191_s13 = sld [smem:[#allocation9 + $0x37]] }
 0x56f   : > { %v1527_v62 = vstv %s4012_s0  ;;  %v1620_v42 = vstv %s4014_s2  ;;  %v1715_v26 = vstv %s4018_s4  ;;  %v5215_v13 = vstv %s4022_s5  ;;  %s4206_s18 = sld [smem:[#allocation9 + $0x43]] }
 0x570   : > { %v1278_v27 = vadd.f32 1e-05, %v1276_v40  ;;  %v1279_v61 = vadd.f32 1e-05, %v1277_v37  ;;  %v1358_v14 = vadd.f32 1e-05, %v1356_v18  ;;  %v1891_v36 = vstv %s4024_s6 }
 0x571   : > { %v1359_v17 = vadd.f32 1e-05, %v1357_v53  ;;  %5374 = sst [smem:[#allocation82_spill]] %s4154_s30  ;;  %v1983_v57 = vstv %s4026_s7  ;;  %v2078_v59 = vstv %s5371_s23  ;;  %v1533_v40 = vstv %s5372_s25 }
 0x572   : > { %2635 = vrsqrt.f32 %v1278_v27  ;;  %5377 = sst [smem:[#allocation83_spill]] %s4170_s12 }
 0x573   : > { %2637 = vrsqrt.f32 %v1279_v61  ;;  %5381 = sst [smem:[#allocation86_spill]] %s4179_s15 }
 0x574   : > { %2639 = vrsqrt.f32 %v1358_v14  ;;  %5384 = sst [smem:[#allocation88_spill]] %s4191_s13 }
 0x575   : > { %2641 = vrsqrt.f32 %v1359_v17  ;;  %5387 = sst [smem:[#allocation90_spill]] %s4206_s18 }
 0x576   : > { %s4218_s11 = sld [smem:[#allocation9 + $0x4f]] }
 0x577   : > { %s4230_s14 = sld [smem:[#allocation9 + $0x3e]] }
 0x578   : > { %s4242_s17 = sld [smem:[#allocation9 + $0x44]] }
 0x579   : > { %s4254_s5 = sld [smem:[#allocation9 + $0x51]] }
 0x57a   : > { %s4257_s2 = sld [smem:[#allocation9 + $0x45]] }
 0x57b   : > { %s4270_s8 = sld [smem:[#allocation9 + $0x56]] }
 0x57c   : > { %5389 = sst [smem:[#allocation91_spill]] %s4218_s11 }
 0x57d   : > { %5391 = sst [smem:[#allocation92_spill]] %s4230_s14 }
 0x57e   : > { %5394 = sst [smem:[#allocation93_spill]] %s4242_s17 }
 0x57f   : > { %v2636_v33 = vpop.eup %2635  ;;  %5402 = sst [smem:[#allocation97_spill]] %s4254_s5 }
 0x580   : > { %v2638_v29 = vpop.eup %2637  ;;  %v1282_v2 = vmul.f32 %v2636_v33, %v1260_v24  ;;  %5404 = sst [smem:[#allocation98_spill]] %s4257_s2 }
 0x581   : > { %v2640_v47 = vpop.eup %2639  ;;  %v1283_v41 = vmul.f32 %v2638_v29, %v1261_v51  ;;  %v2661_v51 = vld [vmem:[%s5307_s29 + $0x10] sm:$0xff]  ;;  %s4036_s29 = sld [smem:[#allocation9 + $0x39]] }
 0x582   : > { %v2642_v3 = vpop.eup %2641  ;;  %vm1284_vm10 = vcmp.ge.f32.partialorder %v1282_v2, 0.0  ;;  %v1286_v9 = vmul.f32 0.2, %v1282_v2  ;;  %v1362_v23 = vmul.f32 %v2640_v47, %v1340_v25  ;;  %5413 = sst [smem:[#allocation102_spill]] %s4270_s8 }
 0x583   : > { %vm1285_vm11 = vcmp.ge.f32.partialorder %v1283_v41, 0.0  ;;  %v1287_v35 = vmul.f32 0.2, %v1283_v41  ;;  %v1363_v11 = vmul.f32 %v2642_v3, %v1341_v52  ;;  %s4289_s12 = sld [smem:[#allocation9 + $0x58]] }
 0x584   : > { %v1288_v1 = vsel %vm1284_vm10, %v1282_v2, %v1286_v9  ;;  %vm1364_vm14 = vcmp.ge.f32.partialorder %v1362_v23, 0.0  ;;  %v1366_v44 = vmul.f32 0.2, %v1362_v23  ;;  %vm1382_vm10 = vcmp.lt.s32.totalorder %v5287_v32, 3  ;;  %s5424_s23 = sld [smem:[#allocation63_spill]] }
 0x585   : > { %v1289_v31 = vsel %vm1285_vm11, %v1283_v41, %v1287_v35  ;;  %v3929_v19 = vadd.f32 %v2659_v5, %v1288_v1  ;;  %vm1365_vm15 = vcmp.ge.f32.partialorder %v1363_v11, 0.0  ;;  %v1367_v48 = vmul.f32 0.2, %v1363_v11  ;;  %s4295_s7 = sld [smem:[#allocation9 + $0x5d]] }
 0x586   : > { %v3932_v56 = vadd.f32 %v2660_v28, %v1289_v31  ;;  %v1368_v6 = vsel %vm1364_vm14, %v1362_v23, %v1366_v44  ;;  %vm1385_vm11 = vcmp.ge.s32.totalorder %v5293_v7, 3  ;;  %vm1386_vm14 = vcmp.ge.s32.totalorder %v5294_v12, 3  ;;  %s4303_s2 = sld [smem:[#allocation9 + $0x53]] }
 0x587   : > { %5308 = vst [vmem:[#allocation19_spill] sm:$0xff] %v3929_v19  ;;  %v1369_v24 = vsel %vm1365_vm15, %v1363_v11, %v1367_v48  ;;  %v3935_v25 = vadd.f32 %v2661_v51, %v1368_v6  ;;  %5323 = sst [smem:[#allocation35_spill]] %s4036_s29  ;;  %vm1393_vm15 = vcmp.lt.s32.totalorder %v5287_v32, 2 }
 0x588   : > { %5309 = vst [vmem:[#allocation21_spill] sm:$0xff] %v3932_v56  ;;  %v3938_v55 = vadd.f32 %v2662_v43, %v1369_v24  ;;  %s4056_s29 = sld [smem:[#allocation9 + $0xe]] }
 0x589   : > { %5310 = vst [vmem:[#allocation22_spill] sm:$0xff] %v3935_v25  ;;  %v3942_v52 = vmax.f32 %v3929_v19, %v3935_v25  ;;  %v1372_v39 = vadd.f32 %v3935_v25, %v3929_v19  ;;  %s5373_s3 = sld [smem:[#allocation35_spill]] }
 0x58a   : > { %5311 = vst [vmem:[#allocation24_spill] sm:$0xff] %v3938_v55  ;;  %v3946_v46 = vmax.f32 %v3932_v56, %v3938_v55  ;;  %v1373_v63 = vadd.f32 %v3938_v55, %v3932_v56  ;;  %s4310_s14 = sld [smem:[#allocation9 + $0x59]] }
 0x58b   : > { %5312 = vst [vmem:[#allocation25_spill] sm:$0xff] %v3942_v52  ;;  %1438 = vrot.lane.b32.xlu0 %v3942_v52, %s2787_s20  ;;  %v3958_v38 = vmul.f32 0.5, %v1372_v39  ;;  %v4177_v53 = vmul.f32 %v1545_v8, %v3942_v52  ;;  %v4182_v27 = vmul.f32 %v1638_v45, %v3942_v52  ;;  %v4249_v43 = vmul.f32 %v1733_v0, %v3942_v52  ;;  %5426 = sst [smem:[#allocation63_spill]] %s4295_s7 }
 0x58c   : > { %5313 = vst [vmem:[#allocation26_spill] sm:$0xff] %v3946_v46  ;;  %1440 = vrot.lane.b32.xlu1 %v3946_v46, %s2787_s20  ;;  %v3956_v60 = vmul.f32 0.5, %v1373_v63  ;;  %v4174_v18 = vmul.f32 %v1545_v8, %v3946_v46  ;;  %v4194_v33 = vmul.f32 %v1638_v45, %v3946_v46  ;;  %v4246_v51 = vmul.f32 %v1733_v0, %v3946_v46  ;;  %s4316_s8 = sld [smem:[#allocation9 + $0x5f]] }
 0x58d   : > { %5380 = vst [vmem:[#allocation85_spill] sm:$0xff] %v4177_v53  ;;  %5382 = vst [vmem:[#allocation87_spill] sm:$0xff] %v4182_v27  ;;  %v4186_v14 = vmul.f32 %v1503_v10, %v3958_v38  ;;  %v4189_v17 = vmul.f32 %v1596_v15, %v3958_v38  ;;  %v4204_v41 = vmul.f32 %v1691_v21, %v3958_v38  ;;  %s5437_s15 = sld [smem:[#allocation79_spill]] }
 0x58e   : > { %5332 = sst [smem:[#allocation43_spill]] %s4056_s29  ;;  %5379 = vst [vmem:[#allocation84_spill] sm:$0xff] %v4174_v18  ;;  %5385 = vst [vmem:[#allocation89_spill] sm:$0xff] %v4194_v33  ;;  %v4198_v2 = vmul.f32 %v1503_v10, %v3956_v60  ;;  %v4201_v47 = vmul.f32 %v1596_v15, %v3956_v60  ;;  %v4210_v9 = vmul.f32 %v1691_v21, %v3956_v60 }
 0x58f   : > { %1446 = vrot.lane.b32.xlu0 %v3942_v52, %s2788_s21  ;;  %s4078_s29 = sld [smem:[#allocation9 + $0x2b]]  ;;  %v1626_v37 = vstv %s5373_s3  ;;  %v4213_v23 = vmul.f32 %v1783_v4, %v3956_v60  ;;  %v4216_v35 = vmul.f32 %v1867_v30, %v3956_v60  ;;  %v4222_v1 = vmul.f32 %v1959_v22, %v3956_v60  ;;  %5396 = vst [vmem:[#allocation94_spill] sm:$0xff] %v4246_v51 }
 0x590   : > { %1448 = vrot.lane.b32.xlu1 %v3946_v46, %s2788_s21  ;;  %v4225_v44 = vmul.f32 %v2054_v58, %v3956_v60  ;;  %v4228_v31 = vmul.f32 %v1783_v4, %v3958_v38  ;;  %v4234_v48 = vmul.f32 %v1867_v30, %v3958_v38  ;;  %v4237_v28 = vmul.f32 %v1959_v22, %v3958_v38  ;;  %s4283_s3 = sld [smem:[#allocation9 + $0x52]] }
 0x591   : > { %v4240_v6 = vmul.f32 %v2054_v58, %v3958_v38  ;;  %5398 = vst [vmem:[#allocation95_spill] sm:$0xff] %v4249_v43  ;;  %v4252_v63 = vmul.f32 %v1909_v16, %v3946_v46  ;;  %v4266_v10 = vmul.f32 %v2001_v54, %v3942_v52  ;;  %v4273_v4 = vmul.f32 %v2096_v34, %v3946_v46  ;;  %5438 = sst [smem:[#allocation79_spill]] %s4322_s24 }
 0x592   : > { %v4276_v30 = vmul.f32 %v2096_v34, %v3942_v52  ;;  %s5440_s6 = sld [smem:[#allocation81_spill]] }
 0x593   : > { %1380 = vrot.lane.b32.xlu0 %v3956_v60, %s2787_s20  ;;  %5400 = vst [vmem:[#allocation96_spill] sm:$0xff] %v4252_v63  ;;  %5410 = vst [vmem:[#allocation101_spill] sm:$0xff] %v4266_v10  ;;  %s5441_s11 = sld [smem:[#allocation86_spill]] }
 0x594   : > { %1378 = vrot.lane.b32.xlu1 %v3958_v38, %s2787_s20  ;;  %s4038_s20 = sld [smem:[#allocation9 + $0x40]]  ;;  %5415 = vst [vmem:[#allocation103_spill] sm:$0xff] %v4273_v4  ;;  %5417 = vst [vmem:[#allocation104_spill] sm:$0xff] %v4276_v30 }
 0x595   : > { %5343 = sst [smem:[#allocation54_spill]] %s4078_s29 }
 0x596   : > { %s4100_s29 = sld [smem:[#allocation9 + $0x19]] }
 0x597   : > { %1400 = vrot.lane.b32.xlu0 %v3958_v38, %s5291_s26  ;;  %s5442_s0 = sld [smem:[#allocation83_spill]] }
 0x598   : > { %1389 = vrot.lane.b32.xlu1 %v3958_v38, %s2788_s21  ;;  %s4336_s18 = sld [smem:[#allocation9 + $0x61]] }
 0x599   : > { %s5444_s4 = sld [smem:[#allocation88_spill]] }
 0x59a   : > { %5324 = sst [smem:[#allocation36_spill]] %s4038_s20 }
 0x59b   : > { %1408 = vrot.lane.b32.xlu0 %v3958_v38, %s5292_s27  ;;  %s4058_s20 = sld [smem:[#allocation9 + $0x15]] }
 0x59c   : > { %1391 = vrot.lane.b32.xlu1 %v3956_v60, %s2788_s21  ;;  %s4044_s21 = sld [smem:[#allocation9 + $0x4e]] }
 0x59d   : > { %5353 = sst [smem:[#allocation64_spill]] %s4100_s29 }
 0x59e   : > { %5443 = sst [smem:[#allocation81_spill]] %s4336_s18 }
 0x59f   : > { %1416 = vrot.lane.b32.xlu0 %v3958_v38, %s2789_s22  ;;  %s5445_s7 = sld [smem:[#allocation92_spill]] }
 0x5a0   : > { %1402 = vrot.lane.b32.xlu1 %v3956_v60, %s5291_s26  ;;  %s5448_s17 = sld [smem:[#allocation93_spill]] }
 0x5a1   : > { %5333 = sst [smem:[#allocation44_spill]] %s4058_s20 }
 0x5a2   : > { %5326 = sst [smem:[#allocation38_spill]] %s4044_s21 }
 0x5a3   : > { %1427 = vrot.lane.b32.xlu0 %v3958_v38, %s5127_s9  ;;  %s4064_s21 = sld [smem:[#allocation9 + $0x2a]]  ;;  %v4263_v38 = vmul.f32 %v2001_v54, %v3946_v46 }
 0x5a4   : > { %1410 = vrot.lane.b32.xlu1 %v3956_v60, %s5292_s27  ;;  %s4080_s20 = sld [smem:[#allocation9 + $0x2]] }
 0x5a5   : > { %5408 = vst [vmem:[#allocation100_spill] sm:$0xff] %v4263_v38  ;;  %s4342_s16 = sld [smem:[#allocation9 + $0x4a]] }
 0x5a6   : > { %s5472_s5 = sld [smem:[#allocation36_spill]] }
 0x5a7   : > { %1454 = vrot.lane.b32.xlu0 %v3942_v52, %s5291_s26  ;;  %s5475_s25 = sld [smem:[#allocation38_spill]] }
 0x5a8   : > { %1418 = vrot.lane.b32.xlu1 %v3956_v60, %s2789_s22  ;;  %s5487_s29 = sld [smem:[#allocation43_spill]] }
 0x5a9   : > { %5336 = sst [smem:[#allocation47_spill]] %s4064_s21 }
 0x5aa   : > { %5344 = sst [smem:[#allocation55_spill]] %s4080_s20 }
 0x5ab   : > { %1462 = vrot.lane.b32.xlu0 %v3942_v52, %s5292_s27  ;;  %s4086_s21 = sld [smem:[#allocation9 + $0x17]] }
 0x5ac   : > { %1429 = vrot.lane.b32.xlu1 %v3956_v60, %s5127_s9  ;;  %s4102_s20 = sld [smem:[#allocation9 + $0x20]]  ;;  %v4260_v60 = vmul.f32 %v1909_v16, %v3942_v52  ;;  %v5489_v55 = vstv %s5472_s5 }
 0x5ad   : > { %5449 = sst [smem:[#allocation86_spill]] %s4342_s16  ;;  %v5491_v56 = vmov %v5489_v55  ;;  %v5493_v19 = vstv %s5475_s25 }
 0x5ae   : > { %5406 = vst [vmem:[#allocation99_spill] sm:$0xff] %v4260_v60  ;;  %s5477_s16 = sld [smem:[#allocation39_spill]] }
 0x5af   : > { %1470 = vrot.lane.b32.xlu0 %v3942_v52, %s2789_s22  ;;  %s5494_s24 = sld [smem:[#allocation44_spill]] }
 0x5b0   : > { %1456 = vrot.lane.b32.xlu1 %v3946_v46, %s5291_s26  ;;  %s4040_s26 = sld [smem:[#allocation9 + $0x47]] }
 0x5b1   : > { %s5506_s5 = sld [smem:[#allocation48_spill]] }
 0x5b2   : > { %5354 = sst [smem:[#allocation65_spill]] %s4102_s20 }
 0x5b3   : > { %1478 = vrot.lane.b32.xlu0 %v3942_v52, %s5127_s9  ;;  %s4050_s9 = sld [smem:[#allocation9]] }
 0x5b4   : > { %1464 = vrot.lane.b32.xlu1 %v3946_v46, %s5292_s27  ;;  %s5330_s27 = smov 125   ;;  %s4118_s20 = sld [smem:[#allocation9 + $0x28]] }
 0x5b5   : > { %s5512_s25 = sld [smem:[#allocation51_spill]] }
 0x5b6   : > { %5325 = sst [smem:[#allocation37_spill]] %s4040_s26 }
 0x5b7   : > { %s4060_s26 = sld [smem:[#allocation9 + $0x1c]] }
 0x5b8   : > { %1472 = vrot.lane.b32.xlu1 %v3946_v46, %s2789_s22  ;;  %s4062_s22 = sld [smem:[#allocation9 + $0x23]] }
 0x5b9   : > { %5329 = sst [smem:[#allocation41_spill]] %s4050_s9 }
 0x5ba   : > { %s4070_s9 = sld [smem:[#allocation9 + $0xf]] }
 0x5bb   : > { %5362 = sst [smem:[#allocation73_spill]] %s4118_s20 }
 0x5bc   : > { %1480 = vrot.lane.b32.xlu1 %v3946_v46, %s5330_s27  ;;  %s4074_s27 = sld [smem:[#allocation9 + $0x1d]] }
 0x5bd   : > { %5334 = sst [smem:[#allocation45_spill]] %s4060_s26 }
 0x5be   : > { %5335 = sst [smem:[#allocation46_spill]] %s4062_s22 }
 0x5bf   : > { %s4082_s26 = sld [smem:[#allocation9 + $0x9]] }
 0x5c0   : > { %5339 = sst [smem:[#allocation50_spill]] %s4070_s9 }
 0x5c1   : > { %s4084_s22 = sld [smem:[#allocation9 + $0x10]] }
 0x5c2   : > { %5341 = sst [smem:[#allocation52_spill]] %s4074_s27 }
 0x5c3   : > { %s4092_s9 = sld [smem:[#allocation9 + $0x2c]] }
 0x5c4   : > { %s4096_s27 = sld [smem:[#allocation9 + $0xb]] }
 0x5c5   : > { %5345 = sst [smem:[#allocation56_spill]] %s4082_s26 }
 0x5c6   : > { %s4104_s26 = sld [smem:[#allocation9 + $0x27]] }
 0x5c7   : > { %5346 = sst [smem:[#allocation57_spill]] %s4084_s22 }
 0x5c8   : > { %s4106_s22 = sld [smem:[#allocation9 + $0x2e]] }
 0x5c9   : > { %5349 = sst [smem:[#allocation60_spill]] %s4092_s9 }
 0x5ca   : > { %5351 = sst [smem:[#allocation62_spill]] %s4096_s27 }
 0x5cb   : > { %s4112_s9 = sld [smem:[#allocation9 + $0x13]] }
 0x5cc   : > { %5355 = sst [smem:[#allocation66_spill]] %s4104_s26 }
 0x5cd   : > { %s4114_s27 = sld [smem:[#allocation9 + $0x1a]] }
 0x5ce   : > { %5356 = sst [smem:[#allocation67_spill]] %s4106_s22 }
 0x5cf   : > { %s4120_s26 = sld [smem:[#allocation9 + $0x2f]] }
 0x5d0   : > { %s4122_s22 = sld [smem:[#allocation9 + $0x6]] }
 0x5d1   : > { %5359 = sst [smem:[#allocation70_spill]] %s4112_s9 }
 0x5d2   : > { %s4128_s9 = sld [smem:[#allocation9 + $0x1b]] }
 0x5d3   : > { %5360 = sst [smem:[#allocation71_spill]] %s4114_s27 }
 0x5d4   : > { %s4130_s27 = sld [smem:[#allocation9 + $0x22]] }
 0x5d5   : > { %5363 = sst [smem:[#allocation74_spill]] %s4120_s26 }
 0x5d6   : > { %5364 = sst [smem:[#allocation75_spill]] %s4122_s22 }
 0x5d7   : > { %s4134_s20 = sld [smem:[#allocation9 + $0x30]] }
 0x5d8   : > { %5367 = sst [smem:[#allocation78_spill]] %s4128_s9 }
 0x5d9   : > { %s4136_s26 = sld [smem:[#allocation9 + $0x48]] }
 0x5da   : > { %s5421_s13 = sld [smem:[#allocation60_spill]] }
 0x5db   : > { %5422 = sst [smem:[#allocation60_spill]] %s4289_s12 }
 0x5dc   : > { %s5446_s22 = sld [smem:[#allocation90_spill]] }
 0x5dd   : > { %s5458_s9 = sld [smem:[#allocation30_spill]] }
 0x5de   : > { %s5482_s18 = sld [smem:[#allocation41_spill]] }
 0x5df   : > { %5369 = sst [smem:[#allocation80_spill]] %s4136_s26 }
 0x5e0   : > { %s4150_s26 = sld [smem:[#allocation9 + $0x35]] }
 0x5e1   : > { %s5484_s12 = sld [smem:[#allocation42_spill]] }
 0x5e2   : > { %s5503_s30 = sld [smem:[#allocation45_spill]] }
 0x5fd   : > { %v1439_v8 = vpop.permute.xlu0 %1438 }
 0x5fe   : > { %v1441_v34 = vpop.permute.xlu1 %1440 }
 0x5ff   : > { %v1442_v21 = vsel %vm1382_vm10, %v1439_v8, %v1441_v34  ;;  %v1443_v54 = vsel %vm1382_vm10, %v1441_v34, %v1439_v8 }
 0x600   : > { %v1444_v29 = vsel %vm1385_vm11, %v1443_v54, 0.0  ;;  %v4366_v16 = vsel %vm1386_vm14, %v1442_v21, 0.0 }
 0x601   : > { %v1447_v49 = vpop.permute.xlu0 %1446  ;;  %5455 = vst [vmem:[#allocation105_spill] sm:$0xff] %v4366_v16  ;;  %v4382_v0 = vmul.f32 %v1527_v62, %v1444_v29  ;;  %v4387_v15 = vmul.f32 %v1527_v62, %v4366_v16  ;;  %v4398_v45 = vmul.f32 %v1620_v42, %v4366_v16  ;;  %v4402_v22 = vmul.f32 %v1715_v26, %v1444_v29 }
 0x602   : > { %v1449_v58 = vpop.permute.xlu1 %1448  ;;  %v4415_v24 = vmul.f32 %v5215_v13, %v1444_v29  ;;  %v4450_v11 = vmul.f32 %v2078_v59, %v4366_v16 }
 0x603   : > { %v1451_v39 = vsel %vm1393_vm15, %v1449_v58, %v1447_v49  ;;  %v1450_v54 = vsel %vm1393_vm15, %v1447_v49, %v1449_v58  ;;  %5461 = vst [vmem:[#allocation106_spill] sm:$0xff] %v4382_v0  ;;  %v4393_v58 = vmul.f32 %v1620_v42, %v1444_v29  ;;  %5465 = vst [vmem:[#allocation108_spill] sm:$0xff] %v4398_v45 }
 0x604   : > { %5466 = vst [vmem:[#allocation109_spill] sm:$0xff] %v4402_v22  ;;  %v4406_v62 = vsel %vm1396_vm13, %v1451_v39, 0.0  ;;  %v4411_v49 = vmul.f32 %v1715_v26, %v4366_v16  ;;  %5470 = vst [vmem:[#allocation112_spill] sm:$0xff] %v4415_v24  ;;  %v4419_v42 = vmul.f32 %v1891_v36, %v1444_v29  ;;  %v4423_v21 = vsel %vm1397_vm12, %v1450_v54, 0.0 }
 0x605   : > { %v1381_v8 = vpop.permute.xlu0 %1380  ;;  %5464 = vst [vmem:[#allocation107_spill] sm:$0xff] %v4393_v58  ;;  %5468 = vst [vmem:[#allocation110_spill] sm:$0xff] %v4406_v62  ;;  %v4428_v39 = vmul.f32 %v1891_v36, %v4366_v16  ;;  %v4432_v26 = vmul.f32 %v1983_v57, %v1444_v29  ;;  %v4441_v54 = vmul.f32 %v1983_v57, %v4366_v16  ;;  %v5510_v16 = vstv %s5484_s12  ;;  %s5520_s12 = sld [smem:[#allocation47_spill]] }
 0x606   : > { %v1379_v34 = vpop.permute.xlu1 %1378  ;;  %5469 = vst [vmem:[#allocation111_spill] sm:$0xff] %v4411_v49  ;;  %5471 = vst [vmem:[#allocation113_spill] sm:$0xff] %v4419_v42  ;;  %v4445_v36 = vmul.f32 %v2078_v59, %v1444_v29  ;;  %v4455_v3 = vmul.f32 %v1533_v40, %v4406_v62  ;;  %v4460_v57 = vmul.f32 %v1533_v40, %v4423_v21  ;;  %v5513_v10 = vmov %v5510_v16 }
 0x607   : > { %5473 = vst [vmem:[#allocation114_spill] sm:$0xff] %v4423_v21  ;;  %5474 = vst [vmem:[#allocation115_spill] sm:$0xff] %v4428_v39  ;;  %v1383_v13 = vsel %vm1382_vm10, %v1379_v34, %v1381_v8  ;;  %v1384_v5 = vsel %vm1382_vm10, %v1381_v8, %v1379_v34  ;;  %v4465_v29 = vmul.f32 %v1626_v37, %v4406_v62  ;;  %vm1424_vm10 = vcmp.lt.s32.totalorder %v5294_v12, 14 }
 0x608   : > { %5476 = vst [vmem:[#allocation116_spill] sm:$0xff] %v4432_v26  ;;  %5478 = vst [vmem:[#allocation117_spill] sm:$0xff] %v4441_v54  ;;  %v1387_v59 = vsel %vm1385_vm11, %v1384_v5, 0.0  ;;  %v1388_v34 = vsel %vm1386_vm14, %v1383_v13, 0.0  ;;  %v4474_v61 = vmul.f32 %v1626_v37, %v4423_v21  ;;  %v4479_v40 = vmul.f32 %v5489_v55, %v4406_v62 }
 0x609   : > { %5480 = vst [vmem:[#allocation118_spill] sm:$0xff] %v4445_v36  ;;  %5481 = vst [vmem:[#allocation119_spill] sm:$0xff] %v4450_v11  ;;  %v4484_v25 = vmul.f32 %v5491_v56, %v4423_v21  ;;  %v4489_v5 = vmul.f32 %v5493_v19, %v4406_v62  ;;  %v5496_v13 = vmov %v5493_v19  ;;  %v5498_v37 = vstv %s5477_s16  ;;  %s5511_s16 = sld [smem:[#allocation49_spill]]  ;;  %v1401_v39 = vpop.permute.xlu0 %1400 }
 0x60a   : > { %5483 = vst [vmem:[#allocation120_spill] sm:$0xff] %v4455_v3  ;;  %v1390_v8 = vpop.permute.xlu1 %1389  ;;  %5485 = vst [vmem:[#allocation121_spill] sm:$0xff] %v4460_v57  ;;  %v4494_v20 = vmul.f32 %v5496_v13, %v4423_v21  ;;  %v4499_v50 = vmul.f32 %v5498_v37, %v4406_v62  ;;  %v5500_v55 = vmov %v5498_v37  ;;  %v5502_v56 = vstv %s5479_s1  ;;  %s5515_s1 = sld [smem:[#allocation46_spill]] }
 0x60b   : > { %5486 = vst [vmem:[#allocation122_spill] sm:$0xff] %v4465_v29  ;;  %5488 = vst [vmem:[#allocation123_spill] sm:$0xff] %v4474_v61  ;;  %v4504_v52 = vmul.f32 %v5500_v55, %v4423_v21  ;;  %v4509_v46 = vmul.f32 %v5502_v56, %v4406_v62  ;;  %v5505_v19 = vmov %v5502_v56  ;;  %v5508_v13 = vstv %s5482_s18  ;;  %s5518_s18 = sld [smem:[#allocation50_spill]] }
 0x60c   : > { %5490 = vst [vmem:[#allocation124_spill] sm:$0xff] %v4479_v40  ;;  %5492 = vst [vmem:[#allocation125_spill] sm:$0xff] %v4484_v25  ;;  %v4514_v24 = vmul.f32 %v5505_v19, %v4423_v21  ;;  %v1488_v30 = vmul.f32 %v5508_v13, %v1387_v59  ;;  %v5509_v37 = vmov %v5508_v13  ;;  %v1581_v55 = vmul.f32 %v5510_v16, %v1387_v59 }
 0x60d   : > { %5495 = vst [vmem:[#allocation126_spill] sm:$0xff] %v4489_v5  ;;  %5497 = vst [vmem:[#allocation127_spill] sm:$0xff] %v4494_v20  ;;  %v1489_v4 = vmul.f32 %v5509_v37, %v1388_v34  ;;  %v1582_v56 = vmul.f32 %v5513_v10, %v1388_v34  ;;  %v5514_v62 = vstv %s5487_s29  ;;  %v5526_v5 = vstv %s5512_s25  ;;  %s5527_s29 = sld [smem:[#allocation52_spill]] }
 0x60e   : > { %5499 = vst [vmem:[#allocation128_spill] sm:$0xff] %v4499_v50  ;;  %5501 = vst [vmem:[#allocation129_spill] sm:$0xff] %v4504_v52  ;;  %v1392_v36 = vpop.permute.xlu1 %1391  ;;  %v5516_v21 = vmov %v5514_v62  ;;  %v5521_v50 = vstv %s5503_s30  ;;  %v5528_v42 = vmov %v5526_v5  ;;  %s5536_s30 = sld [smem:[#allocation54_spill]]  ;;  %vm1431_vm11 = vcmp.lt.s32.totalorder %v5287_v32, 125 }
 0x60f   : > { %5504 = vst [vmem:[#allocation130_spill] sm:$0xff] %v4509_v46  ;;  %5507 = vst [vmem:[#allocation131_spill] sm:$0xff] %v4514_v24  ;;  %v1676_v46 = vmul.f32 %v5514_v62, %v1387_v59  ;;  %v1394_v19 = vsel %vm1393_vm15, %v1390_v8, %v1392_v36  ;;  %v1395_v13 = vsel %vm1393_vm15, %v1392_v36, %v1390_v8  ;;  %v5517_v24 = vstv %s5494_s24  ;;  %s5534_s24 = sld [smem:[#allocation53_spill]] }
 0x610   : > { %v1677_v37 = vmul.f32 %v5516_v21, %v1388_v34  ;;  %v1768_v16 = vmul.f32 %v5517_v24, %v1387_v59  ;;  %v1398_v38 = vsel %vm1396_vm13, %v1395_v13, 0.0  ;;  %v1399_v10 = vsel %vm1397_vm12, %v1394_v19, 0.0  ;;  %s5544_s25 = sld [smem:[#allocation57_spill]] }
 0x611   : > { %v5519_v62 = vmov %v5517_v24  ;;  %v1852_v60 = vmul.f32 %v5521_v50, %v1387_v59  ;;  %v5522_v36 = vstv %s5506_s5  ;;  %v5524_v52 = vmov %v5521_v50  ;;  %s5540_s5 = sld [smem:[#allocation55_spill]] }
 0x612   : > { %v1769_v11 = vmul.f32 %v5519_v62, %v1388_v34  ;;  %v1492_v8 = vmul.f32 %v5522_v36, %v1398_v38  ;;  %v5523_v26 = vmov %v5522_v36  ;;  %v1853_v24 = vmul.f32 %v5524_v52, %v1388_v34  ;;  %v1403_v19 = vpop.permute.xlu1 %1402 }
 0x613   : > { %v1493_v21 = vmul.f32 %v5523_v26, %v1399_v10  ;;  %v5525_v63 = vstv %s5511_s16  ;;  %v1772_v13 = vmul.f32 %v5526_v5, %v1398_v38  ;;  %v1773_v20 = vmul.f32 %v5528_v42, %v1399_v10  ;;  %s5541_s16 = sld [smem:[#allocation56_spill]] }
 0x614   : > { %v1585_v54 = vmul.f32 %v5525_v63, %v1398_v38  ;;  %v5529_v43 = vstv %s5515_s1  ;;  %v5530_v50 = vmov %v5525_v63  ;;  %v5531_v36 = vstv %s5518_s18  ;;  %s5549_s1 = sld [smem:[#allocation58_spill]] }
 0x615   : > { %v1944_v62 = vmul.f32 %v5529_v43, %v1387_v59  ;;  %v1586_v51 = vmul.f32 %v5530_v50, %v1399_v10  ;;  %v1680_v40 = vmul.f32 %v5531_v36, %v1398_v38  ;;  %v5532_v27 = vmov %v5531_v36  ;;  %s5550_s18 = sld [smem:[#allocation59_spill]] }
 0x616   : > { %v1681_v26 = vmul.f32 %v5532_v27, %v1399_v10  ;;  %v5533_v22 = vmov %v5529_v43  ;;  %v5535_v63 = vstv %s5520_s12  ;;  %v1774_v5 = vadd.f32 %v1772_v13, %v1768_v16  ;;  %s5566_s12 = sld [smem:[#allocation64_spill]] }
 0x617   : > { %v1945_v52 = vmul.f32 %v5533_v22, %v1388_v34  ;;  %v2039_v25 = vmul.f32 %v5535_v63, %v1387_v59  ;;  %v1775_v42 = vadd.f32 %v1773_v20, %v1769_v11  ;;  %v5537_v33 = vmov %v5535_v63 }
 0x618   : > { %v2040_v49 = vmul.f32 %v5537_v33, %v1388_v34  ;;  %v1494_v53 = vadd.f32 %v1492_v8, %v1488_v30  ;;  %v1495_v43 = vadd.f32 %v1493_v21, %v1489_v4  ;;  %v5538_v29 = vstv %s5527_s29  ;;  %s5569_s29 = sld [smem:[#allocation65_spill]] }
 0x619   : > { %v1856_v18 = vmul.f32 %v5538_v29, %v1398_v38  ;;  %v1587_v50 = vadd.f32 %v1585_v54, %v1581_v55  ;;  %v5539_v36 = vmov %v5538_v29  ;;  %v1404_v22 = vsel %vm372_vm1, %v1401_v39, %v1403_v19  ;;  %v1411_v54 = vpop.permute.xlu1 %1410 }
 0x61a   : > { %v1857_v27 = vmul.f32 %v5539_v36, %v1399_v10  ;;  %v1405_v59 = vsel %vm372_vm1, %v1403_v19, %v1401_v39  ;;  %v1588_v20 = vadd.f32 %v1586_v51, %v1582_v56  ;;  %v1682_v33 = vadd.f32 %v1680_v40, %v1676_v46  ;;  %v1409_v39 = vpop.permute.xlu0 %1408 }
 0x61b   : > { %v1683_v11 = vadd.f32 %v1681_v26, %v1677_v37  ;;  %v5542_v4 = vstv %s5534_s24  ;;  %v5545_v55 = vstv %s5536_s30  ;;  %v1406_v8 = vsel %vm375_vm4, %v1405_v59, 0.0  ;;  %s5572_s24 = sld [smem:[#allocation66_spill]] }
 0x61c   : > { %v1948_v30 = vmul.f32 %v5542_v4, %v1398_v38  ;;  %v5543_v29 = vmov %v5542_v4  ;;  %v2043_v16 = vmul.f32 %v5545_v55, %v1398_v38  ;;  %v1407_v51 = vsel %vm376_vm5, %v1404_v22, 0.0  ;;  %s5576_s30 = sld [smem:[#allocation67_spill]] }
 0x61d   : > { %v1949_v34 = vmul.f32 %v5543_v29, %v1399_v10  ;;  %v1858_v46 = vadd.f32 %v1856_v18, %v1852_v60  ;;  %v5546_v40 = vmov %v5545_v55  ;;  %v5547_v37 = vstv %s5540_s5  ;;  %s5582_s5 = sld [smem:[#allocation71_spill]] }
 0x61e   : > { %v2044_v56 = vmul.f32 %v5546_v40, %v1399_v10  ;;  %v1499_v21 = vmul.f32 %v5547_v37, %v1407_v51  ;;  %v5548_v13 = vstv %s5541_s16  ;;  %v1859_v26 = vadd.f32 %v1857_v27, %v1853_v24  ;;  %s5584_s16 = sld [smem:[#allocation69_spill]] }
 0x61f   : > { %v1592_v19 = vmul.f32 %v5548_v13, %v1407_v51  ;;  %v5551_v63 = vmov %v5547_v37  ;;  %v5552_v38 = vstv %s4086_s21  ;;  %v1950_v55 = vadd.f32 %v1948_v30, %v1944_v62  ;;  %v4608_v62 = vpop.permute.xlu1 %1418  ;;  %s5563_s21 = sld [smem:[#allocation61_spill]] }
 0x620   : > { %v1498_v36 = vmul.f32 %v5551_v63, %v1406_v8  ;;  %v1778_v4 = vmul.f32 %v5552_v38, %v1406_v8  ;;  %v5553_v29 = vmov %v5552_v38  ;;  %v5554_v22 = vmov %v5548_v13 }
 0x621   : > { %v1779_v59 = vmul.f32 %v5553_v29, %v1407_v51  ;;  %v1591_v18 = vmul.f32 %v5554_v22, %v1406_v8  ;;  %v5555_v60 = vstv %s5544_s25  ;;  %v1951_v58 = vadd.f32 %v1949_v34, %v1945_v52  ;;  %v4614_v52 = vpop.permute.xlu0 %1416  ;;  %s5585_s25 = sld [smem:[#allocation70_spill]] }
 0x622   : > { %v1686_v10 = vmul.f32 %v5555_v60, %v1406_v8  ;;  %v5556_v40 = vmov %v5555_v60  ;;  %v2045_v61 = vadd.f32 %v2043_v16, %v2039_v25  ;;  %v1780_v13 = vadd.f32 %v1778_v4, %v1774_v5 }
 0x623   : > { %v1687_v37 = vmul.f32 %v5556_v40, %v1407_v51  ;;  %v1781_v24 = vadd.f32 %v1779_v59, %v1775_v42  ;;  %v1501_v27 = vadd.f32 %v1499_v21, %v1495_v43  ;;  %v1594_v63 = vadd.f32 %v1592_v19, %v1588_v20 }
 0x624   : > { %v5557_v38 = vstv %s5549_s1  ;;  %v5558_v29 = vstv %s5550_s18  ;;  %v2046_v30 = vadd.f32 %v2044_v56, %v2040_v49  ;;  %v1500_v22 = vadd.f32 %v1498_v36, %v1494_v53  ;;  %s5587_s1 = sld [smem:[#allocation72_spill]] }
 0x625   : > { %v1863_v3 = vmul.f32 %v5557_v38, %v1407_v51  ;;  %v1955_v45 = vmul.f32 %v5558_v29, %v1407_v51  ;;  %v5559_v57 = vmov %v5557_v38  ;;  %v5560_v0 = vmov %v5558_v29  ;;  %s5590_s18 = sld [smem:[#allocation73_spill]] }
 0x626   : > { %v1862_v60 = vmul.f32 %v5559_v57, %v1406_v8  ;;  %v1954_v40 = vmul.f32 %v5560_v0, %v1406_v8  ;;  %v1593_v25 = vadd.f32 %v1591_v18, %v1587_v50  ;;  %v1688_v5 = vadd.f32 %v1686_v10, %v1682_v33 }
 0x627   : > { %v1689_v42 = vadd.f32 %v1687_v37, %v1683_v11  ;;  %v5561_v43 = vstv %s5421_s13  ;;  %v1865_v20 = vadd.f32 %v1863_v3, %v1859_v26  ;;  %v1957_v16 = vadd.f32 %v1955_v45, %v1951_v58  ;;  %s5564_s13 = sld [smem:[#allocation62_spill]]  ;;  %v1428_v26 = vpop.permute.xlu0 %1427 }
 0x628   : > { %v2050_v34 = vmul.f32 %v5561_v43, %v1407_v51  ;;  %v5562_v21 = vmov %v5561_v43  ;;  %v1787_v4 = vadd.f32 %v4213_v23, %v1781_v24  ;;  %vm1420_vm12 = vcmp.lt.s32.totalorder %v5287_v32, 126 }
 0x629   : > { %v2049_v19 = vmul.f32 %v5562_v21, %v1406_v8  ;;  %v1507_v53 = vadd.f32 %v4198_v2, %v1501_v27  ;;  %v1600_v0 = vadd.f32 %v4201_v47, %v1594_v63  ;;  %v1412_v49 = vsel %vm383_vm0, %v1409_v39, %v1411_v54  ;;  %v1430_v8 = vpop.permute.xlu1 %1429 }
 0x62a   : > { %v1413_v57 = vsel %vm383_vm0, %v1411_v54, %v1409_v39  ;;  %vm1423_vm13 = vcmp.lt.s32.totalorder %v5293_v7, 14  ;;  %v1864_v3 = vadd.f32 %v1862_v60, %v1858_v46  ;;  %v1956_v23 = vadd.f32 %v1954_v40, %v1950_v55 }
 0x62b   : > { %v1414_v45 = vsel %vm386_vm2, %v1412_v49, 0.0  ;;  %v1415_v2 = vsel %vm387_vm3, %v1413_v57, 0.0  ;;  %v2052_v47 = vadd.f32 %v2050_v34, %v2046_v30  ;;  %v1506_v58 = vadd.f32 %v4186_v14, %v1500_v22 }
 0x62c   : > { %v5565_v50 = vstv %s5563_s21  ;;  %v2051_v51 = vadd.f32 %v2049_v19, %v2045_v61  ;;  %v1695_v39 = vadd.f32 %v4210_v9, %v1689_v42  ;;  %v1871_v46 = vadd.f32 %v4216_v35, %v1865_v20  ;;  %s5597_s21 = sld [smem:[#allocation74_spill]] }
 0x62d   : > { %v1510_v33 = vmul.f32 %v5565_v50, %v1414_v45  ;;  %v5567_v11 = vmov %v5565_v50  ;;  %v1963_v56 = vadd.f32 %v4222_v1, %v1957_v16  ;;  %v1599_v36 = vadd.f32 %v4189_v17, %v1593_v25  ;;  %v4671_v20 = vpop.permute.xlu1 %1456 }
 0x62e   : > { %v1511_v54 = vmul.f32 %v5567_v11, %v1415_v2  ;;  %v5568_v59 = vstv %s5564_s13  ;;  %v1786_v10 = vadd.f32 %v4228_v31, %v1780_v13  ;;  %v1694_v61 = vadd.f32 %v4204_v41, %v1688_v5  ;;  %s5601_s13 = sld [smem:[#allocation75_spill]] }
 0x62f   : > { %v1603_v14 = vmul.f32 %v5568_v59, %v1414_v45  ;;  %v5570_v55 = vmov %v5568_v59  ;;  %v5571_v37 = vstv %s5424_s23  ;;  %v5574_v1 = vstv %s5566_s12  ;;  %s5581_s23 = sld [smem:[#allocation68_spill]] }
 0x630   : > { %v1604_v18 = vmul.f32 %v5570_v55, %v1415_v2  ;;  %v1698_v9 = vmul.f32 %v5571_v37, %v1414_v45  ;;  %v5573_v24 = vmov %v5571_v37  ;;  %v1790_v27 = vmul.f32 %v5574_v1, %v1414_v45  ;;  %s5602_s12 = sld [smem:[#allocation76_spill]] }
 0x631   : > { %v1699_v35 = vmul.f32 %v5573_v24, %v1415_v2  ;;  %v2058_v17 = vadd.f32 %v4225_v44, %v2052_v47  ;;  %v1512_v63 = vadd.f32 %v1510_v33, %v1506_v58  ;;  %v1513_v38 = vadd.f32 %v1511_v54, %v1507_v53 }
 0x632   : > { %v5575_v29 = vmov %v5574_v1  ;;  %vm1434_vm14 = vcmp.lt.s32.totalorder %v5293_v7, 13  ;;  %vm1435_vm15 = vcmp.lt.s32.totalorder %v5294_v12, 13  ;;  %v1792_v41 = vadd.f32 %v1790_v27, %v1786_v10 }
 0x633   : > { %v1791_v30 = vmul.f32 %v5575_v29, %v1415_v2  ;;  %v1870_v31 = vadd.f32 %v4234_v48, %v1864_v3  ;;  %v5577_v13 = vstv %s5569_s29  ;;  %v1962_v5 = vadd.f32 %v4237_v28, %v1956_v23  ;;  %v4676_v28 = vpop.permute.xlu0 %1454  ;;  %s5603_s29 = sld [smem:[#allocation78_spill]] }
 0x634   : > { %v1874_v22 = vmul.f32 %v5577_v13, %v1414_v45  ;;  %v5578_v60 = vmov %v5577_v13  ;;  %v5579_v44 = vstv %s5572_s24  ;;  %v1605_v16 = vadd.f32 %v1603_v14, %v1599_v36  ;;  %s5606_s24 = sld [smem:[#allocation77_spill]] }
 0x635   : > { %v1875_v40 = vmul.f32 %v5578_v60, %v1415_v2  ;;  %v1793_v25 = vadd.f32 %v1791_v30, %v1787_v4  ;;  %v1966_v42 = vmul.f32 %v5579_v44, %v1414_v45  ;;  %v5580_v43 = vmov %v5579_v44 }
 0x636   : > { %v1967_v34 = vmul.f32 %v5580_v43, %v1415_v2  ;;  %v1606_v21 = vadd.f32 %v1604_v18, %v1600_v0  ;;  %v1700_v19 = vadd.f32 %v1698_v9, %v1694_v61  ;;  %v1701_v48 = vadd.f32 %v1699_v35, %v1695_v39  ;;  %v1465_v61 = vpop.permute.xlu1 %1464 }
 0x637   : > { %v2057_v53 = vadd.f32 %v4240_v6, %v2051_v51  ;;  %v5583_v49 = vstv %s5576_s30  ;;  %v1421_v57 = vsel %vm1420_vm12, %v4614_v52, %v4608_v62  ;;  %v1422_v0 = vsel %vm1420_vm12, %v4608_v62, %v4614_v52  ;;  %s2793_s30 = smov 96  }
 0x638   : > { %v2061_v4 = vmul.f32 %v5583_v49, %v1414_v45  ;;  %v1876_v3 = vadd.f32 %v1874_v22, %v1870_v31  ;;  %v1877_v23 = vadd.f32 %v1875_v40, %v1871_v46  ;;  %v1425_v6 = vsel %vm1423_vm13, %v1421_v57, 0.0 }
 0x639   : > { %v1426_v45 = vsel %vm1424_vm10, %v1422_v0, 0.0  ;;  %v1968_v47 = vadd.f32 %v1966_v42, %v1962_v5  ;;  %v1969_v58 = vadd.f32 %v1967_v34, %v1963_v56  ;;  %v5586_v50 = vmov %v5583_v49  ;;  %v1463_v5 = vpop.permute.xlu0 %1462 }
 0x63a   : > { %v2062_v33 = vmul.f32 %v5586_v50, %v1415_v2  ;;  %v1432_v11 = vsel %vm1431_vm11, %v1428_v26, %v1430_v8  ;;  %v5588_v54 = vstv %s5581_s23  ;;  %v5591_v39 = vstv %s5582_s5  ;;  %s5721_s23 = sld [smem:[#allocation18_spill]] }
 0x63b   : > { %v1516_v62 = vmul.f32 %v5588_v54, %v1425_v6  ;;  %v5589_v52 = vmov %v5588_v54  ;;  %v1796_v46 = vmul.f32 %v5591_v39, %v1425_v6  ;;  %v5592_v36 = vmov %v5591_v39  ;;  %s2524_s5 = sld [smem:[#allocation9 + $0x62]] }
 0x63c   : > { %v1517_v51 = vmul.f32 %v5589_v52, %v1426_v45  ;;  %v1797_v59 = vmul.f32 %v5592_v36, %v1426_v45  ;;  %v2063_v14 = vadd.f32 %v2061_v4, %v2057_v53  ;;  %v5593_v55 = vstv %s5584_s16  ;;  %s2148_s16 = sld [smem:[#allocation10]] }
 0x63d   : > { %v1609_v18 = vmul.f32 %v5593_v55, %v1425_v6  ;;  %v5594_v56 = vmov %v5593_v55  ;;  %v1433_v2 = vsel %vm1431_vm11, %v1430_v8, %v1428_v26  ;;  %v5595_v37 = vstv %s5585_s25  ;;  %v1471_v55 = vpop.permute.xlu0 %1470  ;;  %s2527_s25 = sld [smem:[#allocation10 + $0x1]] }
 0x63e   : > { %v1610_v10 = vmul.f32 %v5594_v56, %v1426_v45  ;;  %v1704_v9 = vmul.f32 %v5595_v37, %v1425_v6  ;;  %v5596_v24 = vmov %v5595_v37  ;;  %v1798_v1 = vadd.f32 %v1796_v46, %v1792_v41 }
 0x63f   : > { %v1705_v35 = vmul.f32 %v5596_v24, %v1426_v45  ;;  %v1799_v27 = vadd.f32 %v1797_v59, %v1793_v25  ;;  %v2064_v29 = vadd.f32 %v2062_v33, %v2058_v17  ;;  %v5598_v30 = vstv %s5587_s1  ;;  %s2528_s1 = sld [smem:[#allocation10 + $0x2]] }
 0x640   : > { %v1880_v31 = vmul.f32 %v5598_v30, %v1425_v6  ;;  %v5599_v13 = vmov %v5598_v30  ;;  %v5600_v60 = vstv %s5590_s18  ;;  %v1518_v8 = vadd.f32 %v1516_v62, %v1512_v63  ;;  %s2529_s18 = sld [smem:[#allocation10 + $0x3]] }
 0x641   : > { %v1881_v22 = vmul.f32 %v5599_v13, %v1426_v45  ;;  %v1972_v40 = vmul.f32 %v5600_v60, %v1425_v6  ;;  %v1519_v26 = vadd.f32 %v1517_v51, %v1513_v38  ;;  %v1436_v44 = vsel %vm1434_vm14, %v1432_v11, 0.0 }
 0x642   : > { %v1437_v17 = vsel %vm1435_vm15, %v1433_v2, 0.0  ;;  %v1611_v41 = vadd.f32 %v1609_v18, %v1605_v16  ;;  %v1612_v25 = vadd.f32 %v1610_v10, %v1606_v21  ;;  %v5604_v42 = vmov %v5600_v60  ;;  %v1473_v21 = vpop.permute.xlu1 %1472 }
 0x643   : > { %v1973_v43 = vmul.f32 %v5604_v42, %v1426_v45  ;;  %v5605_v34 = vstv %s5597_s21  ;;  %v1706_v49 = vadd.f32 %v1704_v9, %v1700_v19  ;;  %v1707_v63 = vadd.f32 %v1705_v35, %v1701_v48  ;;  %s5741_s21 = sld [smem:[#allocation17_spill]] }
 0x644   : > { %v2067_v53 = vmul.f32 %v5605_v34, %v1425_v6  ;;  %v1882_v38 = vadd.f32 %v1880_v31, %v1876_v3  ;;  %v5607_v4 = vmov %v5605_v34  ;;  %v1883_v0 = vadd.f32 %v1881_v22, %v1877_v23 }
 0x645   : > { %v2068_v57 = vmul.f32 %v5607_v4, %v1426_v45  ;;  %v1974_v50 = vadd.f32 %v1972_v40, %v1968_v47  ;;  %v5608_v33 = vstv %s5601_s13  ;;  %v5610_v62 = vstv %s5602_s12 }
 0x646   : > { %v1522_v11 = vmul.f32 %v5608_v33, %v1436_v44  ;;  %v5609_v16 = vmov %v5608_v33  ;;  %v1615_v52 = vmul.f32 %v5610_v62, %v1436_v44  ;;  %v5611_v6 = vmov %v5610_v62 }
 0x647   : > { %v1523_v54 = vmul.f32 %v5609_v16, %v1437_v17  ;;  %v1616_v19 = vmul.f32 %v5611_v6, %v1437_v17  ;;  %v5612_v51 = vstv %s5603_s29  ;;  %v1975_v45 = vadd.f32 %v1973_v43, %v1969_v58 }
 0x648   : > { %v1802_v48 = vmul.f32 %v5612_v51, %v1436_v44  ;;  %v5613_v3 = vmov %v5612_v51  ;;  %v2069_v23 = vadd.f32 %v2067_v53, %v2063_v14  ;;  %v5614_v46 = vstv %s5606_s24  ;;  %v5624_v51 = vld [vmem:[#allocation121_spill] sm:$0xff]  ;;  %s5743_s24 = sld [smem:[#allocation139_spill]] }
 0x649   : > { %v1803_v39 = vmul.f32 %v5613_v3, %v1437_v17  ;;  %v1710_v47 = vmul.f32 %v5614_v46, %v1436_v44  ;;  %v5615_v36 = vmov %v5614_v46  ;;  %v5616_v10 = vstv %s4130_s27  ;;  %s5684_s27 = smov 16   ;;  %s5742_s13 = sshll.u32 %s5741_s21, 5 }
 0x64a   : > { %v1711_v59 = vmul.f32 %v5615_v36, %v1437_v17  ;;  %v4744_v18 = vadd.f32 %v1802_v48, %v1798_v1  ;;  %v1886_v2 = vmul.f32 %v5616_v10, %v1436_v44  ;;  %v5617_v37 = vmov %v5616_v10  ;;  %v5630_v36 = vld [vmem:[#allocation120_spill] sm:$0xff] }
 0x64b   : > { %v4746_v56 = vadd.f32 %v1803_v39, %v1799_v27  ;;  %v1887_v9 = vmul.f32 %v5617_v37, %v1437_v17  ;;  %v2070_v24 = vadd.f32 %v2068_v57, %v2064_v29  ;;  %v1524_v35 = vadd.f32 %v1522_v11, %v1518_v8  ;;  %v1481_v29 = vpop.permute.xlu1 %1480 }
 0x64c   : > { %v5618_v30 = vstv %s5437_s15  ;;  %v1525_v13 = vadd.f32 %v1523_v54, %v1519_v26  ;;  %v1617_v22 = vadd.f32 %v1615_v52, %v1611_v41  ;;  %v1618_v60 = vadd.f32 %v1616_v19, %v1612_v25  ;;  %v5623_v19 = vld [vmem:[#allocation106_spill] sm:$0xff]  ;;  %s5706_s15 = smov 112  }
 0x64d   : > { %v1978_v58 = vmul.f32 %v5618_v30, %v1436_v44  ;;  %v5619_v14 = vmov %v5618_v30  ;;  %v1458_v1 = vsel %vm372_vm1, %v4676_v28, %v4671_v20  ;;  %v1712_v27 = vadd.f32 %v1710_v47, %v1706_v49 }
 0x64e   : > { %v1979_v31 = vmul.f32 %v5619_v14, %v1437_v17  ;;  %v1713_v40 = vadd.f32 %v1711_v59, %v1707_v63  ;;  %v5620_v42 = vstv %s4134_s20  ;;  %v4764_v8 = vadd.f32 %v1886_v2, %v1882_v38  ;;  %s5625_s20 = sld [smem:[#allocation82_spill]]  ;;  %v5635_v14 = vld [vmem:[#allocation107_spill] sm:$0xff] }
 0x64f   : > { %v2073_v43 = vmul.f32 %v5620_v42, %v1436_v44  ;;  %v5621_v34 = vmov %v5620_v42  ;;  %v4766_v4 = vadd.f32 %v1887_v9, %v1883_v0  ;;  %v1459_v26 = vsel %vm372_vm1, %v4671_v20, %v4676_v28 }
 0x650   : > { %v2074_v53 = vmul.f32 %v5621_v34, %v1437_v17  ;;  %v1467_v41 = vsel %vm383_vm0, %v1465_v61, %v1463_v5  ;;  %v4774_v25 = vadd.f32 %v1978_v58, %v1974_v50  ;;  %v4776_v49 = vadd.f32 %v1979_v31, %v1975_v45  ;;  %v1479_v17 = vpop.permute.xlu0 %1478 }
 0x651   : > { %v4780_v44 = vsel %vm376_vm5, %v1458_v1, 0.0  ;;  %v1466_v63 = vsel %vm383_vm0, %v1463_v5, %v1465_v61  ;;  %v1474_v38 = vsel %vm1420_vm12, %v1471_v55, %v1473_v21  ;;  %v1475_v20 = vsel %vm1420_vm12, %v1473_v21, %v1471_v55 }
 0x652   : > { %v1482_v28 = vsel %vm1431_vm11, %v1479_v17, %v1481_v29  ;;  %v1483_v57 = vsel %vm1431_vm11, %v1481_v29, %v1479_v17  ;;  %v4792_v0 = vadd.f32 %v2073_v43, %v2069_v23  ;;  %v4794_v50 = vadd.f32 %v2074_v53, %v2070_v24  ;;  %v5628_v23 = vld [vmem:[#allocation108_spill] sm:$0xff]  ;;  %v5633_v24 = vld [vmem:[#allocation123_spill] sm:$0xff]  ;;  %v5639_v29 = vld [vmem:[#allocation84_spill] sm:$0xff] }
 0x653   : > { %v4798_v61 = vsel %vm387_vm3, %v1467_v41, 0.0  ;;  %v4802_v5 = vsel %vm1424_vm10, %v1475_v20, 0.0  ;;  %v4806_v33 = vsel %vm375_vm4, %v1459_v26, 0.0  ;;  %v4810_v11 = vsel %vm386_vm2, %v1466_v63, 0.0  ;;  %v5640_v17 = vld [vmem:[#allocation122_spill] sm:$0xff] }
 0x654   : > { %v4814_v16 = vsel %vm1435_vm15, %v1483_v57, 0.0  ;;  %v1531_v54 = vadd.f32 %v4387_v15, %v1525_v13  ;;  %v4819_v21 = vsel %vm1423_vm13, %v1474_v38, 0.0  ;;  %v4823_v62 = vsel %vm1434_vm14, %v1482_v28, 0.0  ;;  %v5642_v20 = vld [vmem:[#allocation85_spill] sm:$0xff] }
 0x655   : > { %v5622_v52 = vstv %s5440_s6  ;;  %v1530_v12 = vadd.f32 %v5623_v19, %v1524_v35  ;;  %v5626_v15 = vstv %s4150_s26  ;;  %v5627_v39 = vstv %s4164_s10  ;;  %v5645_v19 = vld [vmem:[#allocation111_spill] sm:$0xff]  ;;  %s5660_s6 = sld [smem:[#allocation91_spill]] }
 0x656   : > { %v1541_v6 = vmul.f32 %v5622_v52, %v4780_v44  ;;  %v1537_v48 = vadd.f32 %v5624_v51, %v1531_v54  ;;  %v1553_v3 = vmul.f32 %v5626_v15, %v4798_v61  ;;  %v1559_v45 = vmul.f32 %v5627_v39, %v4802_v5  ;;  %s5672_s26 = sld [smem:[#allocation102_spill]] }
 0x657   : > { %v1624_v7 = vadd.f32 %v5628_v23, %v1618_v60  ;;  %v5629_v46 = vstv %s5444_s4  ;;  %v1536_v59 = vadd.f32 %v5630_v36, %v1530_v12  ;;  %v5631_v55 = vmov %v5622_v52  ;;  %v5648_v36 = vld [vmem:[#allocation125_spill] sm:$0xff]  ;;  %s5653_s4 = sld [smem:[#allocation98_spill]] }
 0x658   : > { %v1565_v47 = vmul.f32 %v5629_v46, %v4814_v16  ;;  %v1540_v10 = vmul.f32 %v5631_v55, %v4806_v33  ;;  %v5632_v2 = vmov %v5626_v15  ;;  %v1543_v9 = vadd.f32 %v1541_v6, %v1537_v48  ;;  %v5646_v48 = vld [vmem:[#allocation89_spill] sm:$0xff]  ;;  %s5685_s10 = sld [smem:[#allocation79_spill]] }
 0x659   : > { %v1552_v37 = vmul.f32 %v5632_v2, %v4810_v11  ;;  %v1630_v35 = vadd.f32 %v5633_v24, %v1624_v7  ;;  %v5634_v30 = vstv %s4146_s28  ;;  %v1623_v31 = vadd.f32 %v5635_v14, %v1617_v22  ;;  %v5650_v2 = vld [vmem:[#allocation109_spill] sm:$0xff]  ;;  %s2791_s28 = smov 48  }
 0x65a   : > { %v1634_v58 = vmul.f32 %v5634_v30, %v4780_v44  ;;  %v1542_v13 = vadd.f32 %v1540_v10, %v1536_v59  ;;  %v5636_v60 = vmov %v5627_v39  ;;  %v5637_v42 = vmov %v5629_v46 }
 0x65b   : > { %v1558_v1 = vmul.f32 %v5636_v60, %v4819_v21  ;;  %v1564_v43 = vmul.f32 %v5637_v42, %v4823_v62  ;;  %v5638_v34 = vstv %s5625_s20  ;;  %v1549_v26 = vadd.f32 %v5639_v29, %v1543_v9  ;;  %s355_s20 = scalar_lea.vmem %s5743_s24, %s5742_s13 }
 0x65c   : > { %v1646_v53 = vmul.f32 %v5638_v34, %v4798_v61  ;;  %v1636_v41 = vadd.f32 %v1634_v58, %v1630_v35  ;;  %v1629_v63 = vadd.f32 %v5640_v17, %v1623_v31  ;;  %v5641_v38 = vmov %v5634_v30  ;;  %v5658_v17 = vld [vmem:[#allocation94_spill] sm:$0xff] }
 0x65d   : > { %v1633_v22 = vmul.f32 %v5641_v38, %v4806_v33  ;;  %v1548_v28 = vadd.f32 %v5642_v20, %v1542_v13  ;;  %v5643_v57 = vstv %s5441_s11  ;;  %v5644_v52 = vstv %s5445_s7  ;;  %s2792_s7 = smov 32   ;;  %s5689_s11 = sld [smem:[#allocation63_spill]] }
 0x65e   : > { %v1652_v54 = vmul.f32 %v5643_v57, %v4802_v5  ;;  %v1658_v6 = vmul.f32 %v5644_v52, %v4814_v16  ;;  %v1719_v12 = vadd.f32 %v5645_v19, %v1713_v40  ;;  %v1555_v51 = vadd.f32 %v1553_v3, %v1549_v26  ;;  %v5651_v3 = vld [vmem:[#allocation87_spill] sm:$0xff] }
 0x65f   : > { %v1642_v15 = vadd.f32 %v5646_v48, %v1636_v41  ;;  %v1635_v39 = vadd.f32 %v1633_v22, %v1629_v63  ;;  %v5647_v23 = vmov %v5638_v34  ;;  %v1554_v46 = vadd.f32 %v1552_v37, %v1548_v28  ;;  %v5654_v37 = vld [vmem:[#allocation124_spill] sm:$0xff]  ;;  %v5665_v48 = vld [vmem:[#allocation95_spill] sm:$0xff] }
 0x660   : > { %v1645_v7 = vmul.f32 %v5647_v23, %v4810_v11  ;;  %v1725_v59 = vadd.f32 %v5648_v36, %v1719_v12  ;;  %v5649_v55 = vstv %s5442_s0  ;;  %v1718_v9 = vadd.f32 %v5650_v2, %v1712_v27  ;;  %s5662_s0 = sld [smem:[#allocation97_spill]] }
 0x661   : > { %v1729_v10 = vmul.f32 %v5649_v55, %v4780_v44  ;;  %v1561_v40 = vadd.f32 %v1559_v45, %v1555_v51  ;;  %v1648_v24 = vadd.f32 %v1646_v53, %v1642_v15  ;;  %v1641_v35 = vadd.f32 %v5651_v3, %v1635_v39 }
 0x662   : > { %v5652_v30 = vmov %v5643_v57  ;;  %v1560_v14 = vadd.f32 %v1558_v1, %v1554_v46  ;;  %v1724_v13 = vadd.f32 %v5654_v37, %v1718_v9  ;;  %v5655_v60 = vmov %v5649_v55  ;;  %v5669_v55 = vld [vmem:[#allocation113_spill] sm:$0xff] }
 0x663   : > { %v1651_v58 = vmul.f32 %v5652_v30, %v4819_v21  ;;  %v1731_v31 = vadd.f32 %v1729_v10, %v1725_v59  ;;  %v1728_v42 = vmul.f32 %v5655_v60, %v4806_v33  ;;  %v1567_v34 = vadd.f32 %v1565_v47, %v1561_v40  ;;  %v5673_v30 = vld [vmem:[#allocation126_spill] sm:$0xff] }
 0x664   : > { %v1647_v29 = vadd.f32 %v1645_v7, %v1641_v35  ;;  %v5656_v27 = vmov %v5644_v52  ;;  %v5657_v53 = vstv %s5446_s22  ;;  %v1566_v41 = vadd.f32 %v1564_v43, %v1560_v14  ;;  %v5664_v43 = vld [vmem:[#allocation115_spill] sm:$0xff]  ;;  %s5678_s22 = sld [smem:[#allocation60_spill]] }
 0x665   : > { %v1657_v45 = vmul.f32 %v5656_v27, %v4823_v62  ;;  %v1741_v26 = vmul.f32 %v5657_v53, %v4798_v61  ;;  %v1737_v63 = vadd.f32 %v5658_v17, %v1731_v31  ;;  %v5659_v1 = vstv %s5448_s17  ;;  %1570 = vrot.lane.b32.xlu1 %v1567_v34, %s2791_s28  ;;  %v5667_v7 = vld [vmem:[#allocation127_spill] sm:$0xff]  ;;  %v5677_v34 = vld [vmem:[#allocation117_spill] sm:$0xff]  ;;  %s5708_s17 = sld [smem:[#allocation81_spill]] }
 0x666   : > { %v1747_v38 = vmul.f32 %v5659_v1, %v4802_v5  ;;  %v1730_v22 = vadd.f32 %v1728_v42, %v1724_v13  ;;  %v1654_v47 = vadd.f32 %v1652_v54, %v1648_v24  ;;  %v5661_v20 = vstv %s5653_s4  ;;  %1568 = vrot.lane.b32.xlu0 %v1566_v41, %s2791_s28 }
 0x667   : > { %v1753_v28 = vmul.f32 %v5661_v20, %v4814_v16  ;;  %v5663_v57 = vmov %v5657_v53  ;;  %v1895_v19 = vadd.f32 %v5664_v43, %v4766_v4  ;;  %v1653_v12 = vadd.f32 %v1651_v58, %v1647_v29 }
 0x668   : > { %v1740_v52 = vmul.f32 %v5663_v57, %v4810_v11  ;;  %v1743_v51 = vadd.f32 %v1741_v26, %v1737_v63  ;;  %v1736_v15 = vadd.f32 %v5665_v48, %v1730_v22  ;;  %v5666_v39 = vmov %v5659_v1  ;;  %v5681_v1 = vld [vmem:[#allocation129_spill] sm:$0xff] }
 0x669   : > { %v1746_v23 = vmul.f32 %v5666_v39, %v4819_v21  ;;  %v1660_v54 = vadd.f32 %v1658_v6, %v1654_v47  ;;  %v1901_v46 = vadd.f32 %v5667_v7, %v1895_v19  ;;  %v5668_v36 = vstv %s5660_s6  ;;  %v5691_v39 = vld [vmem:[#allocation128_spill] sm:$0xff] }
 0x66a   : > { %v1905_v59 = vmul.f32 %v5668_v36, %v4780_v44  ;;  %v1894_v4 = vadd.f32 %v5669_v55, %v4764_v8  ;;  %v1659_v10 = vadd.f32 %v1657_v45, %v1653_v12  ;;  %v1742_v2 = vadd.f32 %v1740_v52, %v1736_v15  ;;  %v5679_v45 = vld [vmem:[#allocation96_spill] sm:$0xff] }
 0x66b   : > { %v5670_v9 = vmov %v5661_v20  ;;  %v5671_v24 = vstv %s5662_s0  ;;  %1663 = vrot.lane.b32.xlu1 %v1660_v54, %s2792_s7  ;;  %v1749_v6 = vadd.f32 %v1747_v38, %v1743_v51  ;;  %v5674_v14 = vmov %v5668_v36  ;;  %v5683_v20 = vld [vmem:[#allocation116_spill] sm:$0xff] }
 0x66c   : > { %v1752_v40 = vmul.f32 %v5670_v9, %v4823_v62  ;;  %v1917_v3 = vmul.f32 %v5671_v24, %v4798_v61  ;;  %v1907_v35 = vadd.f32 %v1905_v59, %v1901_v46  ;;  %v1900_v58 = vadd.f32 %v5673_v30, %v1894_v4  ;;  %1661 = vrot.lane.b32.xlu0 %v1659_v10, %s2792_s7  ;;  %v5694_v4 = vld [vmem:[#allocation119_spill] sm:$0xff] }
 0x66d   : > { %v1904_v31 = vmul.f32 %v5674_v14, %v4806_v33  ;;  %v1748_v8 = vadd.f32 %v1746_v23, %v1742_v2  ;;  %v5675_v37 = vstv %s4283_s3  ;;  %v5676_v60 = vstv %s4303_s2  ;;  %v5695_v2 = vld [vmem:[#allocation100_spill] sm:$0xff]  ;;  %v5698_v14 = vld [vmem:[#allocation131_spill] sm:$0xff]  ;;  %s5700_s3 = sld [smem:[#allocation37_spill]] }
 0x66e   : > { %v1923_v13 = vmul.f32 %v5675_v37, %v4802_v5  ;;  %v1929_v42 = vmul.f32 %v5676_v60, %v4814_v16  ;;  %v1987_v29 = vadd.f32 %v5677_v34, %v4776_v49  ;;  %v1755_v27 = vadd.f32 %v1753_v28, %v1749_v6  ;;  %v5686_v28 = vld [vmem:[#allocation99_spill] sm:$0xff]  ;;  %s4979_s2 = sld [smem:[#allocation9 + $0x4b]] }
 0x66f   : > { %v1913_v53 = vadd.f32 %v5679_v45, %v1907_v35  ;;  %v1906_v26 = vadd.f32 %v1904_v31, %v1900_v58  ;;  %v5680_v41 = vmov %v5671_v24  ;;  %v1754_v63 = vadd.f32 %v1752_v40, %v1748_v8  ;;  %v5704_v45 = vld [vmem:[#allocation105_spill] sm:$0xff] }
 0x670   : > { %v1916_v17 = vmul.f32 %v5680_v41, %v4810_v11  ;;  %v1993_v38 = vadd.f32 %v5681_v1, %v1987_v29  ;;  %v5682_v22 = vstv %s5672_s26  ;;  %v1986_v57 = vadd.f32 %v5683_v20, %v4774_v25  ;;  %1758 = vrot.lane.b32.xlu1 %v1755_v27, %s5684_s27  ;;  %v5703_v27 = vld [vmem:[#allocation118_spill] sm:$0xff] }
 0x671   : > { %v1997_v47 = vmul.f32 %v5682_v22, %v4780_v44  ;;  %v1919_v49 = vadd.f32 %v1917_v3, %v1913_v53  ;;  %v1912_v52 = vadd.f32 %v5686_v28, %v1906_v26  ;;  %v5687_v43 = vmov %v5675_v37  ;;  %1756 = vrot.lane.b32.xlu0 %v1754_v63, %s5684_s27 }
 0x672   : > { %v1922_v19 = vmul.f32 %v5687_v43, %v4819_v21  ;;  %v5688_v12 = vmov %v5676_v60  ;;  %v5690_v15 = vstv %s5678_s22  ;;  %v1992_v23 = vadd.f32 %v5691_v39, %v1986_v57  ;;  %v5713_v43 = vld [vmem:[#allocation103_spill] sm:$0xff] }
 0x673   : > { %v1928_v51 = vmul.f32 %v5688_v12, %v4823_v62  ;;  %v1999_v48 = vadd.f32 %v1997_v47, %v1993_v38  ;;  %v2009_v25 = vmul.f32 %v5690_v15, %v4798_v61  ;;  %v5692_v54 = vmov %v5682_v22  ;;  %v5709_v47 = vld [vmem:[#allocation130_spill] sm:$0xff] }
 0x674   : > { %v1996_v7 = vmul.f32 %v5692_v54, %v4806_v33  ;;  %v1925_v46 = vadd.f32 %v1923_v13, %v1919_v49  ;;  %v1918_v36 = vadd.f32 %v1916_v17, %v1912_v52  ;;  %v5693_v59 = vstv %s4310_s14  ;;  %v5701_v13 = vld [vmem:[#allocation101_spill] sm:$0xff]  ;;  %s4998_s14 = sld [smem:[#allocation9 + $0x4c]] }
 0x675   : > { %v2015_v55 = vmul.f32 %v5693_v59, %v4802_v5  ;;  %v2082_v10 = vadd.f32 %v5694_v4, %v4794_v50  ;;  %v2005_v9 = vadd.f32 %v5695_v2, %v1999_v48  ;;  %v5696_v40 = vstv %s5685_s10  ;;  %v5711_v49 = vld [vmem:[#allocation110_spill] sm:$0xff] }
 0x676   : > { %v2021_v24 = vmul.f32 %v5696_v40, %v4814_v16  ;;  %v1998_v3 = vadd.f32 %v1996_v7, %v1992_v23  ;;  %v5697_v6 = vmov %v5690_v15  ;;  %v1931_v30 = vadd.f32 %v1929_v42, %v1925_v46 }
 0x677   : > { %v2008_v35 = vmul.f32 %v5697_v6, %v4810_v11  ;;  %v1924_v58 = vadd.f32 %v1922_v19, %v1918_v36  ;;  %v2088_v31 = vadd.f32 %v5698_v14, %v2082_v10  ;;  %v5699_v8 = vstv %s5689_s11 }
 0x678   : > { %v2092_v37 = vmul.f32 %v5699_v8, %v4780_v44  ;;  %v2011_v50 = vadd.f32 %v2009_v25, %v2005_v9  ;;  %v2004_v60 = vadd.f32 %v5701_v13, %v1998_v3  ;;  %v5702_v34 = vmov %v5693_v59  ;;  %1934 = vrot.lane.b32.xlu1 %v1931_v30, %s5706_s15  ;;  %v5717_v25 = vld [vmem:[#allocation114_spill] sm:$0xff] }
 0x679   : > { %v2014_v29 = vmul.f32 %v5702_v34, %v4819_v21  ;;  %v2081_v42 = vadd.f32 %v5703_v27, %v4792_v0  ;;  %v5705_v53 = vstv %s5458_s9  ;;  %v1930_v41 = vadd.f32 %v1928_v51, %v1924_v58  ;;  %s5716_s9 = sld [smem:[#allocation80_spill]] }
 0x67a   : > { %v1809_v26 = vmul.f32 %v5705_v53, %v5704_v45  ;;  %v5707_v17 = vmov %v5696_v40  ;;  %v2094_v1 = vadd.f32 %v2092_v37, %v2088_v31  ;;  %v2017_v38 = vadd.f32 %v2015_v55, %v2011_v50  ;;  %v5722_v40 = vld [vmem:[#allocation104_spill] sm:$0xff] }
 0x67b   : > { %v2020_v63 = vmul.f32 %v5707_v17, %v4823_v62  ;;  %v2010_v22 = vadd.f32 %v2008_v35, %v2004_v60  ;;  %v2087_v20 = vadd.f32 %v5709_v47, %v2081_v42  ;;  %v5710_v57 = vmov %v5699_v8  ;;  %1932 = vrot.lane.b32.xlu0 %v1930_v41, %s5706_s15  ;;  %v5724_v35 = vld [vmem:[#allocation112_spill] sm:$0xff]  ;;  %v5731_v17 = vld [vmem:[#allocation25_spill] sm:$0xff] }
 0x67c   : > { %v2091_v0 = vmul.f32 %v5710_v57, %v4806_v33  ;;  %v5712_v28 = vstv %s5700_s3  ;;  %v2100_v19 = vadd.f32 %v5713_v43, %v2094_v1  ;;  %v5714_v12 = vstv %s4316_s8  ;;  %s5727_s8 = sld [smem:[#allocation86_spill]]  ;;  %v5729_v42 = vld [vmem:[#allocation26_spill] sm:$0xff] }
 0x67d   : > { %v1814_v52 = vmul.f32 %v5712_v28, %v5711_v49  ;;  %v2104_v51 = vmul.f32 %v5714_v12, %v4798_v61  ;;  %v5715_v48 = vstv %s4329_s19  ;;  %v5718_v39 = vmov %v5712_v28  ;;  %s2794_s19 = smov 80  }
 0x67e   : > { %v2110_v15 = vmul.f32 %v5715_v48, %v4802_v5  ;;  %v1815_v23 = vmul.f32 %v5718_v39, %v5717_v25  ;;  %v2023_v54 = vadd.f32 %v2021_v24, %v2017_v38  ;;  %v2016_v7 = vadd.f32 %v2014_v29, %v2010_v22 }
 0x67f   : > { %v2093_v46 = vadd.f32 %v2091_v0, %v2087_v20  ;;  %v2106_v36 = vadd.f32 %v2104_v51, %v2100_v19  ;;  %v5719_v59 = vstv %s5708_s17  ;;  %v5720_v4 = vmov %v5714_v12 }
 0x680   : > { %v2116_v55 = vmul.f32 %v5719_v59, %v4814_v16  ;;  %v2103_v10 = vmul.f32 %v5720_v4, %v4810_v11  ;;  %v1811_v2 = vadd.f32 %v1809_v26, %v4746_v56  ;;  %2026 = vrot.lane.b32.xlu1 %v2023_v54, %s2793_s30  ;;  %v2022_v9 = vadd.f32 %v2020_v63, %v2016_v7 }
 0x681   : > { %v2099_v24 = vadd.f32 %v5722_v40, %v2093_v46  ;;  %v5723_v3 = vmov %v5715_v48  ;;  %v1810_v30 = vadd.f32 %v5724_v35, %v4744_v18  ;;  %v5725_v58 = vstv %s5716_s9 }
 0x682   : > { %v2109_v6 = vmul.f32 %v5723_v3, %v4819_v21  ;;  %v1821_v14 = vmul.f32 %v5725_v58, %v4780_v44  ;;  %v2112_v31 = vadd.f32 %v2110_v15, %v2106_v36  ;;  %v1817_v8 = vadd.f32 %v1815_v23, %v1811_v2  ;;  %2024 = vrot.lane.b32.xlu0 %v2022_v9, %s2793_s30 }
 0x683   : > { %v1837_v56 = vstv %s4979_s2  ;;  %v5726_v37 = vmov %v5725_v58  ;;  %v2105_v13 = vadd.f32 %v2103_v10, %v2099_v24  ;;  %v5728_v60 = vmov %v5719_v59 }
 0x684   : > { %v1820_v50 = vmul.f32 %v5726_v37, %v4806_v33  ;;  %v2115_v34 = vmul.f32 %v5728_v60, %v4823_v62  ;;  %v1816_v29 = vadd.f32 %v1814_v52, %v1810_v30  ;;  %v2118_v27 = vadd.f32 %v2116_v55, %v2112_v31 }
 0x685   : > { %v1823_v18 = vadd.f32 %v1821_v14, %v1817_v8  ;;  %v5730_v45 = vstv %s5721_s23  ;;  %v2111_v44 = vadd.f32 %v2109_v6, %v2105_v13  ;;  %v1843_v26 = vstv %s4998_s14  ;;  %v5735_v8 = vld [vmem:[#allocation20_spill] sm:$0xff] }
 0x686   : > { %v1827_v53 = vmul.f32 %v5730_v45, %v5729_v42  ;;  %v1822_v41 = vadd.f32 %v1820_v50, %v1816_v29  ;;  %v5732_v63 = vmov %v5730_v45  ;;  %2121 = vrot.lane.b32.xlu1 %v2118_v27, %s2794_s19  ;;  %v5733_v38 = vstv %s5727_s8 }
 0x687   : > { %v1826_v1 = vmul.f32 %v5732_v63, %v5731_v17  ;;  %v1833_v22 = vmul.f32 %v5733_v38, %v4798_v61  ;;  %v1839_v47 = vmul.f32 %v1837_v56, %v4802_v5  ;;  %v2117_v20 = vadd.f32 %v2115_v34, %v2111_v44 }
 0x688   : > { %v1829_v33 = vadd.f32 %v1827_v53, %v1823_v18  ;;  %v5734_v0 = vmov %v5733_v38  ;;  %v1838_v28 = vmul.f32 %v1837_v56, %v4819_v21  ;;  %v1845_v43 = vmul.f32 %v1843_v26, %v4814_v16 }
 0x689   : > { %v1828_v57 = vadd.f32 %v1826_v1, %v1822_v41  ;;  %v1832_v49 = vmul.f32 %v5734_v0, %v4810_v11  ;;  %2119 = vrot.lane.b32.xlu0 %v2117_v20, %s2794_s19  ;;  %v1844_v12 = vmul.f32 %v1843_v26, %v4823_v62  ;;  %vm1665_vm0 = vcmp.lt.s32.totalorder %v5287_v32, 32 }
 0x68a   : > { %v1835_v52 = vadd.f32 %v1833_v22, %v1829_v33  ;;  %vm1572_vm1 = vcmp.lt.s32.totalorder %v5287_v32, 48  ;;  %vm1668_vm2 = vcmp.ge.s32.totalorder %v5287_v32, 32  ;;  %vm1575_vm3 = vcmp.ge.s32.totalorder %v5287_v32, 48 }
 0x68b   : > { %v1834_v19 = vadd.f32 %v1832_v49, %v1828_v57  ;;  %vm2028_vm4 = vcmp.lt.s32.totalorder %v5287_v32, 96  ;;  %vm2032_vm5 = vcmp.lt.s32.totalorder %v5735_v8, 224  ;;  %v2133_v45 = vstv %s2524_s5 }
 0x68c   : > { %v1841_v51 = vadd.f32 %v1839_v47, %v1835_v52  ;;  %v2153_v49 = vstv %s2148_s16 }
 0x68d   : > { %v1840_v48 = vadd.f32 %v1838_v28, %v1834_v19  ;;  %v2157_v28 = vstv %s2527_s25 }
 0x68e   : > { %v1847_v15 = vadd.f32 %v1845_v43, %v1841_v51  ;;  %v2167_v51 = vstv %s2528_s1 }
 0x68f   : > { %v1846_v61 = vadd.f32 %v1844_v12, %v1840_v48  ;;  %v5736_v48 = vld [vmem:[#allocation23_spill] sm:$0xff] }
 0x6d7   : > { %v1571_v25 = vpop.permute.xlu1 %1570 }
 0x6d8   : > { %v1569_v5 = vpop.permute.xlu0 %1568 }
 0x6d9   : > { %v1574_v21 = vsel %vm1572_vm1, %v1571_v25, %v1569_v5  ;;  %v1573_v10 = vsel %vm1572_vm1, %v1569_v5, %v1571_v25 }
 0x6da   : > { %v1577_v46 = vsel %vm1575_vm3, %v1574_v21, 0.0 }
 0x6dd   : > { %v1664_v39 = vpop.permute.xlu1 %1663 }
 0x6de   : > { %v1662_v23 = vpop.permute.xlu0 %1661 }
 0x6df   : > { %v1667_v11 = vsel %vm1665_vm0, %v1664_v39, %v1662_v23  ;;  %v1666_v59 = vsel %vm1665_vm0, %v1662_v23, %v1664_v39 }
 0x6e0   : > { %v1670_v54 = vsel %vm1668_vm2, %v1667_v11, 0.0  ;;  %v1673_v40 = vadd.f32 %v1666_v59, %v1573_v10 }
 0x6e1   : > { %v1672_v55 = vadd.f32 %v1670_v54, %v1577_v46  ;;  %v2173_v54 = vstv %s2529_s18 }
 0x6e2   : > { %v1759_v16 = vpop.permute.xlu1 %1758 }
 0x6e3   : > { %v1757_v62 = vpop.permute.xlu0 %1756 }
 0x6e4   : > { %v1761_v7 = vsel %vm444_vm6, %v1759_v16, %v1757_v62  ;;  %v1760_v2 = vsel %vm444_vm6, %v1757_v62, %v1759_v16  ;;  %vm2123_vm6 = vcmp.lt.s32.totalorder %v5287_v32, 80 }
 0x6e5   : > { %v1762_v36 = vsel %vm447_vm7, %v1761_v7, 0.0  ;;  %v1765_v3 = vadd.f32 %v1760_v2, %v1673_v40  ;;  %vm2127_vm7 = vcmp.lt.s32.totalorder %v5735_v8, 208  ;;  %v5746_v8 = vld [vmem:[#allocation21_spill] sm:$0xff] }
 0x6e6   : > { %v1764_v9 = vadd.f32 %v1762_v36, %v1672_v55 }
 0x6e7   : > { %v1849_v31 = vadd.f32 %v1847_v15, %v1765_v3 }
 0x6e8   : > { %v1848_v6 = vadd.f32 %v1846_v61, %v1764_v9 }
 0x6ea   : > { %v1935_v4 = vpop.permute.xlu1 %1934 }
 0x6ed   : > { %v1933_v24 = vpop.permute.xlu0 %1932 }
 0x6ee   : > { %v1936_v30 = vsel %vm603_vm8, %v1933_v24, %v1935_v4  ;;  %v1937_v58 = vsel %vm603_vm8, %v1935_v4, %v1933_v24  ;;  %vm5737_vm8 = vcmp.ge.s32.totalorder %v5736_v48, 1 }
 0x6ef   : > { %v1939_v37 = vsel %vm607_vm9, %v1937_v58, 0.0  ;;  %v1940_v50 = vadd.f32 %v1936_v30, %v1848_v6  ;;  %vm5738_vm9 = vcmp.lt.s32.totalorder %v5736_v48, 7  ;;  %vm5739_vm12 = vmmov %vm5737_vm8  ;;  %v5744_v30 = vld [vmem:[#allocation19_spill] sm:$0xff] }
 0x6f0   : > { %v1941_v29 = vadd.f32 %v1939_v37, %v1849_v31  ;;  %vm5740_vm13 = vmmov %vm5738_vm9  ;;  %v5747_v37 = vld [vmem:[#allocation24_spill] sm:$0xff] }
 0x6f2   : > { %v2027_v35 = vpop.permute.xlu1 %2026 }
 0x6f4   : > { %v2025_v14 = vpop.permute.xlu0 %2024 }
 0x6f5   : > { %v2030_v56 = vsel %vm2028_vm4, %v2027_v35, %v2025_v14  ;;  %v2029_v13 = vsel %vm2028_vm4, %v2025_v14, %v2027_v35  ;;  %v5745_v14 = vld [vmem:[#allocation22_spill] sm:$0xff] }
 0x6f6   : > { %v2034_v60 = vsel %vm2032_vm5, %v2030_v56, 0.0  ;;  %v2035_v27 = vadd.f32 %v2029_v13, %v1940_v50 }
 0x6f7   : > { %v2036_v42 = vadd.f32 %v2034_v60, %v1941_v29 }
 0x6f8   : > { %v2122_v34 = vpop.permute.xlu1 %2121 }
 0x6fb   : > { %v2120_v18 = vpop.permute.xlu0 %2119 }
 0x6fc   : > { %v2124_v53 = vsel %vm2123_vm6, %v2120_v18, %v2122_v34  ;;  %v2125_v44 = vsel %vm2123_vm6, %v2122_v34, %v2120_v18 }
 0x6fd   : > { %v2129_v26 = vsel %vm2127_vm7, %v2125_v44, 0.0  ;;  %v2130_v41 = vadd.f32 %v2124_v53, %v2035_v27 }
 0x6fe   : > { %v2131_v17 = vadd.f32 %v2129_v26, %v2036_v42 }
 0x6ff   : > { %v2134_v63 = vadd.f32 %v2133_v45, %v2130_v41 }
 0x700   : > { %v2135_v1 = vadd.f32 %v2133_v45, %v2131_v17 }
 0x701   : > { %v2525_v33 = vmul.f32 -1.442695, %v2134_v63 }
 0x702   : > { %v2526_v38 = vmul.f32 -1.442695, %v2135_v1 }
 0x703   : > { %2643 = vpow2.f32 %v2525_v33 }
 0x704   : > { %2645 = vpow2.f32 %v2526_v38 }
 0x710   : > { %v2644_v22 = vpop.eup %2643 }
 0x711   : > { %v2646_v32 = vpop.eup %2645  ;;  %v2142_v47 = vadd.f32 1.0, %v2644_v22 }
 0x712   : > { %v2143_v20 = vadd.f32 1.0, %v2646_v32 }
 0x713   : > { %2647 = vrcp.f32 %v2142_v47 }
 0x714   : > { %2649 = vrcp.f32 %v2143_v20 }
 0x720   : > { %v2648_v57 = vpop.eup %2647 }
 0x721   : > { %v2650_v0 = vpop.eup %2649  ;;  %v2149_v52 = vrot.slane %v2648_v57, 7  ;;  %v2163_v43 = vrot.slane %v2648_v57, 1  ;;  %v2158_v39 = vmul.f32 %v2648_v57, %v2157_v28 }
 0x722   : > { %v2150_v19 = vrot.slane %v2650_v0, 7  ;;  %v2164_v12 = vrot.slane %v2650_v0, 1  ;;  %v2159_v16 = vmul.f32 %v2650_v0, %v2157_v28 }
 0x723   : > { %v2151_v15 = vsel %vm5737_vm8, %v2149_v52, 0.0  ;;  %v2165_v61 = vsel %vm5738_vm9, %v2163_v43, 0.0 }
 0x724   : > { %v2152_v25 = vsel %vm5739_vm12, %v2150_v19, 0.0  ;;  %v2154_v5 = vmul.f32 %v2153_v49, %v2151_v15  ;;  %v2166_v23 = vsel %vm5740_vm13, %v2164_v12, 0.0  ;;  %v2168_v62 = vmul.f32 %v2167_v51, %v2165_v61 }
 0x725   : > { %v2155_v11 = vmul.f32 %v2153_v49, %v2152_v25  ;;  %v2169_v46 = vmul.f32 %v2167_v51, %v2166_v23 }
 0x726   : > { %v2160_v21 = vadd.f32 %v2158_v39, %v2154_v5 }
 0x727   : > { %v2161_v7 = vadd.f32 %v2159_v16, %v2155_v11 }
 0x728   : > { %v2170_v36 = vadd.f32 %v2168_v62, %v2160_v21 }
 0x729   : > { %v2171_v59 = vadd.f32 %v2169_v46, %v2161_v7 }
 0x72a   : > { %v2174_v55 = vadd.f32 %v2173_v54, %v2170_v36 }
 0x72b   : > { %v2175_v4 = vadd.f32 %v2173_v54, %v2171_v59 }
 0x72c   : > { %v2530_v10 = vmul.f32 -1.442695, %v2174_v55 }
 0x72d   : > { %v2531_v2 = vmul.f32 -1.442695, %v2175_v4 }
 0x72e   : > { %2651 = vpow2.f32 %v2530_v10 }
 0x72f   : > { %2653 = vpow2.f32 %v2531_v2 }
 0x73b   : > { %v2652_v9 = vpop.eup %2651 }
 0x73c   : > { %v2654_v40 = vpop.eup %2653  ;;  %v2182_v24 = vadd.f32 1.0, %v2652_v9 }
 0x73d   : > { %v2183_v3 = vadd.f32 1.0, %v2654_v40 }
 0x73e   : > { %2655 = vrcp.f32 %v2182_v24 }
 0x73f   : > { %2657 = vrcp.f32 %v2183_v3 }
 0x74b   : > { %v2656_v6 = vpop.eup %2655 }
 0x74c   : > { %v2658_v35 = vpop.eup %2657  ;;  %v2188_v58 = vmul.f32 %v2656_v6, %v5744_v30  ;;  %v2190_v31 = vmul.f32 %v2656_v6, %v5745_v14 }
 0x74d   : > { %v2189_v56 = vmul.f32 %v2658_v35, %v5746_v8  ;;  %v2191_v50 = vmul.f32 %v2658_v35, %v5747_v37 }
 0x74e   : > { %2192 = vst [vmem:[%s355_s20] sm:$0xff] %v2188_v58  ;;  %2532 = vst [vmem:[%s355_s20 + $0x10] sm:$0xff] %v2190_v31 }
 0x74f   : > { %2193 = vst [vmem:[%s355_s20 + $0x8] sm:$0xff] %v2189_v56  ;;  %2533 = vst [vmem:[%s355_s20 + $0x18] sm:$0xff] %v2191_v50 }
 0x750 PF: > { %s5748_s4 = sld [smem:[#allocation16_spill]] }
 0x756   : > { %s21_s24 = sadd.s32 1, %s5748_s4  }
 0x757   : > { %p18_p11 = scmp.ge.s32.totalorder %s21_s24, 4  }
 0x759   :  { %20 = sbr.rel (!%p18_p11) target bundleno = 13 (0xd), region = 105 }
 0x75e   :  { %2218 = vsyncpa [#allocation3], 1 }
 0x75f   :  { %2220 = vsyncpa [#allocation3 + $0x1], 1 }
 0x760   :  { %2221 = vsyncpa [#allocation5], 1 }
 0x761   :  { %2222 = vsyncpa [#allocation8], 1 }
 0x762   :  { %2223 = vsyncpa [#allocation11], 1 }

</bundles_post_ra>
